<compile_context>
chip_gen: v5e
topology: v5e:2x2
jax: 0.10.0
libtpu: 0.0.40
codegen_flags: <defaults>
</compile_context>

<pallas_src>
import functools

import jax
import jax.numpy as jnp
from jax.experimental import pallas as pl
from jax.experimental.pallas import tpu as pltpu


_MATMUL_DTYPE = jnp.bfloat16        # MXU datapath dtype (f32 accumulation)
_ACT_DTYPE = jnp.bfloat16           # inter-kernel activation dtype


def _tpu_budget():
    """(vmem_limit_bytes, row_tile_target) tuned per TPU generation."""
    try:
        cap = int(pltpu.get_tpu_info().vmem_capacity_bytes)
    except Exception:               # unknown part / query unsupported
        cap = 0
    if cap >= 100 * 1024 * 1024:    # v5e / v6e: 128 MiB physical VMEM
        return 96 * 1024 * 1024, 512
    if cap > 0:                     # v7x: 64 MiB physical VMEM, 2 TCs
        return 48 * 1024 * 1024, 256
    return 32 * 1024 * 1024, 256    # conservative fallback


_VMEM_LIMIT, _TILE_TARGET = _tpu_budget()


# ----------------------------- Pallas kernels -------------------------------

def _gelu_tanh(x):
    # tanh-approx GELU: the transcendental goes to the EUP slot (free vs VALU).
    # TODO(synk): nn.GELU() is exact erf; tanh approximation deviates by ~1e-3.
    c = 0.7978845608028654  # sqrt(2/pi)
    return 0.5 * x * (1.0 + jnp.tanh(c * (x + 0.044715 * x * x * x)))


def _fused_linear_kernel(*refs, ln, has_bias, has_res, act):
    """[LayerNorm(x)] @ w [+ b] [-> GELU] [+ residual] for one row tile."""
    it = iter(refs)
    x_ref = next(it)
    if ln:
        x = x_ref[...].astype(jnp.float32)            # LN math in f32 on the VPU
        g = next(it)[...].astype(jnp.float32)
        beta = next(it)[...].astype(jnp.float32)
        mean = jnp.mean(x, axis=-1, keepdims=True)
        xc = x - mean
        var = jnp.mean(xc * xc, axis=-1, keepdims=True)
        x = (xc * jax.lax.rsqrt(var + 1e-5) * g + beta).astype(_MATMUL_DTYPE)
    else:
        x = x_ref[...].astype(_MATMUL_DTYPE)          # no redundant f32 pass
    w = next(it)[...].astype(_MATMUL_DTYPE)
    acc = jnp.dot(x, w, preferred_element_type=jnp.float32)
    if has_bias:
        acc = acc + next(it)[...].astype(jnp.float32)  # (1, N) broadcast
    if act == "gelu":
        acc = _gelu_tanh(acc)
    if has_res:
        acc = acc + next(it)[...].astype(jnp.float32)  # fused residual add
    o_ref = refs[-1]
    o_ref[...] = acc.astype(o_ref.dtype)


def _attention_kernel(*refs, heads, head_dim, scale, fused_qkv):
    """All heads of one batch element; q/k/v column blocks selected in-kernel."""
    o_ref = refs[-1]
    inner = heads * head_dim
    if fused_qkv:                       # self-attention: one (1, N, 3*inner) tile
        src = refs[0][0]                # (N, 3*inner), bf16 — no full-tile upcast
        q_all = src[:, :inner]
        kv_src, k_base, v_base = src, inner, 2 * inner
    else:                               # cross-attn: q (1,Nq,inner), kv (1,Nk,2*inner)
        q_all = refs[0][0]
        kv_src, k_base, v_base = refs[1][0], 0, inner
    # scale applied once to q (only the small q slab is touched in f32)
    q_all = (q_all.astype(jnp.float32) * scale).astype(_MATMUL_DTYPE)
    for h in range(heads):              # static unroll over heads
        lo = h * head_dim
        qh = q_all[:, lo:lo + head_dim]
        kh = kv_src[:, k_base + lo:k_base + lo + head_dim].astype(_MATMUL_DTYPE)
        vh = kv_src[:, v_base + lo:v_base + lo + head_dim].astype(_MATMUL_DTYPE)
        # sim = einsum('i d, j d -> i j', q_h, k_h)
        sim = jax.lax.dot_general(qh, kh, (((1,), (1,)), ((), ())),
                                  preferred_element_type=jnp.float32)
        sim = sim - jnp.max(sim, axis=-1, keepdims=True)       # stable softmax (f32)
        p = jnp.exp(sim)
        # TODO(synk): approx reciprocal (EUP) deviates slightly from exact softmax.
        p = p * pl.reciprocal(jnp.sum(p, axis=-1, keepdims=True), approx=True)
        out_h = jnp.dot(p.astype(_MATMUL_DTYPE), vh,
                        preferred_element_type=jnp.float32)
        o_ref[0, :, lo:lo + head_dim] = out_h.astype(o_ref.dtype)   # direct store


# ----------------------------- Pallas wrappers -------------------------------

def _pick_tile(m, target):
    """Multiple-of-8 row tile <= min(target, ceil(m/2)); prefers exact divisors.

    Guarantees >= 2 grid steps whenever m > 8 (keeps both v7x TensorCores busy);
    if no exact divisor exists the grid uses pl.cdiv with a masked tail block.
    """
    if m <= 8:
        return m
    cap = min(target, -(-m // 2))
    cap = max(8, (cap // 8) * 8)
    for t in range(cap, 7, -8):
        if m % t == 0:
            return t
    return cap


def fused_linear(x, w, b=None, *, ln_gb=None, residual=None, act=None,
                 out_dtype=_ACT_DTYPE):
    """[LayerNorm] -> Linear [-> GELU] [+ residual], tiled over rows."""
    shp = x.shape
    K = shp[-1]
    N = w.shape[1]
    x2 = x.reshape(-1, K)
    M = x2.shape[0]
    tm = _pick_tile(M, _TILE_TARGET)
    grid = (pl.cdiv(M, tm),)

    inputs = [x2]
    in_specs = [pl.BlockSpec((tm, K), lambda i: (i, 0))]
    if ln_gb is not None:
        g, beta = ln_gb
        inputs += [g.reshape(1, K), beta.reshape(1, K)]
        in_specs += [pl.BlockSpec((1, K), lambda i: (0, 0)),
                     pl.BlockSpec((1, K), lambda i: (0, 0))]
    inputs.append(w)
    in_specs.append(pl.BlockSpec((K, N), lambda i: (0, 0)))     # resident across grid
    if b is not None:
        inputs.append(b.reshape(1, N))
        in_specs.append(pl.BlockSpec((1, N), lambda i: (0, 0)))
    if residual is not None:
        inputs.append(residual.reshape(-1, N))
        in_specs.append(pl.BlockSpec((tm, N), lambda i: (i, 0)))

    flops = 2 * M * K * N
    trans = M * N if act == "gelu" else 0
    out_isz = jnp.dtype(out_dtype).itemsize
    bytes_accessed = int(x2.size * x2.dtype.itemsize + w.size * w.dtype.itemsize
                         + M * N * out_isz * (2 if residual is not None else 1))

    out = pl.pallas_call(
        functools.partial(_fused_linear_kernel, ln=ln_gb is not None,
                          has_bias=b is not None, has_res=residual is not None,
                          act=act),
        grid=grid,
        in_specs=in_specs,
        out_specs=pl.BlockSpec((tm, N), lambda i: (i, 0)),
        out_shape=jax.ShapeDtypeStruct((M, N), out_dtype),
        compiler_params=pltpu.CompilerParams(
            dimension_semantics=("parallel",), vmem_limit_bytes=_VMEM_LIMIT),
        cost_estimate=pl.CostEstimate(flops=flops, transcendentals=trans,
                                      bytes_accessed=bytes_accessed),
    )(*inputs)
    return out.reshape(shp[:-1] + (N,))


def _attention_call(kern, inputs, in_specs, out_shape, flops, trans, bytes_accessed):
    B = out_shape.shape[0]
    return pl.pallas_call(
        kern,
        grid=(B,),                       # NOTE: keep B >= 2 for v7x dual-core.
        in_specs=in_specs,
        out_specs=pl.BlockSpec((1,) + out_shape.shape[1:], lambda i: (i, 0, 0)),
        out_shape=out_shape,
        compiler_params=pltpu.CompilerParams(
            dimension_semantics=("parallel",), vmem_limit_bytes=_VMEM_LIMIT),
        cost_estimate=pl.CostEstimate(flops=flops, transcendentals=trans,
                                      bytes_accessed=bytes_accessed),
    )(*inputs)


def attention_self(qkv, heads, head_dim):
    """Self-attention core; consumes the fused (B, N, 3*inner) projection directly."""
    B, N, three_inner = qkv.shape
    inner = heads * head_dim
    scale = float(head_dim) ** -0.5
    kern = functools.partial(_attention_kernel, heads=heads, head_dim=head_dim,
                             scale=scale, fused_qkv=True)
    flops = 4 * B * N * N * inner
    bytes_accessed = int(qkv.size * qkv.dtype.itemsize + B * N * inner * 2)
    return _attention_call(
        kern, [qkv],
        [pl.BlockSpec((1, N, three_inner), lambda i: (i, 0, 0))],
        jax.ShapeDtypeStruct((B, N, inner), _ACT_DTYPE),
        flops, B * heads * N * N, bytes_accessed)


def attention_cross(q, kv, heads, head_dim):
    """Cross-attention core; consumes q and the fused (B, Nk, 2*inner) kv directly."""
    # TODO(synk): for very large Nk (big feature maps on v7x) tile the Nk axis
    # with an online-softmax accumulator; bf16 k/v keeps VMEM bounded here.
    B, Nq, inner = q.shape
    Nk = kv.shape[1]
    scale = float(head_dim) ** -0.5
    kern = functools.partial(_attention_kernel, heads=heads, head_dim=head_dim,
                             scale=scale, fused_qkv=False)
    flops = 4 * B * Nq * Nk * inner
    bytes_accessed = int(q.size * q.dtype.itemsize + kv.size * kv.dtype.itemsize
                         + B * Nq * inner * 2)
    return _attention_call(
        kern, [q, kv],
        [pl.BlockSpec((1, Nq, inner), lambda i: (i, 0, 0)),
         pl.BlockSpec((1, Nk, 2 * inner), lambda i: (i, 0, 0))],
        jax.ShapeDtypeStruct((B, Nq, inner), _ACT_DTYPE),
        flops, B * heads * Nq * Nk, bytes_accessed)


# ----------------------------- transformer layers -----------------------------

def self_attention_layer(x, p, heads, head_dim):
    # fused LayerNorm + concatenated QKV projection (bias-free), fed straight
    # into attention (no XLA q/k/v splits).
    qkv = fused_linear(x, p["wqkv"], ln_gb=(p["n_g"], p["n_b"]))
    o = attention_self(qkv, heads, head_dim)
    x = fused_linear(o, p["wout"], p["bout"], residual=x)           # to_out + residual
    h = fused_linear(x, p["w1"], p["b1"], ln_gb=(p["ln_g"], p["ln_b"]), act="gelu")
    return fused_linear(h, p["w2"], p["b2"], residual=x)            # MLP out + residual


def cross_attention_layer(x_q, x_kv, p, heads, head_dim):
    q = fused_linear(x_q, p["wq"], ln_gb=(p["qn_g"], p["qn_b"]))        # LN(q) @ Wq
    kv = fused_linear(x_kv, p["wkv"], ln_gb=(p["kvn_g"], p["kvn_b"]))   # LN(kv) @ Wkv
    o = attention_cross(q, kv, heads, head_dim)                         # in-kernel chunk(2)
    x = fused_linear(o, p["wout"], p["bout"], residual=x_q)             # to_out + residual
    h = fused_linear(x, p["w1"], p["b1"], ln_gb=(p["ln_g"], p["ln_b"]), act="gelu")
    return fused_linear(h, p["w2"], p["b2"], residual=x)


# ----------------------------- full forward ----------------------------------

def forward(x, params, cfg):
    B, C, Himg, Wimg = x.shape
    ps = cfg["patch"]
    H, Dh = cfg["num_heads"], cfg["head_dim"]

    # TODO(synk): the reference's resnet(layers=[2,2,2], return_features=True)
    # backbone definition is not included in the source; stand-in = patchify +
    # Pallas fused linear projection producing a "layer 3"-style feature map,
    # then 'b c h w -> b (h w) c'.
    xp = x.reshape(B, C, Himg // ps, ps, Wimg // ps, ps)
    xp = xp.transpose(0, 2, 4, 1, 3, 5).reshape(
        B, (Himg // ps) * (Wimg // ps), C * ps * ps).astype(_ACT_DTYPE)
    feat = fused_linear(xp, params["proj_w"], params["proj_b"])     # (B, Np, feat_dim) bf16
    features = [feat for _ in cfg["input_layer"]]                   # input_layer=[3, 3]

    x_latent = jnp.broadcast_to(params["latent"][None],
                                (B,) + params["latent"].shape).astype(_ACT_DTYPE)
    cls_token = jnp.broadcast_to(params["cls_token"][None],
                                 (B,) + params["cls_token"].shape).astype(_ACT_DTYPE)

    ca_in_i = 0
    ca_out_i = 0
    for sa_i in range(cfg["num_self_attention"]):
        if sa_i in cfg["ca_in"]:
            x_latent = cross_attention_layer(x_latent, features[ca_in_i],
                                             params["ca_input"][ca_in_i], H, Dh)
            # skip_connection_in defaults to False -> no extra add
            ca_in_i += 1
        x_latent = self_attention_layer(x_latent, params["sa"][sa_i], H, Dh)
        if sa_i in cfg["ca_out"]:
            cls_token = cross_attention_layer(cls_token, x_latent,
                                              params["ca_output"][ca_out_i], H, Dh)
            ca_out_i += 1

    # to_logits (ca_out non-empty -> Identity, LayerNorm, Linear), then squeeze(dim=1).
    # Classifier weight is lane-padded to a 128 multiple; slice back outside.
    logits = fused_linear(cls_token, params["out_w"], params["out_b"],
                          ln_gb=(params["out_ln_g"], params["out_ln_b"]),
                          out_dtype=jnp.float32)
    return logits[:, 0, :cfg["num_classes"]]


# ----------------------------- parameter init --------------------------------

def init_params(key, cfg):
    D = cfg["latent_dim"]
    H = cfg["num_heads"]
    Dh = cfg["head_dim"]
    inner = H * Dh
    keys = iter(jax.random.split(key, 1024))
    wdt = _MATMUL_DTYPE                                   # matmul weights stored bf16 in HBM

    def tn(shape, std=0.02, dtype=jnp.float32):           # trunc_normal_(std=0.02)
        return (std * jax.random.truncated_normal(next(keys), -2.0, 2.0, shape)).astype(dtype)

    def mlp_p(dim, ratio=4):
        return dict(ln_g=jnp.ones((dim,), jnp.float32), ln_b=jnp.zeros((dim,), jnp.float32),
                    w1=tn((dim, dim * ratio), dtype=wdt), b1=jnp.zeros((dim * ratio,), jnp.float32),
                    w2=tn((dim * ratio, dim), dtype=wdt), b2=jnp.zeros((dim,), jnp.float32))

    def sa_p(dim):
        p = dict(n_g=jnp.ones((dim,), jnp.float32), n_b=jnp.zeros((dim,), jnp.float32),
                 wqkv=jnp.concatenate([tn((dim, inner), dtype=wdt),
                                       tn((dim, 2 * inner), dtype=wdt)], axis=1),
                 wout=tn((inner, dim), dtype=wdt), bout=jnp.zeros((dim,), jnp.float32))
        p.update(mlp_p(dim))
        return p

    def ca_p(q_dim, kv_dim):
        p = dict(qn_g=jnp.ones((q_dim,), jnp.float32), qn_b=jnp.zeros((q_dim,), jnp.float32),
                 kvn_g=jnp.ones((kv_dim,), jnp.float32), kvn_b=jnp.zeros((kv_dim,), jnp.float32),
                 wq=tn((q_dim, inner), dtype=wdt), wkv=tn((kv_dim, 2 * inner), dtype=wdt),
                 wout=tn((inner, q_dim), dtype=wdt), bout=jnp.zeros((q_dim,), jnp.float32))
        p.update(mlp_p(q_dim))
        return p

    feat_dim = cfg["feature_dim"]
    nc = cfg["num_classes"]
    nc_pad = ((nc + 127) // 128) * 128                     # lane-dense classifier store
    out_w = jnp.pad(tn((D, nc), dtype=wdt), ((0, 0), (0, nc_pad - nc)))
    return dict(
        proj_w=tn((cfg["patch_feat"], feat_dim), dtype=wdt),
        proj_b=jnp.zeros((feat_dim,), jnp.float32),
        # latent / cls_token: normal(0, 0.02).clamp(-2, 2)
        latent=jnp.clip(0.02 * jax.random.normal(next(keys), (cfg["num_latents"], D)),
                        -2.0, 2.0).astype(jnp.float32),
        cls_token=jnp.clip(0.02 * jax.random.normal(next(keys), (1, D)),
                           -2.0, 2.0).astype(jnp.float32),
        ca_input=[ca_p(D, feat_dim) for _ in range(len(cfg["ca_in"]))],
        sa=[sa_p(D) for _ in range(cfg["num_self_attention"])],
        ca_output=[ca_p(D, D) for _ in range(len(cfg["ca_out"]))],
        out_ln_g=jnp.ones((D,), jnp.float32),
        out_ln_b=jnp.zeros((D,), jnp.float32),
        out_w=out_w,
        out_b=jnp.zeros((nc_pad,), jnp.float32),
    )


# ----------------------------------- main -------------------------------------

if __name__ == "__main__":
    # Small configuration consistent with the module's structure
    # (full model: 196 latents, dim 384, 12 SA layers, 6 heads x 64, 1000 classes).
    cfg = dict(
        patch=4,
        patch_feat=3 * 4 * 4,
        feature_dim=32,            # stand-in for resnet "layer 3" channels (256 in full model)
        input_layer=[3, 3],
        num_latents=16,
        latent_dim=32,
        num_self_attention=3,      # 12 in full model
        num_heads=2,               # 6 in full model
        head_dim=8,                # 64 in full model
        ca_in={0, 2},              # {0, 6} in full model
        ca_out={0, 1, 2},          # range(12) in full model
        num_classes=10,            # 1000 in full model
    )

    key = jax.random.PRNGKey(0)
    kx, kp = jax.random.split(key)
    x = jax.random.normal(kx, (2, 3, 16, 16), jnp.float32)   # NCHW image input
    params = init_params(kp, cfg)

    fwd = jax.jit(lambda x_, p_: forward(x_, p_, cfg))
    out = fwd(x, params)
    out = jax.block_until_ready(out)
    assert out.shape == (2, cfg["num_classes"]), out.shape
    assert bool(jnp.all(jnp.isfinite(out)))
    print("KERNEL_OK")
</pallas_src>

<mosaic_0001>
module attributes {stable_mosaic.version = 11 : i64} {
  func.func @_fused_linear_kernel(%arg0: i32, %arg1: memref<16x48xbf16, #tpu.memory_space<vmem>>, %arg2: memref<48x32xbf16, #tpu.memory_space<vmem>>, %arg3: memref<1x32xf32, #tpu.memory_space<vmem>>, %arg4: memref<16x32xbf16, #tpu.memory_space<vmem>>) attributes {dimension_semantics = [#tpu.dimension_semantics<parallel>], iteration_bounds = array<i64: 2>, scalar_prefetch = 0 : i64, scratch_operands = 0 : i64, tpu.core_type = #tpu.core_type<tc>, window_params = [{transform_indices = @transform_0, window_bounds = array<i64: 16, 48>}, {pipeline_mode = #tpu.pipeline_mode<synchronous>, transform_indices = @transform_1, window_bounds = array<i64: 48, 32>}, {pipeline_mode = #tpu.pipeline_mode<synchronous>, transform_indices = @transform_2, window_bounds = array<i64: 1, 32>}, {transform_indices = @transform_3, window_bounds = array<i64: 16, 32>}]} {
    %c0 = arith.constant 0 : index
    %c0_0 = arith.constant 0 : index
    %0 = vector.load %arg1[%c0, %c0_0] : memref<16x48xbf16, #tpu.memory_space<vmem>>, vector<16x48xbf16>
    %c0_1 = arith.constant 0 : index
    %c0_2 = arith.constant 0 : index
    %1 = vector.load %arg2[%c0_1, %c0_2] : memref<48x32xbf16, #tpu.memory_space<vmem>>, vector<48x32xbf16>
    %cst = arith.constant dense<0.000000e+00> : vector<16x32xf32>
    %2 = tpu.matmul %0, %1, %cst {dimension_numbers = #tpu.dot_dimension_numbers<[1], [0], [0], [1], [0, 0, 1, 1], [], []>} : vector<16x48xbf16>, vector<48x32xbf16>, vector<16x32xf32> -> vector<16x32xf32>
    %c0_3 = arith.constant 0 : index
    %c0_4 = arith.constant 0 : index
    %3 = vector.load %arg3[%c0_3, %c0_4] : memref<1x32xf32, #tpu.memory_space<vmem>>, vector<1x32xf32>
    %4 = vector.broadcast %3 : vector<1x32xf32> to vector<16x32xf32>
    %5 = arith.addf %2, %4 : vector<16x32xf32>
    %6 = arith.truncf %5 : vector<16x32xf32> to vector<16x32xbf16>
    %c0_5 = arith.constant 0 : index
    %c0_6 = arith.constant 0 : index
    %7 = vector.load %arg4[%c0_5, %c0_6] : memref<16x32xbf16, #tpu.memory_space<vmem>>, vector<16x32xbf16>
    tpu.vector_store %arg4[%c0_5, %c0_6], %6 {strides = array<i32>} : memref<16x32xbf16, #tpu.memory_space<vmem>>, vector<16x32xbf16>,
    return
  }
  func.func @transform_0(%arg0: i32) -> (i32, i32) {
    %c0_i32 = arith.constant 0 : i32
    %c0_i32_0 = arith.constant 0 : i32
    return %arg0, %c0_i32 : i32, i32
  }
  func.func @transform_1(%arg0: i32) -> (i32, i32) {
    %c0_i32 = arith.constant 0 : i32
    %c0_i32_0 = arith.constant 0 : i32
    %c0_i32_1 = arith.constant 0 : i32
    return %c0_i32, %c0_i32_0 : i32, i32
  }
  func.func @transform_2(%arg0: i32) -> (i32, i32) {
    %c0_i32 = arith.constant 0 : i32
    %c0_i32_0 = arith.constant 0 : i32
    %c0_i32_1 = arith.constant 0 : i32
    return %c0_i32, %c0_i32_0 : i32, i32
  }
  func.func @transform_3(%arg0: i32) -> (i32, i32) {
    %c0_i32 = arith.constant 0 : i32
    %c0_i32_0 = arith.constant 0 : i32
    return %arg0, %c0_i32 : i32, i32
  }
}

module attributes {stable_mosaic.version = 11 : i64} {
  func.func @_fused_linear_kernel(%arg0: i32, %arg1: memref<16x32xbf16, #tpu.memory_space<vmem>>, %arg2: memref<1x32xf32, #tpu.memory_space<vmem>>, %arg3: memref<1x32xf32, #tpu.memory_space<vmem>>, %arg4: memref<32x32xbf16, #tpu.memory_space<vmem>>, %arg5: memref<16x32xbf16, #tpu.memory_space<vmem>>) attributes {dimension_semantics = [#tpu.dimension_semantics<parallel>], iteration_bounds = array<i64: 2>, scalar_prefetch = 0 : i64, scratch_operands = 0 : i64, tpu.core_type = #tpu.core_type<tc>, window_params = [{transform_indices = @transform_0, window_bounds = array<i64: 16, 32>}, {pipeline_mode = #tpu.pipeline_mode<synchronous>, transform_indices = @transform_1, window_bounds = array<i64: 1, 32>}, {pipeline_mode = #tpu.pipeline_mode<synchronous>, transform_indices = @transform_2, window_bounds = array<i64: 1, 32>}, {pipeline_mode = #tpu.pipeline_mode<synchronous>, transform_indices = @transform_3, window_bounds = array<i64: 32, 32>}, {transform_indices = @transform_4, window_bounds = array<i64: 16, 32>}]} {
    %c0 = arith.constant 0 : index
    %c0_0 = arith.constant 0 : index
    %0 = vector.load %arg1[%c0, %c0_0] : memref<16x32xbf16, #tpu.memory_space<vmem>>, vector<16x32xbf16>
    %1 = arith.extf %0 : vector<16x32xbf16> to vector<16x32xf32>
    %c0_1 = arith.constant 0 : index
    %c0_2 = arith.constant 0 : index
    %2 = vector.load %arg2[%c0_1, %c0_2] : memref<1x32xf32, #tpu.memory_space<vmem>>, vector<1x32xf32>
    %c0_3 = arith.constant 0 : index
    %c0_4 = arith.constant 0 : index
    %3 = vector.load %arg3[%c0_3, %c0_4] : memref<1x32xf32, #tpu.memory_space<vmem>>, vector<1x32xf32>
    %cst = arith.constant dense<0.000000e+00> : vector<16xf32>
    %4 = vector.multi_reduction <add>, %1, %cst [1] : vector<16x32xf32> to vector<16xf32>
    %5 = vector.shape_cast %4 : vector<16xf32> to vector<16x1xf32>
    %cst_5 = arith.constant 3.200000e+01 : f32
    %6 = vector.broadcast %cst_5 : f32 to vector<16x1xf32>
    %7 = arith.divf %5, %6 : vector<16x1xf32>
    %8 = vector.broadcast %7 : vector<16x1xf32> to vector<16x32xf32>
    %9 = arith.subf %1, %8 : vector<16x32xf32>
    %10 = arith.mulf %9, %9 : vector<16x32xf32>
    %cst_6 = arith.constant dense<0.000000e+00> : vector<16xf32>
    %11 = vector.multi_reduction <add>, %10, %cst_6 [1] : vector<16x32xf32> to vector<16xf32>
    %12 = vector.shape_cast %11 : vector<16xf32> to vector<16x1xf32>
    %cst_7 = arith.constant 3.200000e+01 : f32
    %13 = vector.broadcast %cst_7 : f32 to vector<16x1xf32>
    %14 = arith.divf %12, %13 : vector<16x1xf32>
    %cst_8 = arith.constant 9.99999974E-6 : f32
    %15 = vector.broadcast %cst_8 : f32 to vector<16x1xf32>
    %16 = arith.addf %14, %15 : vector<16x1xf32>
    %17 = math.rsqrt %16 : vector<16x1xf32>
    %18 = vector.broadcast %17 : vector<16x1xf32> to vector<16x32xf32>
    %19 = arith.mulf %9, %18 : vector<16x32xf32>
    %20 = vector.broadcast %2 : vector<1x32xf32> to vector<16x32xf32>
    %21 = arith.mulf %19, %20 : vector<16x32xf32>
    %22 = vector.broadcast %3 : vector<1x32xf32> to vector<16x32xf32>
    %23 = arith.addf %21, %22 : vector<16x32xf32>
    %24 = arith.truncf %23 : vector<16x32xf32> to vector<16x32xbf16>
    %c0_9 = arith.constant 0 : index
    %c0_10 = arith.constant 0 : index
    %25 = vector.load %arg4[%c0_9, %c0_10] : memref<32x32xbf16, #tpu.memory_space<vmem>>, vector<32x32xbf16>
    %cst_11 = arith.constant dense<0.000000e+00> : vector<16x32xf32>
    %26 = tpu.matmul %24, %25, %cst_11 {dimension_numbers = #tpu.dot_dimension_numbers<[1], [0], [0], [1], [0, 0, 1, 1], [], []>} : vector<16x32xbf16>, vector<32x32xbf16>, vector<16x32xf32> -> vector<16x32xf32>
    %27 = arith.truncf %26 : vector<16x32xf32> to vector<16x32xbf16>
    %c0_12 = arith.constant 0 : index
    %c0_13 = arith.constant 0 : index
    %28 = vector.load %arg5[%c0_12, %c0_13] : memref<16x32xbf16, #tpu.memory_space<vmem>>, vector<16x32xbf16>
    tpu.vector_store %arg5[%c0_12, %c0_13], %27 {strides = array<i32>} : memref<16x32xbf16, #tpu.memory_space<vmem>>, vector<16x32xbf16>,
    return
  }
  func.func @transform_0(%arg0: i32) -> (i32, i32) {
    %c0_i32 = arith.constant 0 : i32
    %c0_i32_0 = arith.constant 0 : i32
    return %arg0, %c0_i32 : i32, i32
  }
  func.func @transform_1(%arg0: i32) -> (i32, i32) {
    %c0_i32 = arith.constant 0 : i32
    %c0_i32_0 = arith.constant 0 : i32
    %c0_i32_1 = arith.constant 0 : i32
    return %c0_i32, %c0_i32_0 : i32, i32
  }
  func.func @transform_2(%arg0: i32) -> (i32, i32) {
    %c0_i32 = arith.constant 0 : i32
    %c0_i32_0 = arith.constant 0 : i32
    %c0_i32_1 = arith.constant 0 : i32
    return %c0_i32, %c0_i32_0 : i32, i32
  }
  func.func @transform_3(%arg0: i32) -> (i32, i32) {
    %c0_i32 = arith.constant 0 : i32
    %c0_i32_0 = arith.constant 0 : i32
    %c0_i32_1 = arith.constant 0 : i32
    return %c0_i32, %c0_i32_0 : i32, i32
  }
  func.func @transform_4(%arg0: i32) -> (i32, i32) {
    %c0_i32 = arith.constant 0 : i32
    %c0_i32_0 = arith.constant 0 : i32
    return %arg0, %c0_i32 : i32, i32
  }
}

module attributes {stable_mosaic.version = 11 : i64} {
  func.func @_fused_linear_kernel(%arg0: i32, %arg1: memref<16x32xbf16, #tpu.memory_space<vmem>>, %arg2: memref<1x32xf32, #tpu.memory_space<vmem>>, %arg3: memref<1x32xf32, #tpu.memory_space<vmem>>, %arg4: memref<32x16xbf16, #tpu.memory_space<vmem>>, %arg5: memref<16x16xbf16, #tpu.memory_space<vmem>>) attributes {dimension_semantics = [#tpu.dimension_semantics<parallel>], iteration_bounds = array<i64: 2>, scalar_prefetch = 0 : i64, scratch_operands = 0 : i64, tpu.core_type = #tpu.core_type<tc>, window_params = [{transform_indices = @transform_0, window_bounds = array<i64: 16, 32>}, {pipeline_mode = #tpu.pipeline_mode<synchronous>, transform_indices = @transform_1, window_bounds = array<i64: 1, 32>}, {pipeline_mode = #tpu.pipeline_mode<synchronous>, transform_indices = @transform_2, window_bounds = array<i64: 1, 32>}, {pipeline_mode = #tpu.pipeline_mode<synchronous>, transform_indices = @transform_3, window_bounds = array<i64: 32, 16>}, {transform_indices = @transform_4, window_bounds = array<i64: 16, 16>}]} {
    %c0 = arith.constant 0 : index
    %c0_0 = arith.constant 0 : index
    %0 = vector.load %arg1[%c0, %c0_0] : memref<16x32xbf16, #tpu.memory_space<vmem>>, vector<16x32xbf16>
    %1 = arith.extf %0 : vector<16x32xbf16> to vector<16x32xf32>
    %c0_1 = arith.constant 0 : index
    %c0_2 = arith.constant 0 : index
    %2 = vector.load %arg2[%c0_1, %c0_2] : memref<1x32xf32, #tpu.memory_space<vmem>>, vector<1x32xf32>
    %c0_3 = arith.constant 0 : index
    %c0_4 = arith.constant 0 : index
    %3 = vector.load %arg3[%c0_3, %c0_4] : memref<1x32xf32, #tpu.memory_space<vmem>>, vector<1x32xf32>
    %cst = arith.constant dense<0.000000e+00> : vector<16xf32>
    %4 = vector.multi_reduction <add>, %1, %cst [1] : vector<16x32xf32> to vector<16xf32>
    %5 = vector.shape_cast %4 : vector<16xf32> to vector<16x1xf32>
    %cst_5 = arith.constant 3.200000e+01 : f32
    %6 = vector.broadcast %cst_5 : f32 to vector<16x1xf32>
    %7 = arith.divf %5, %6 : vector<16x1xf32>
    %8 = vector.broadcast %7 : vector<16x1xf32> to vector<16x32xf32>
    %9 = arith.subf %1, %8 : vector<16x32xf32>
    %10 = arith.mulf %9, %9 : vector<16x32xf32>
    %cst_6 = arith.constant dense<0.000000e+00> : vector<16xf32>
    %11 = vector.multi_reduction <add>, %10, %cst_6 [1] : vector<16x32xf32> to vector<16xf32>
    %12 = vector.shape_cast %11 : vector<16xf32> to vector<16x1xf32>
    %cst_7 = arith.constant 3.200000e+01 : f32
    %13 = vector.broadcast %cst_7 : f32 to vector<16x1xf32>
    %14 = arith.divf %12, %13 : vector<16x1xf32>
    %cst_8 = arith.constant 9.99999974E-6 : f32
    %15 = vector.broadcast %cst_8 : f32 to vector<16x1xf32>
    %16 = arith.addf %14, %15 : vector<16x1xf32>
    %17 = math.rsqrt %16 : vector<16x1xf32>
    %18 = vector.broadcast %17 : vector<16x1xf32> to vector<16x32xf32>
    %19 = arith.mulf %9, %18 : vector<16x32xf32>
    %20 = vector.broadcast %2 : vector<1x32xf32> to vector<16x32xf32>
    %21 = arith.mulf %19, %20 : vector<16x32xf32>
    %22 = vector.broadcast %3 : vector<1x32xf32> to vector<16x32xf32>
    %23 = arith.addf %21, %22 : vector<16x32xf32>
    %24 = arith.truncf %23 : vector<16x32xf32> to vector<16x32xbf16>
    %c0_9 = arith.constant 0 : index
    %c0_10 = arith.constant 0 : index
    %25 = vector.load %arg4[%c0_9, %c0_10] : memref<32x16xbf16, #tpu.memory_space<vmem>>, vector<32x16xbf16>
    %cst_11 = arith.constant dense<0.000000e+00> : vector<16x16xf32>
    %26 = tpu.matmul %24, %25, %cst_11 {dimension_numbers = #tpu.dot_dimension_numbers<[1], [0], [0], [1], [0, 0, 1, 1], [], []>} : vector<16x32xbf16>, vector<32x16xbf16>, vector<16x16xf32> -> vector<16x16xf32>
    %27 = arith.truncf %26 : vector<16x16xf32> to vector<16x16xbf16>
    %c0_12 = arith.constant 0 : index
    %c0_13 = arith.constant 0 : index
    %28 = vector.load %arg5[%c0_12, %c0_13] : memref<16x16xbf16, #tpu.memory_space<vmem>>, vector<16x16xbf16>
    tpu.vector_store %arg5[%c0_12, %c0_13], %27 {strides = array<i32>} : memref<16x16xbf16, #tpu.memory_space<vmem>>, vector<16x16xbf16>,
    return
  }
  func.func @transform_0(%arg0: i32) -> (i32, i32) {
    %c0_i32 = arith.constant 0 : i32
    %c0_i32_0 = arith.constant 0 : i32
    return %arg0, %c0_i32 : i32, i32
  }
  func.func @transform_1(%arg0: i32) -> (i32, i32) {
    %c0_i32 = arith.constant 0 : i32
    %c0_i32_0 = arith.constant 0 : i32
    %c0_i32_1 = arith.constant 0 : i32
    return %c0_i32, %c0_i32_0 : i32, i32
  }
  func.func @transform_2(%arg0: i32) -> (i32, i32) {
    %c0_i32 = arith.constant 0 : i32
    %c0_i32_0 = arith.constant 0 : i32
    %c0_i32_1 = arith.constant 0 : i32
    return %c0_i32, %c0_i32_0 : i32, i32
  }
  func.func @transform_3(%arg0: i32) -> (i32, i32) {
    %c0_i32 = arith.constant 0 : i32
    %c0_i32_0 = arith.constant 0 : i32
    %c0_i32_1 = arith.constant 0 : i32
    return %c0_i32, %c0_i32_0 : i32, i32
  }
  func.func @transform_4(%arg0: i32) -> (i32, i32) {
    %c0_i32 = arith.constant 0 : i32
    %c0_i32_0 = arith.constant 0 : i32
    return %arg0, %c0_i32 : i32, i32
  }
}

module attributes {stable_mosaic.version = 11 : i64} {
  func.func @_attention_kernel(%arg0: i32, %arg1: memref<1x16x16xbf16, #tpu.memory_space<vmem>>, %arg2: memref<1x16x32xbf16, #tpu.memory_space<vmem>>, %arg3: memref<1x16x16xbf16, #tpu.memory_space<vmem>>) attributes {dimension_semantics = [#tpu.dimension_semantics<parallel>], iteration_bounds = array<i64: 2>, scalar_prefetch = 0 : i64, scratch_operands = 0 : i64, tpu.core_type = #tpu.core_type<tc>, window_params = [{transform_indices = @transform_0, window_bounds = array<i64: 1, 16, 16>}, {transform_indices = @transform_1, window_bounds = array<i64: 1, 16, 32>}, {transform_indices = @transform_2, window_bounds = array<i64: 1, 16, 16>}]} {
    %c0 = arith.constant 0 : index
    %c0_0 = arith.constant 0 : index
    %c0_1 = arith.constant 0 : index
    %0 = vector.load %arg1[%c0, %c0_0, %c0_1] : memref<1x16x16xbf16, #tpu.memory_space<vmem>>, vector<1x16x16xbf16>
    %1 = vector.shape_cast %0 : vector<1x16x16xbf16> to vector<16x16xbf16>
    %c0_2 = arith.constant 0 : index
    %c0_3 = arith.constant 0 : index
    %c0_4 = arith.constant 0 : index
    %2 = vector.load %arg2[%c0_2, %c0_3, %c0_4] : memref<1x16x32xbf16, #tpu.memory_space<vmem>>, vector<1x16x32xbf16>
    %3 = vector.shape_cast %2 : vector<1x16x32xbf16> to vector<16x32xbf16>
    %4 = arith.extf %1 : vector<16x16xbf16> to vector<16x16xf32>
    %cst = arith.constant 0.353553385 : f32
    %5 = vector.broadcast %cst : f32 to vector<16x16xf32>
    %6 = arith.mulf %4, %5 : vector<16x16xf32>
    %7 = arith.truncf %6 : vector<16x16xf32> to vector<16x16xbf16>
    %8 = vector.extract_strided_slice %7 {offsets = [0, 0], sizes = [16, 8], strides = [1, 1]} : vector<16x16xbf16> to vector<16x8xbf16>
    %9 = vector.extract_strided_slice %3 {offsets = [0, 0], sizes = [16, 8], strides = [1, 1]} : vector<16x32xbf16> to vector<16x8xbf16>
    %10 = vector.extract_strided_slice %3 {offsets = [0, 16], sizes = [16, 8], strides = [1, 1]} : vector<16x32xbf16> to vector<16x8xbf16>
    %cst_5 = arith.constant dense<0.000000e+00> : vector<16x16xf32>
    %11 = tpu.matmul %8, %9, %cst_5 {dimension_numbers = #tpu.dot_dimension_numbers<[1], [1], [0], [0], [0, 0, 1, 0], [], []>} : vector<16x8xbf16>, vector<16x8xbf16>, vector<16x16xf32> -> vector<16x16xf32>
    %cst_6 = arith.constant dense<0xFF800000> : vector<16xf32>
    %12 = vector.multi_reduction <maximumf>, %11, %cst_6 [1] : vector<16x16xf32> to vector<16xf32>
    %13 = vector.shape_cast %12 : vector<16xf32> to vector<16x1xf32>
    %14 = vector.broadcast %13 : vector<16x1xf32> to vector<16x16xf32>
    %15 = arith.subf %11, %14 : vector<16x16xf32>
    %16 = math.exp %15 : vector<16x16xf32>
    %cst_7 = arith.constant dense<0.000000e+00> : vector<16xf32>
    %17 = vector.multi_reduction <add>, %16, %cst_7 [1] : vector<16x16xf32> to vector<16xf32>
    %18 = vector.shape_cast %17 : vector<16xf32> to vector<16x1xf32>
    %19 = tpu.reciprocal %18 {approx = true} : vector<16x1xf32> -> vector<16x1xf32>
    %20 = vector.broadcast %19 : vector<16x1xf32> to vector<16x16xf32>
    %21 = arith.mulf %16, %20 : vector<16x16xf32>
    %22 = arith.truncf %21 : vector<16x16xf32> to vector<16x16xbf16>
    %cst_8 = arith.constant dense<0.000000e+00> : vector<16x8xf32>
    %23 = tpu.matmul %22, %10, %cst_8 {dimension_numbers = #tpu.dot_dimension_numbers<[1], [0], [0], [1], [0, 0, 1, 1], [], []>} : vector<16x16xbf16>, vector<16x8xbf16>, vector<16x8xf32> -> vector<16x8xf32>
    %24 = arith.truncf %23 : vector<16x8xf32> to vector<16x8xbf16>
    %c0_9 = arith.constant 0 : index
    %c0_10 = arith.constant 0 : index
    %c0_11 = arith.constant 0 : index
    %25 = vector.load %arg3[%c0_9, %c0_10, %c0_11] : memref<1x16x16xbf16, #tpu.memory_space<vmem>>, vector<1x16x8xbf16>
    %26 = vector.shape_cast %25 : vector<1x16x8xbf16> to vector<16x8xbf16>
    %27 = vector.shape_cast %24 : vector<16x8xbf16> to vector<1x16x8xbf16>
    tpu.vector_store %arg3[%c0_9, %c0_10, %c0_11], %27 {strides = array<i32>} : memref<1x16x16xbf16, #tpu.memory_space<vmem>>, vector<1x16x8xbf16>,
    %28 = vector.extract_strided_slice %7 {offsets = [0, 8], sizes = [16, 8], strides = [1, 1]} : vector<16x16xbf16> to vector<16x8xbf16>
    %29 = vector.extract_strided_slice %3 {offsets = [0, 8], sizes = [16, 8], strides = [1, 1]} : vector<16x32xbf16> to vector<16x8xbf16>
    %30 = vector.extract_strided_slice %3 {offsets = [0, 24], sizes = [16, 8], strides = [1, 1]} : vector<16x32xbf16> to vector<16x8xbf16>
    %cst_12 = arith.constant dense<0.000000e+00> : vector<16x16xf32>
    %31 = tpu.matmul %28, %29, %cst_12 {dimension_numbers = #tpu.dot_dimension_numbers<[1], [1], [0], [0], [0, 0, 1, 0], [], []>} : vector<16x8xbf16>, vector<16x8xbf16>, vector<16x16xf32> -> vector<16x16xf32>
    %cst_13 = arith.constant dense<0xFF800000> : vector<16xf32>
    %32 = vector.multi_reduction <maximumf>, %31, %cst_13 [1] : vector<16x16xf32> to vector<16xf32>
    %33 = vector.shape_cast %32 : vector<16xf32> to vector<16x1xf32>
    %34 = vector.broadcast %33 : vector<16x1xf32> to vector<16x16xf32>
    %35 = arith.subf %31, %34 : vector<16x16xf32>
    %36 = math.exp %35 : vector<16x16xf32>
    %cst_14 = arith.constant dense<0.000000e+00> : vector<16xf32>
    %37 = vector.multi_reduction <add>, %36, %cst_14 [1] : vector<16x16xf32> to vector<16xf32>
    %38 = vector.shape_cast %37 : vector<16xf32> to vector<16x1xf32>
    %39 = tpu.reciprocal %38 {approx = true} : vector<16x1xf32> -> vector<16x1xf32>
    %40 = vector.broadcast %39 : vector<16x1xf32> to vector<16x16xf32>
    %41 = arith.mulf %36, %40 : vector<16x16xf32>
    %42 = arith.truncf %41 : vector<16x16xf32> to vector<16x16xbf16>
    %cst_15 = arith.constant dense<0.000000e+00> : vector<16x8xf32>
    %43 = tpu.matmul %42, %30, %cst_15 {dimension_numbers = #tpu.dot_dimension_numbers<[1], [0], [0], [1], [0, 0, 1, 1], [], []>} : vector<16x16xbf16>, vector<16x8xbf16>, vector<16x8xf32> -> vector<16x8xf32>
    %44 = arith.truncf %43 : vector<16x8xf32> to vector<16x8xbf16>
    %c0_16 = arith.constant 0 : index
    %c0_17 = arith.constant 0 : index
    %c8 = arith.constant 8 : index
    %45 = vector.load %arg3[%c0_16, %c0_17, %c8] : memref<1x16x16xbf16, #tpu.memory_space<vmem>>, vector<1x16x8xbf16>
    %46 = vector.shape_cast %45 : vector<1x16x8xbf16> to vector<16x8xbf16>
    %47 = vector.shape_cast %44 : vector<16x8xbf16> to vector<1x16x8xbf16>
    tpu.vector_store %arg3[%c0_16, %c0_17, %c8], %47 {strides = array<i32>} : memref<1x16x16xbf16, #tpu.memory_space<vmem>>, vector<1x16x8xbf16>,
    return
  }
  func.func @transform_0(%arg0: i32) -> (i32, i32, i32) {
    %c0_i32 = arith.constant 0 : i32
    %c0_i32_0 = arith.constant 0 : i32
    %c0_i32_1 = arith.constant 0 : i32
    return %arg0, %c0_i32, %c0_i32_0 : i32, i32, i32
  }
  func.func @transform_1(%arg0: i32) -> (i32, i32, i32) {
    %c0_i32 = arith.constant 0 : i32
    %c0_i32_0 = arith.constant 0 : i32
    %c0_i32_1 = arith.constant 0 : i32
    return %arg0, %c0_i32, %c0_i32_0 : i32, i32, i32
  }
  func.func @transform_2(%arg0: i32) -> (i32, i32, i32) {
    %c0_i32 = arith.constant 0 : i32
    %c0_i32_0 = arith.constant 0 : i32
    %c0_i32_1 = arith.constant 0 : i32
    return %arg0, %c0_i32, %c0_i32_0 : i32, i32, i32
  }
}

module attributes {stable_mosaic.version = 11 : i64} {
  func.func @_fused_linear_kernel(%arg0: i32, %arg1: memref<16x16xbf16, #tpu.memory_space<vmem>>, %arg2: memref<16x32xbf16, #tpu.memory_space<vmem>>, %arg3: memref<1x32xf32, #tpu.memory_space<vmem>>, %arg4: memref<16x32xbf16, #tpu.memory_space<vmem>>, %arg5: memref<16x32xbf16, #tpu.memory_space<vmem>>) attributes {dimension_semantics = [#tpu.dimension_semantics<parallel>], iteration_bounds = array<i64: 2>, scalar_prefetch = 0 : i64, scratch_operands = 0 : i64, tpu.core_type = #tpu.core_type<tc>, window_params = [{transform_indices = @transform_0, window_bounds = array<i64: 16, 16>}, {pipeline_mode = #tpu.pipeline_mode<synchronous>, transform_indices = @transform_1, window_bounds = array<i64: 16, 32>}, {pipeline_mode = #tpu.pipeline_mode<synchronous>, transform_indices = @transform_2, window_bounds = array<i64: 1, 32>}, {transform_indices = @transform_3, window_bounds = array<i64: 16, 32>}, {transform_indices = @transform_4, window_bounds = array<i64: 16, 32>}]} {
    %c0 = arith.constant 0 : index
    %c0_0 = arith.constant 0 : index
    %0 = vector.load %arg1[%c0, %c0_0] : memref<16x16xbf16, #tpu.memory_space<vmem>>, vector<16x16xbf16>
    %c0_1 = arith.constant 0 : index
    %c0_2 = arith.constant 0 : index
    %1 = vector.load %arg2[%c0_1, %c0_2] : memref<16x32xbf16, #tpu.memory_space<vmem>>, vector<16x32xbf16>
    %cst = arith.constant dense<0.000000e+00> : vector<16x32xf32>
    %2 = tpu.matmul %0, %1, %cst {dimension_numbers = #tpu.dot_dimension_numbers<[1], [0], [0], [1], [0, 0, 1, 1], [], []>} : vector<16x16xbf16>, vector<16x32xbf16>, vector<16x32xf32> -> vector<16x32xf32>
    %c0_3 = arith.constant 0 : index
    %c0_4 = arith.constant 0 : index
    %3 = vector.load %arg3[%c0_3, %c0_4] : memref<1x32xf32, #tpu.memory_space<vmem>>, vector<1x32xf32>
    %4 = vector.broadcast %3 : vector<1x32xf32> to vector<16x32xf32>
    %5 = arith.addf %2, %4 : vector<16x32xf32>
    %c0_5 = arith.constant 0 : index
    %c0_6 = arith.constant 0 : index
    %6 = vector.load %arg4[%c0_5, %c0_6] : memref<16x32xbf16, #tpu.memory_space<vmem>>, vector<16x32xbf16>
    %7 = arith.extf %6 : vector<16x32xbf16> to vector<16x32xf32>
    %8 = arith.addf %5, %7 : vector<16x32xf32>
    %9 = arith.truncf %8 : vector<16x32xf32> to vector<16x32xbf16>
    %c0_7 = arith.constant 0 : index
    %c0_8 = arith.constant 0 : index
    %10 = vector.load %arg5[%c0_7, %c0_8] : memref<16x32xbf16, #tpu.memory_space<vmem>>, vector<16x32xbf16>
    tpu.vector_store %arg5[%c0_7, %c0_8], %9 {strides = array<i32>} : memref<16x32xbf16, #tpu.memory_space<vmem>>, vector<16x32xbf16>,
    return
  }
  func.func @transform_0(%arg0: i32) -> (i32, i32) {
    %c0_i32 = arith.constant 0 : i32
    %c0_i32_0 = arith.constant 0 : i32
    return %arg0, %c0_i32 : i32, i32
  }
  func.func @transform_1(%arg0: i32) -> (i32, i32) {
    %c0_i32 = arith.constant 0 : i32
    %c0_i32_0 = arith.constant 0 : i32
    %c0_i32_1 = arith.constant 0 : i32
    return %c0_i32, %c0_i32_0 : i32, i32
  }
  func.func @transform_2(%arg0: i32) -> (i32, i32) {
    %c0_i32 = arith.constant 0 : i32
    %c0_i32_0 = arith.constant 0 : i32
    %c0_i32_1 = arith.constant 0 : i32
    return %c0_i32, %c0_i32_0 : i32, i32
  }
  func.func @transform_3(%arg0: i32) -> (i32, i32) {
    %c0_i32 = arith.constant 0 : i32
    %c0_i32_0 = arith.constant 0 : i32
    return %arg0, %c0_i32 : i32, i32
  }
  func.func @transform_4(%arg0: i32) -> (i32, i32) {
    %c0_i32 = arith.constant 0 : i32
    %c0_i32_0 = arith.constant 0 : i32
    return %arg0, %c0_i32 : i32, i32
  }
}

module attributes {stable_mosaic.version = 11 : i64} {
  func.func @_fused_linear_kernel(%arg0: i32, %arg1: memref<16x32xbf16, #tpu.memory_space<vmem>>, %arg2: memref<1x32xf32, #tpu.memory_space<vmem>>, %arg3: memref<1x32xf32, #tpu.memory_space<vmem>>, %arg4: memref<32x128xbf16, #tpu.memory_space<vmem>>, %arg5: memref<1x128xf32, #tpu.memory_space<vmem>>, %arg6: memref<16x128xbf16, #tpu.memory_space<vmem>>) attributes {dimension_semantics = [#tpu.dimension_semantics<parallel>], iteration_bounds = array<i64: 2>, scalar_prefetch = 0 : i64, scratch_operands = 0 : i64, tpu.core_type = #tpu.core_type<tc>, window_params = [{transform_indices = @transform_0, window_bounds = array<i64: 16, 32>}, {pipeline_mode = #tpu.pipeline_mode<synchronous>, transform_indices = @transform_1, window_bounds = array<i64: 1, 32>}, {pipeline_mode = #tpu.pipeline_mode<synchronous>, transform_indices = @transform_2, window_bounds = array<i64: 1, 32>}, {pipeline_mode = #tpu.pipeline_mode<synchronous>, transform_indices = @transform_3, window_bounds = array<i64: 32, 128>}, {pipeline_mode = #tpu.pipeline_mode<synchronous>, transform_indices = @transform_4, window_bounds = array<i64: 1, 128>}, {transform_indices = @transform_5, window_bounds = array<i64: 16, 128>}]} {
    %c0 = arith.constant 0 : index
    %c0_0 = arith.constant 0 : index
    %0 = vector.load %arg1[%c0, %c0_0] : memref<16x32xbf16, #tpu.memory_space<vmem>>, vector<16x32xbf16>
    %1 = arith.extf %0 : vector<16x32xbf16> to vector<16x32xf32>
    %c0_1 = arith.constant 0 : index
    %c0_2 = arith.constant 0 : index
    %2 = vector.load %arg2[%c0_1, %c0_2] : memref<1x32xf32, #tpu.memory_space<vmem>>, vector<1x32xf32>
    %c0_3 = arith.constant 0 : index
    %c0_4 = arith.constant 0 : index
    %3 = vector.load %arg3[%c0_3, %c0_4] : memref<1x32xf32, #tpu.memory_space<vmem>>, vector<1x32xf32>
    %cst = arith.constant dense<0.000000e+00> : vector<16xf32>
    %4 = vector.multi_reduction <add>, %1, %cst [1] : vector<16x32xf32> to vector<16xf32>
    %5 = vector.shape_cast %4 : vector<16xf32> to vector<16x1xf32>
    %cst_5 = arith.constant 3.200000e+01 : f32
    %6 = vector.broadcast %cst_5 : f32 to vector<16x1xf32>
    %7 = arith.divf %5, %6 : vector<16x1xf32>
    %8 = vector.broadcast %7 : vector<16x1xf32> to vector<16x32xf32>
    %9 = arith.subf %1, %8 : vector<16x32xf32>
    %10 = arith.mulf %9, %9 : vector<16x32xf32>
    %cst_6 = arith.constant dense<0.000000e+00> : vector<16xf32>
    %11 = vector.multi_reduction <add>, %10, %cst_6 [1] : vector<16x32xf32> to vector<16xf32>
    %12 = vector.shape_cast %11 : vector<16xf32> to vector<16x1xf32>
    %cst_7 = arith.constant 3.200000e+01 : f32
    %13 = vector.broadcast %cst_7 : f32 to vector<16x1xf32>
    %14 = arith.divf %12, %13 : vector<16x1xf32>
    %cst_8 = arith.constant 9.99999974E-6 : f32
    %15 = vector.broadcast %cst_8 : f32 to vector<16x1xf32>
    %16 = arith.addf %14, %15 : vector<16x1xf32>
    %17 = math.rsqrt %16 : vector<16x1xf32>
    %18 = vector.broadcast %17 : vector<16x1xf32> to vector<16x32xf32>
    %19 = arith.mulf %9, %18 : vector<16x32xf32>
    %20 = vector.broadcast %2 : vector<1x32xf32> to vector<16x32xf32>
    %21 = arith.mulf %19, %20 : vector<16x32xf32>
    %22 = vector.broadcast %3 : vector<1x32xf32> to vector<16x32xf32>
    %23 = arith.addf %21, %22 : vector<16x32xf32>
    %24 = arith.truncf %23 : vector<16x32xf32> to vector<16x32xbf16>
    %c0_9 = arith.constant 0 : index
    %c0_10 = arith.constant 0 : index
    %25 = vector.load %arg4[%c0_9, %c0_10] : memref<32x128xbf16, #tpu.memory_space<vmem>>, vector<32x128xbf16>
    %cst_11 = arith.constant dense<0.000000e+00> : vector<16x128xf32>
    %26 = tpu.matmul %24, %25, %cst_11 {dimension_numbers = #tpu.dot_dimension_numbers<[1], [0], [0], [1], [0, 0, 1, 1], [], []>} : vector<16x32xbf16>, vector<32x128xbf16>, vector<16x128xf32> -> vector<16x128xf32>
    %c0_12 = arith.constant 0 : index
    %c0_13 = arith.constant 0 : index
    %27 = vector.load %arg5[%c0_12, %c0_13] : memref<1x128xf32, #tpu.memory_space<vmem>>, vector<1x128xf32>
    %28 = vector.broadcast %27 : vector<1x128xf32> to vector<16x128xf32>
    %29 = arith.addf %26, %28 : vector<16x128xf32>
    %cst_14 = arith.constant 5.000000e-01 : f32
    %30 = vector.broadcast %cst_14 : f32 to vector<16x128xf32>
    %31 = arith.mulf %30, %29 : vector<16x128xf32>
    %cst_15 = arith.constant 4.471500e-02 : f32
    %32 = vector.broadcast %cst_15 : f32 to vector<16x128xf32>
    %33 = arith.mulf %32, %29 : vector<16x128xf32>
    %34 = arith.mulf %33, %29 : vector<16x128xf32>
    %35 = arith.mulf %34, %29 : vector<16x128xf32>
    %36 = arith.addf %29, %35 : vector<16x128xf32>
    %cst_16 = arith.constant 0.797884583 : f32
    %37 = vector.broadcast %cst_16 : f32 to vector<16x128xf32>
    %38 = arith.mulf %37, %36 : vector<16x128xf32>
    %39 = math.tanh %38 : vector<16x128xf32>
    %cst_17 = arith.constant 1.000000e+00 : f32
    %40 = vector.broadcast %cst_17 : f32 to vector<16x128xf32>
    %41 = arith.addf %40, %39 : vector<16x128xf32>
    %42 = arith.mulf %31, %41 : vector<16x128xf32>
    %43 = arith.truncf %42 : vector<16x128xf32> to vector<16x128xbf16>
    %c0_18 = arith.constant 0 : index
    %c0_19 = arith.constant 0 : index
    %44 = vector.load %arg6[%c0_18, %c0_19] : memref<16x128xbf16, #tpu.memory_space<vmem>>, vector<16x128xbf16>
    tpu.vector_store %arg6[%c0_18, %c0_19], %43 {strides = array<i32>} : memref<16x128xbf16, #tpu.memory_space<vmem>>, vector<16x128xbf16>,
    return
  }
  func.func @transform_0(%arg0: i32) -> (i32, i32) {
    %c0_i32 = arith.constant 0 : i32
    %c0_i32_0 = arith.constant 0 : i32
    return %arg0, %c0_i32 : i32, i32
  }
  func.func @transform_1(%arg0: i32) -> (i32, i32) {
    %c0_i32 = arith.constant 0 : i32
    %c0_i32_0 = arith.constant 0 : i32
    %c0_i32_1 = arith.constant 0 : i32
    return %c0_i32, %c0_i32_0 : i32, i32
  }
  func.func @transform_2(%arg0: i32) -> (i32, i32) {
    %c0_i32 = arith.constant 0 : i32
    %c0_i32_0 = arith.constant 0 : i32
    %c0_i32_1 = arith.constant 0 : i32
    return %c0_i32, %c0_i32_0 : i32, i32
  }
  func.func @transform_3(%arg0: i32) -> (i32, i32) {
    %c0_i32 = arith.constant 0 : i32
    %c0_i32_0 = arith.constant 0 : i32
    %c0_i32_1 = arith.constant 0 : i32
    return %c0_i32, %c0_i32_0 : i32, i32
  }
  func.func @transform_4(%arg0: i32) -> (i32, i32) {
    %c0_i32 = arith.constant 0 : i32
    %c0_i32_0 = arith.constant 0 : i32
    %c0_i32_1 = arith.constant 0 : i32
    return %c0_i32, %c0_i32_0 : i32, i32
  }
  func.func @transform_5(%arg0: i32) -> (i32, i32) {
    %c0_i32 = arith.constant 0 : i32
    %c0_i32_0 = arith.constant 0 : i32
    return %arg0, %c0_i32 : i32, i32
  }
}

module attributes {stable_mosaic.version = 11 : i64} {
  func.func @_fused_linear_kernel(%arg0: i32, %arg1: memref<16x128xbf16, #tpu.memory_space<vmem>>, %arg2: memref<128x32xbf16, #tpu.memory_space<vmem>>, %arg3: memref<1x32xf32, #tpu.memory_space<vmem>>, %arg4: memref<16x32xbf16, #tpu.memory_space<vmem>>, %arg5: memref<16x32xbf16, #tpu.memory_space<vmem>>) attributes {dimension_semantics = [#tpu.dimension_semantics<parallel>], iteration_bounds = array<i64: 2>, scalar_prefetch = 0 : i64, scratch_operands = 0 : i64, tpu.core_type = #tpu.core_type<tc>, window_params = [{transform_indices = @transform_0, window_bounds = array<i64: 16, 128>}, {pipeline_mode = #tpu.pipeline_mode<synchronous>, transform_indices = @transform_1, window_bounds = array<i64: 128, 32>}, {pipeline_mode = #tpu.pipeline_mode<synchronous>, transform_indices = @transform_2, window_bounds = array<i64: 1, 32>}, {transform_indices = @transform_3, window_bounds = array<i64: 16, 32>}, {transform_indices = @transform_4, window_bounds = array<i64: 16, 32>}]} {
    %c0 = arith.constant 0 : index
    %c0_0 = arith.constant 0 : index
    %0 = vector.load %arg1[%c0, %c0_0] : memref<16x128xbf16, #tpu.memory_space<vmem>>, vector<16x128xbf16>
    %c0_1 = arith.constant 0 : index
    %c0_2 = arith.constant 0 : index
    %1 = vector.load %arg2[%c0_1, %c0_2] : memref<128x32xbf16, #tpu.memory_space<vmem>>, vector<128x32xbf16>
    %cst = arith.constant dense<0.000000e+00> : vector<16x32xf32>
    %2 = tpu.matmul %0, %1, %cst {dimension_numbers = #tpu.dot_dimension_numbers<[1], [0], [0], [1], [0, 0, 1, 1], [], []>} : vector<16x128xbf16>, vector<128x32xbf16>, vector<16x32xf32> -> vector<16x32xf32>
    %c0_3 = arith.constant 0 : index
    %c0_4 = arith.constant 0 : index
    %3 = vector.load %arg3[%c0_3, %c0_4] : memref<1x32xf32, #tpu.memory_space<vmem>>, vector<1x32xf32>
    %4 = vector.broadcast %3 : vector<1x32xf32> to vector<16x32xf32>
    %5 = arith.addf %2, %4 : vector<16x32xf32>
    %c0_5 = arith.constant 0 : index
    %c0_6 = arith.constant 0 : index
    %6 = vector.load %arg4[%c0_5, %c0_6] : memref<16x32xbf16, #tpu.memory_space<vmem>>, vector<16x32xbf16>
    %7 = arith.extf %6 : vector<16x32xbf16> to vector<16x32xf32>
    %8 = arith.addf %5, %7 : vector<16x32xf32>
    %9 = arith.truncf %8 : vector<16x32xf32> to vector<16x32xbf16>
    %c0_7 = arith.constant 0 : index
    %c0_8 = arith.constant 0 : index
    %10 = vector.load %arg5[%c0_7, %c0_8] : memref<16x32xbf16, #tpu.memory_space<vmem>>, vector<16x32xbf16>
    tpu.vector_store %arg5[%c0_7, %c0_8], %9 {strides = array<i32>} : memref<16x32xbf16, #tpu.memory_space<vmem>>, vector<16x32xbf16>,
    return
  }
  func.func @transform_0(%arg0: i32) -> (i32, i32) {
    %c0_i32 = arith.constant 0 : i32
    %c0_i32_0 = arith.constant 0 : i32
    return %arg0, %c0_i32 : i32, i32
  }
  func.func @transform_1(%arg0: i32) -> (i32, i32) {
    %c0_i32 = arith.constant 0 : i32
    %c0_i32_0 = arith.constant 0 : i32
    %c0_i32_1 = arith.constant 0 : i32
    return %c0_i32, %c0_i32_0 : i32, i32
  }
  func.func @transform_2(%arg0: i32) -> (i32, i32) {
    %c0_i32 = arith.constant 0 : i32
    %c0_i32_0 = arith.constant 0 : i32
    %c0_i32_1 = arith.constant 0 : i32
    return %c0_i32, %c0_i32_0 : i32, i32
  }
  func.func @transform_3(%arg0: i32) -> (i32, i32) {
    %c0_i32 = arith.constant 0 : i32
    %c0_i32_0 = arith.constant 0 : i32
    return %arg0, %c0_i32 : i32, i32
  }
  func.func @transform_4(%arg0: i32) -> (i32, i32) {
    %c0_i32 = arith.constant 0 : i32
    %c0_i32_0 = arith.constant 0 : i32
    return %arg0, %c0_i32 : i32, i32
  }
}

module attributes {stable_mosaic.version = 11 : i64} {
  func.func @_fused_linear_kernel(%arg0: i32, %arg1: memref<16x32xbf16, #tpu.memory_space<vmem>>, %arg2: memref<1x32xf32, #tpu.memory_space<vmem>>, %arg3: memref<1x32xf32, #tpu.memory_space<vmem>>, %arg4: memref<32x48xbf16, #tpu.memory_space<vmem>>, %arg5: memref<16x48xbf16, #tpu.memory_space<vmem>>) attributes {dimension_semantics = [#tpu.dimension_semantics<parallel>], iteration_bounds = array<i64: 2>, scalar_prefetch = 0 : i64, scratch_operands = 0 : i64, tpu.core_type = #tpu.core_type<tc>, window_params = [{transform_indices = @transform_0, window_bounds = array<i64: 16, 32>}, {pipeline_mode = #tpu.pipeline_mode<synchronous>, transform_indices = @transform_1, window_bounds = array<i64: 1, 32>}, {pipeline_mode = #tpu.pipeline_mode<synchronous>, transform_indices = @transform_2, window_bounds = array<i64: 1, 32>}, {pipeline_mode = #tpu.pipeline_mode<synchronous>, transform_indices = @transform_3, window_bounds = array<i64: 32, 48>}, {transform_indices = @transform_4, window_bounds = array<i64: 16, 48>}]} {
    %c0 = arith.constant 0 : index
    %c0_0 = arith.constant 0 : index
    %0 = vector.load %arg1[%c0, %c0_0] : memref<16x32xbf16, #tpu.memory_space<vmem>>, vector<16x32xbf16>
    %1 = arith.extf %0 : vector<16x32xbf16> to vector<16x32xf32>
    %c0_1 = arith.constant 0 : index
    %c0_2 = arith.constant 0 : index
    %2 = vector.load %arg2[%c0_1, %c0_2] : memref<1x32xf32, #tpu.memory_space<vmem>>, vector<1x32xf32>
    %c0_3 = arith.constant 0 : index
    %c0_4 = arith.constant 0 : index
    %3 = vector.load %arg3[%c0_3, %c0_4] : memref<1x32xf32, #tpu.memory_space<vmem>>, vector<1x32xf32>
    %cst = arith.constant dense<0.000000e+00> : vector<16xf32>
    %4 = vector.multi_reduction <add>, %1, %cst [1] : vector<16x32xf32> to vector<16xf32>
    %5 = vector.shape_cast %4 : vector<16xf32> to vector<16x1xf32>
    %cst_5 = arith.constant 3.200000e+01 : f32
    %6 = vector.broadcast %cst_5 : f32 to vector<16x1xf32>
    %7 = arith.divf %5, %6 : vector<16x1xf32>
    %8 = vector.broadcast %7 : vector<16x1xf32> to vector<16x32xf32>
    %9 = arith.subf %1, %8 : vector<16x32xf32>
    %10 = arith.mulf %9, %9 : vector<16x32xf32>
    %cst_6 = arith.constant dense<0.000000e+00> : vector<16xf32>
    %11 = vector.multi_reduction <add>, %10, %cst_6 [1] : vector<16x32xf32> to vector<16xf32>
    %12 = vector.shape_cast %11 : vector<16xf32> to vector<16x1xf32>
    %cst_7 = arith.constant 3.200000e+01 : f32
    %13 = vector.broadcast %cst_7 : f32 to vector<16x1xf32>
    %14 = arith.divf %12, %13 : vector<16x1xf32>
    %cst_8 = arith.constant 9.99999974E-6 : f32
    %15 = vector.broadcast %cst_8 : f32 to vector<16x1xf32>
    %16 = arith.addf %14, %15 : vector<16x1xf32>
    %17 = math.rsqrt %16 : vector<16x1xf32>
    %18 = vector.broadcast %17 : vector<16x1xf32> to vector<16x32xf32>
    %19 = arith.mulf %9, %18 : vector<16x32xf32>
    %20 = vector.broadcast %2 : vector<1x32xf32> to vector<16x32xf32>
    %21 = arith.mulf %19, %20 : vector<16x32xf32>
    %22 = vector.broadcast %3 : vector<1x32xf32> to vector<16x32xf32>
    %23 = arith.addf %21, %22 : vector<16x32xf32>
    %24 = arith.truncf %23 : vector<16x32xf32> to vector<16x32xbf16>
    %c0_9 = arith.constant 0 : index
    %c0_10 = arith.constant 0 : index
    %25 = vector.load %arg4[%c0_9, %c0_10] : memref<32x48xbf16, #tpu.memory_space<vmem>>, vector<32x48xbf16>
    %cst_11 = arith.constant dense<0.000000e+00> : vector<16x48xf32>
    %26 = tpu.matmul %24, %25, %cst_11 {dimension_numbers = #tpu.dot_dimension_numbers<[1], [0], [0], [1], [0, 0, 1, 1], [], []>} : vector<16x32xbf16>, vector<32x48xbf16>, vector<16x48xf32> -> vector<16x48xf32>
    %27 = arith.truncf %26 : vector<16x48xf32> to vector<16x48xbf16>
    %c0_12 = arith.constant 0 : index
    %c0_13 = arith.constant 0 : index
    %28 = vector.load %arg5[%c0_12, %c0_13] : memref<16x48xbf16, #tpu.memory_space<vmem>>, vector<16x48xbf16>
    tpu.vector_store %arg5[%c0_12, %c0_13], %27 {strides = array<i32>} : memref<16x48xbf16, #tpu.memory_space<vmem>>, vector<16x48xbf16>,
    return
  }
  func.func @transform_0(%arg0: i32) -> (i32, i32) {
    %c0_i32 = arith.constant 0 : i32
    %c0_i32_0 = arith.constant 0 : i32
    return %arg0, %c0_i32 : i32, i32
  }
  func.func @transform_1(%arg0: i32) -> (i32, i32) {
    %c0_i32 = arith.constant 0 : i32
    %c0_i32_0 = arith.constant 0 : i32
    %c0_i32_1 = arith.constant 0 : i32
    return %c0_i32, %c0_i32_0 : i32, i32
  }
  func.func @transform_2(%arg0: i32) -> (i32, i32) {
    %c0_i32 = arith.constant 0 : i32
    %c0_i32_0 = arith.constant 0 : i32
    %c0_i32_1 = arith.constant 0 : i32
    return %c0_i32, %c0_i32_0 : i32, i32
  }
  func.func @transform_3(%arg0: i32) -> (i32, i32) {
    %c0_i32 = arith.constant 0 : i32
    %c0_i32_0 = arith.constant 0 : i32
    %c0_i32_1 = arith.constant 0 : i32
    return %c0_i32, %c0_i32_0 : i32, i32
  }
  func.func @transform_4(%arg0: i32) -> (i32, i32) {
    %c0_i32 = arith.constant 0 : i32
    %c0_i32_0 = arith.constant 0 : i32
    return %arg0, %c0_i32 : i32, i32
  }
}

module attributes {stable_mosaic.version = 11 : i64} {
  func.func @_attention_kernel(%arg0: i32, %arg1: memref<1x16x48xbf16, #tpu.memory_space<vmem>>, %arg2: memref<1x16x16xbf16, #tpu.memory_space<vmem>>) attributes {dimension_semantics = [#tpu.dimension_semantics<parallel>], iteration_bounds = array<i64: 2>, scalar_prefetch = 0 : i64, scratch_operands = 0 : i64, tpu.core_type = #tpu.core_type<tc>, window_params = [{transform_indices = @transform_0, window_bounds = array<i64: 1, 16, 48>}, {transform_indices = @transform_1, window_bounds = array<i64: 1, 16, 16>}]} {
    %c0 = arith.constant 0 : index
    %c0_0 = arith.constant 0 : index
    %c0_1 = arith.constant 0 : index
    %0 = vector.load %arg1[%c0, %c0_0, %c0_1] : memref<1x16x48xbf16, #tpu.memory_space<vmem>>, vector<1x16x48xbf16>
    %1 = vector.shape_cast %0 : vector<1x16x48xbf16> to vector<16x48xbf16>
    %2 = vector.extract_strided_slice %1 {offsets = [0, 0], sizes = [16, 16], strides = [1, 1]} : vector<16x48xbf16> to vector<16x16xbf16>
    %3 = arith.extf %2 : vector<16x16xbf16> to vector<16x16xf32>
    %cst = arith.constant 0.353553385 : f32
    %4 = vector.broadcast %cst : f32 to vector<16x16xf32>
    %5 = arith.mulf %3, %4 : vector<16x16xf32>
    %6 = arith.truncf %5 : vector<16x16xf32> to vector<16x16xbf16>
    %7 = vector.extract_strided_slice %6 {offsets = [0, 0], sizes = [16, 8], strides = [1, 1]} : vector<16x16xbf16> to vector<16x8xbf16>
    %8 = vector.extract_strided_slice %1 {offsets = [0, 16], sizes = [16, 8], strides = [1, 1]} : vector<16x48xbf16> to vector<16x8xbf16>
    %9 = vector.extract_strided_slice %1 {offsets = [0, 32], sizes = [16, 8], strides = [1, 1]} : vector<16x48xbf16> to vector<16x8xbf16>
    %cst_2 = arith.constant dense<0.000000e+00> : vector<16x16xf32>
    %10 = tpu.matmul %7, %8, %cst_2 {dimension_numbers = #tpu.dot_dimension_numbers<[1], [1], [0], [0], [0, 0, 1, 0], [], []>} : vector<16x8xbf16>, vector<16x8xbf16>, vector<16x16xf32> -> vector<16x16xf32>
    %cst_3 = arith.constant dense<0xFF800000> : vector<16xf32>
    %11 = vector.multi_reduction <maximumf>, %10, %cst_3 [1] : vector<16x16xf32> to vector<16xf32>
    %12 = vector.shape_cast %11 : vector<16xf32> to vector<16x1xf32>
    %13 = vector.broadcast %12 : vector<16x1xf32> to vector<16x16xf32>
    %14 = arith.subf %10, %13 : vector<16x16xf32>
    %15 = math.exp %14 : vector<16x16xf32>
    %cst_4 = arith.constant dense<0.000000e+00> : vector<16xf32>
    %16 = vector.multi_reduction <add>, %15, %cst_4 [1] : vector<16x16xf32> to vector<16xf32>
    %17 = vector.shape_cast %16 : vector<16xf32> to vector<16x1xf32>
    %18 = tpu.reciprocal %17 {approx = true} : vector<16x1xf32> -> vector<16x1xf32>
    %19 = vector.broadcast %18 : vector<16x1xf32> to vector<16x16xf32>
    %20 = arith.mulf %15, %19 : vector<16x16xf32>
    %21 = arith.truncf %20 : vector<16x16xf32> to vector<16x16xbf16>
    %cst_5 = arith.constant dense<0.000000e+00> : vector<16x8xf32>
    %22 = tpu.matmul %21, %9, %cst_5 {dimension_numbers = #tpu.dot_dimension_numbers<[1], [0], [0], [1], [0, 0, 1, 1], [], []>} : vector<16x16xbf16>, vector<16x8xbf16>, vector<16x8xf32> -> vector<16x8xf32>
    %23 = arith.truncf %22 : vector<16x8xf32> to vector<16x8xbf16>
    %c0_6 = arith.constant 0 : index
    %c0_7 = arith.constant 0 : index
    %c0_8 = arith.constant 0 : index
    %24 = vector.load %arg2[%c0_6, %c0_7, %c0_8] : memref<1x16x16xbf16, #tpu.memory_space<vmem>>, vector<1x16x8xbf16>
    %25 = vector.shape_cast %24 : vector<1x16x8xbf16> to vector<16x8xbf16>
    %26 = vector.shape_cast %23 : vector<16x8xbf16> to vector<1x16x8xbf16>
    tpu.vector_store %arg2[%c0_6, %c0_7, %c0_8], %26 {strides = array<i32>} : memref<1x16x16xbf16, #tpu.memory_space<vmem>>, vector<1x16x8xbf16>,
    %27 = vector.extract_strided_slice %6 {offsets = [0, 8], sizes = [16, 8], strides = [1, 1]} : vector<16x16xbf16> to vector<16x8xbf16>
    %28 = vector.extract_strided_slice %1 {offsets = [0, 24], sizes = [16, 8], strides = [1, 1]} : vector<16x48xbf16> to vector<16x8xbf16>
    %29 = vector.extract_strided_slice %1 {offsets = [0, 40], sizes = [16, 8], strides = [1, 1]} : vector<16x48xbf16> to vector<16x8xbf16>
    %cst_9 = arith.constant dense<0.000000e+00> : vector<16x16xf32>
    %30 = tpu.matmul %27, %28, %cst_9 {dimension_numbers = #tpu.dot_dimension_numbers<[1], [1], [0], [0], [0, 0, 1, 0], [], []>} : vector<16x8xbf16>, vector<16x8xbf16>, vector<16x16xf32> -> vector<16x16xf32>
    %cst_10 = arith.constant dense<0xFF800000> : vector<16xf32>
    %31 = vector.multi_reduction <maximumf>, %30, %cst_10 [1] : vector<16x16xf32> to vector<16xf32>
    %32 = vector.shape_cast %31 : vector<16xf32> to vector<16x1xf32>
    %33 = vector.broadcast %32 : vector<16x1xf32> to vector<16x16xf32>
    %34 = arith.subf %30, %33 : vector<16x16xf32>
    %35 = math.exp %34 : vector<16x16xf32>
    %cst_11 = arith.constant dense<0.000000e+00> : vector<16xf32>
    %36 = vector.multi_reduction <add>, %35, %cst_11 [1] : vector<16x16xf32> to vector<16xf32>
    %37 = vector.shape_cast %36 : vector<16xf32> to vector<16x1xf32>
    %38 = tpu.reciprocal %37 {approx = true} : vector<16x1xf32> -> vector<16x1xf32>
    %39 = vector.broadcast %38 : vector<16x1xf32> to vector<16x16xf32>
    %40 = arith.mulf %35, %39 : vector<16x16xf32>
    %41 = arith.truncf %40 : vector<16x16xf32> to vector<16x16xbf16>
    %cst_12 = arith.constant dense<0.000000e+00> : vector<16x8xf32>
    %42 = tpu.matmul %41, %29, %cst_12 {dimension_numbers = #tpu.dot_dimension_numbers<[1], [0], [0], [1], [0, 0, 1, 1], [], []>} : vector<16x16xbf16>, vector<16x8xbf16>, vector<16x8xf32> -> vector<16x8xf32>
    %43 = arith.truncf %42 : vector<16x8xf32> to vector<16x8xbf16>
    %c0_13 = arith.constant 0 : index
    %c0_14 = arith.constant 0 : index
    %c8 = arith.constant 8 : index
    %44 = vector.load %arg2[%c0_13, %c0_14, %c8] : memref<1x16x16xbf16, #tpu.memory_space<vmem>>, vector<1x16x8xbf16>
    %45 = vector.shape_cast %44 : vector<1x16x8xbf16> to vector<16x8xbf16>
    %46 = vector.shape_cast %43 : vector<16x8xbf16> to vector<1x16x8xbf16>
    tpu.vector_store %arg2[%c0_13, %c0_14, %c8], %46 {strides = array<i32>} : memref<1x16x16xbf16, #tpu.memory_space<vmem>>, vector<1x16x8xbf16>,
    return
  }
  func.func @transform_0(%arg0: i32) -> (i32, i32, i32) {
    %c0_i32 = arith.constant 0 : i32
    %c0_i32_0 = arith.constant 0 : i32
    %c0_i32_1 = arith.constant 0 : i32
    return %arg0, %c0_i32, %c0_i32_0 : i32, i32, i32
  }
  func.func @transform_1(%arg0: i32) -> (i32, i32, i32) {
    %c0_i32 = arith.constant 0 : i32
    %c0_i32_0 = arith.constant 0 : i32
    %c0_i32_1 = arith.constant 0 : i32
    return %arg0, %c0_i32, %c0_i32_0 : i32, i32, i32
  }
}

module attributes {stable_mosaic.version = 11 : i64} {
  func.func @_fused_linear_kernel(%arg0: i32, %arg1: memref<2x32xbf16, #tpu.memory_space<vmem>>, %arg2: memref<1x32xf32, #tpu.memory_space<vmem>>, %arg3: memref<1x32xf32, #tpu.memory_space<vmem>>, %arg4: memref<32x16xbf16, #tpu.memory_space<vmem>>, %arg5: memref<2x16xbf16, #tpu.memory_space<vmem>>) attributes {dimension_semantics = [#tpu.dimension_semantics<parallel>], iteration_bounds = array<i64: 1>, scalar_prefetch = 0 : i64, scratch_operands = 0 : i64, tpu.core_type = #tpu.core_type<tc>, window_params = [{transform_indices = @transform_0, window_bounds = array<i64: 2, 32>}, {pipeline_mode = #tpu.pipeline_mode<synchronous>, transform_indices = @transform_1, window_bounds = array<i64: 1, 32>}, {pipeline_mode = #tpu.pipeline_mode<synchronous>, transform_indices = @transform_2, window_bounds = array<i64: 1, 32>}, {pipeline_mode = #tpu.pipeline_mode<synchronous>, transform_indices = @transform_3, window_bounds = array<i64: 32, 16>}, {transform_indices = @transform_4, window_bounds = array<i64: 2, 16>}]} {
    %c0 = arith.constant 0 : index
    %c0_0 = arith.constant 0 : index
    %0 = vector.load %arg1[%c0, %c0_0] : memref<2x32xbf16, #tpu.memory_space<vmem>>, vector<2x32xbf16>
    %1 = arith.extf %0 : vector<2x32xbf16> to vector<2x32xf32>
    %c0_1 = arith.constant 0 : index
    %c0_2 = arith.constant 0 : index
    %2 = vector.load %arg2[%c0_1, %c0_2] : memref<1x32xf32, #tpu.memory_space<vmem>>, vector<1x32xf32>
    %c0_3 = arith.constant 0 : index
    %c0_4 = arith.constant 0 : index
    %3 = vector.load %arg3[%c0_3, %c0_4] : memref<1x32xf32, #tpu.memory_space<vmem>>, vector<1x32xf32>
    %cst = arith.constant dense<0.000000e+00> : vector<2xf32>
    %4 = vector.multi_reduction <add>, %1, %cst [1] : vector<2x32xf32> to vector<2xf32>
    %5 = vector.shape_cast %4 : vector<2xf32> to vector<2x1xf32>
    %cst_5 = arith.constant 3.200000e+01 : f32
    %6 = vector.broadcast %cst_5 : f32 to vector<2x1xf32>
    %7 = arith.divf %5, %6 : vector<2x1xf32>
    %8 = vector.broadcast %7 : vector<2x1xf32> to vector<2x32xf32>
    %9 = arith.subf %1, %8 : vector<2x32xf32>
    %10 = arith.mulf %9, %9 : vector<2x32xf32>
    %cst_6 = arith.constant dense<0.000000e+00> : vector<2xf32>
    %11 = vector.multi_reduction <add>, %10, %cst_6 [1] : vector<2x32xf32> to vector<2xf32>
    %12 = vector.shape_cast %11 : vector<2xf32> to vector<2x1xf32>
    %cst_7 = arith.constant 3.200000e+01 : f32
    %13 = vector.broadcast %cst_7 : f32 to vector<2x1xf32>
    %14 = arith.divf %12, %13 : vector<2x1xf32>
    %cst_8 = arith.constant 9.99999974E-6 : f32
    %15 = vector.broadcast %cst_8 : f32 to vector<2x1xf32>
    %16 = arith.addf %14, %15 : vector<2x1xf32>
    %17 = math.rsqrt %16 : vector<2x1xf32>
    %18 = vector.broadcast %17 : vector<2x1xf32> to vector<2x32xf32>
    %19 = arith.mulf %9, %18 : vector<2x32xf32>
    %20 = vector.broadcast %2 : vector<1x32xf32> to vector<2x32xf32>
    %21 = arith.mulf %19, %20 : vector<2x32xf32>
    %22 = vector.broadcast %3 : vector<1x32xf32> to vector<2x32xf32>
    %23 = arith.addf %21, %22 : vector<2x32xf32>
    %24 = arith.truncf %23 : vector<2x32xf32> to vector<2x32xbf16>
    %c0_9 = arith.constant 0 : index
    %c0_10 = arith.constant 0 : index
    %25 = vector.load %arg4[%c0_9, %c0_10] : memref<32x16xbf16, #tpu.memory_space<vmem>>, vector<32x16xbf16>
    %cst_11 = arith.constant dense<0.000000e+00> : vector<2x16xf32>
    %26 = tpu.matmul %24, %25, %cst_11 {dimension_numbers = #tpu.dot_dimension_numbers<[1], [0], [0], [1], [0, 0, 1, 1], [], []>} : vector<2x32xbf16>, vector<32x16xbf16>, vector<2x16xf32> -> vector<2x16xf32>
    %27 = arith.truncf %26 : vector<2x16xf32> to vector<2x16xbf16>
    %c0_12 = arith.constant 0 : index
    %c0_13 = arith.constant 0 : index
    %28 = vector.load %arg5[%c0_12, %c0_13] : memref<2x16xbf16, #tpu.memory_space<vmem>>, vector<2x16xbf16>
    tpu.vector_store %arg5[%c0_12, %c0_13], %27 {strides = array<i32>} : memref<2x16xbf16, #tpu.memory_space<vmem>>, vector<2x16xbf16>,
    return
  }
  func.func @transform_0(%arg0: i32) -> (i32, i32) {
    %c0_i32 = arith.constant 0 : i32
    %c0_i32_0 = arith.constant 0 : i32
    return %arg0, %c0_i32 : i32, i32
  }
  func.func @transform_1(%arg0: i32) -> (i32, i32) {
    %c0_i32 = arith.constant 0 : i32
    %c0_i32_0 = arith.constant 0 : i32
    %c0_i32_1 = arith.constant 0 : i32
    return %c0_i32, %c0_i32_0 : i32, i32
  }
  func.func @transform_2(%arg0: i32) -> (i32, i32) {
    %c0_i32 = arith.constant 0 : i32
    %c0_i32_0 = arith.constant 0 : i32
    %c0_i32_1 = arith.constant 0 : i32
    return %c0_i32, %c0_i32_0 : i32, i32
  }
  func.func @transform_3(%arg0: i32) -> (i32, i32) {
    %c0_i32 = arith.constant 0 : i32
    %c0_i32_0 = arith.constant 0 : i32
    %c0_i32_1 = arith.constant 0 : i32
    return %c0_i32, %c0_i32_0 : i32, i32
  }
  func.func @transform_4(%arg0: i32) -> (i32, i32) {
    %c0_i32 = arith.constant 0 : i32
    %c0_i32_0 = arith.constant 0 : i32
    return %arg0, %c0_i32 : i32, i32
  }
}

module attributes {stable_mosaic.version = 11 : i64} {
  func.func @_attention_kernel(%arg0: i32, %arg1: memref<1x1x16xbf16, #tpu.memory_space<vmem>>, %arg2: memref<1x16x32xbf16, #tpu.memory_space<vmem>>, %arg3: memref<1x1x16xbf16, #tpu.memory_space<vmem>>) attributes {dimension_semantics = [#tpu.dimension_semantics<parallel>], iteration_bounds = array<i64: 2>, scalar_prefetch = 0 : i64, scratch_operands = 0 : i64, tpu.core_type = #tpu.core_type<tc>, window_params = [{transform_indices = @transform_0, window_bounds = array<i64: 1, 1, 16>}, {transform_indices = @transform_1, window_bounds = array<i64: 1, 16, 32>}, {transform_indices = @transform_2, window_bounds = array<i64: 1, 1, 16>}]} {
    %c0 = arith.constant 0 : index
    %c0_0 = arith.constant 0 : index
    %c0_1 = arith.constant 0 : index
    %0 = vector.load %arg1[%c0, %c0_0, %c0_1] : memref<1x1x16xbf16, #tpu.memory_space<vmem>>, vector<1x1x16xbf16>
    %1 = vector.shape_cast %0 : vector<1x1x16xbf16> to vector<1x16xbf16>
    %c0_2 = arith.constant 0 : index
    %c0_3 = arith.constant 0 : index
    %c0_4 = arith.constant 0 : index
    %2 = vector.load %arg2[%c0_2, %c0_3, %c0_4] : memref<1x16x32xbf16, #tpu.memory_space<vmem>>, vector<1x16x32xbf16>
    %3 = vector.shape_cast %2 : vector<1x16x32xbf16> to vector<16x32xbf16>
    %4 = arith.extf %1 : vector<1x16xbf16> to vector<1x16xf32>
    %cst = arith.constant 0.353553385 : f32
    %5 = vector.broadcast %cst : f32 to vector<1x16xf32>
    %6 = arith.mulf %4, %5 : vector<1x16xf32>
    %7 = arith.truncf %6 : vector<1x16xf32> to vector<1x16xbf16>
    %8 = vector.extract_strided_slice %7 {offsets = [0, 0], sizes = [1, 8], strides = [1, 1]} : vector<1x16xbf16> to vector<1x8xbf16>
    %9 = vector.extract_strided_slice %3 {offsets = [0, 0], sizes = [16, 8], strides = [1, 1]} : vector<16x32xbf16> to vector<16x8xbf16>
    %10 = vector.extract_strided_slice %3 {offsets = [0, 16], sizes = [16, 8], strides = [1, 1]} : vector<16x32xbf16> to vector<16x8xbf16>
    %cst_5 = arith.constant dense<0.000000e+00> : vector<1x16xf32>
    %11 = tpu.matmul %8, %9, %cst_5 {dimension_numbers = #tpu.dot_dimension_numbers<[1], [1], [0], [0], [0, 0, 1, 0], [], []>} : vector<1x8xbf16>, vector<16x8xbf16>, vector<1x16xf32> -> vector<1x16xf32>
    %cst_6 = arith.constant dense<0xFF800000> : vector<1xf32>
    %12 = vector.multi_reduction <maximumf>, %11, %cst_6 [1] : vector<1x16xf32> to vector<1xf32>
    %13 = vector.shape_cast %12 : vector<1xf32> to vector<1x1xf32>
    %14 = vector.broadcast %13 : vector<1x1xf32> to vector<1x16xf32>
    %15 = arith.subf %11, %14 : vector<1x16xf32>
    %16 = math.exp %15 : vector<1x16xf32>
    %cst_7 = arith.constant dense<0.000000e+00> : vector<1xf32>
    %17 = vector.multi_reduction <add>, %16, %cst_7 [1] : vector<1x16xf32> to vector<1xf32>
    %18 = vector.shape_cast %17 : vector<1xf32> to vector<1x1xf32>
    %19 = tpu.reciprocal %18 {approx = true} : vector<1x1xf32> -> vector<1x1xf32>
    %20 = vector.broadcast %19 : vector<1x1xf32> to vector<1x16xf32>
    %21 = arith.mulf %16, %20 : vector<1x16xf32>
    %22 = arith.truncf %21 : vector<1x16xf32> to vector<1x16xbf16>
    %cst_8 = arith.constant dense<0.000000e+00> : vector<1x8xf32>
    %23 = tpu.matmul %22, %10, %cst_8 {dimension_numbers = #tpu.dot_dimension_numbers<[1], [0], [0], [1], [0, 0, 1, 1], [], []>} : vector<1x16xbf16>, vector<16x8xbf16>, vector<1x8xf32> -> vector<1x8xf32>
    %24 = arith.truncf %23 : vector<1x8xf32> to vector<1x8xbf16>
    %c0_9 = arith.constant 0 : index
    %c0_10 = arith.constant 0 : index
    %c0_11 = arith.constant 0 : index
    %25 = vector.load %arg3[%c0_9, %c0_10, %c0_11] : memref<1x1x16xbf16, #tpu.memory_space<vmem>>, vector<1x1x8xbf16>
    %26 = vector.shape_cast %25 : vector<1x1x8xbf16> to vector<1x8xbf16>
    %27 = vector.shape_cast %24 : vector<1x8xbf16> to vector<1x1x8xbf16>
    tpu.vector_store %arg3[%c0_9, %c0_10, %c0_11], %27 {strides = array<i32>} : memref<1x1x16xbf16, #tpu.memory_space<vmem>>, vector<1x1x8xbf16>,
    %28 = vector.extract_strided_slice %7 {offsets = [0, 8], sizes = [1, 8], strides = [1, 1]} : vector<1x16xbf16> to vector<1x8xbf16>
    %29 = vector.extract_strided_slice %3 {offsets = [0, 8], sizes = [16, 8], strides = [1, 1]} : vector<16x32xbf16> to vector<16x8xbf16>
    %30 = vector.extract_strided_slice %3 {offsets = [0, 24], sizes = [16, 8], strides = [1, 1]} : vector<16x32xbf16> to vector<16x8xbf16>
    %cst_12 = arith.constant dense<0.000000e+00> : vector<1x16xf32>
    %31 = tpu.matmul %28, %29, %cst_12 {dimension_numbers = #tpu.dot_dimension_numbers<[1], [1], [0], [0], [0, 0, 1, 0], [], []>} : vector<1x8xbf16>, vector<16x8xbf16>, vector<1x16xf32> -> vector<1x16xf32>
    %cst_13 = arith.constant dense<0xFF800000> : vector<1xf32>
    %32 = vector.multi_reduction <maximumf>, %31, %cst_13 [1] : vector<1x16xf32> to vector<1xf32>
    %33 = vector.shape_cast %32 : vector<1xf32> to vector<1x1xf32>
    %34 = vector.broadcast %33 : vector<1x1xf32> to vector<1x16xf32>
    %35 = arith.subf %31, %34 : vector<1x16xf32>
    %36 = math.exp %35 : vector<1x16xf32>
    %cst_14 = arith.constant dense<0.000000e+00> : vector<1xf32>
    %37 = vector.multi_reduction <add>, %36, %cst_14 [1] : vector<1x16xf32> to vector<1xf32>
    %38 = vector.shape_cast %37 : vector<1xf32> to vector<1x1xf32>
    %39 = tpu.reciprocal %38 {approx = true} : vector<1x1xf32> -> vector<1x1xf32>
    %40 = vector.broadcast %39 : vector<1x1xf32> to vector<1x16xf32>
    %41 = arith.mulf %36, %40 : vector<1x16xf32>
    %42 = arith.truncf %41 : vector<1x16xf32> to vector<1x16xbf16>
    %cst_15 = arith.constant dense<0.000000e+00> : vector<1x8xf32>
    %43 = tpu.matmul %42, %30, %cst_15 {dimension_numbers = #tpu.dot_dimension_numbers<[1], [0], [0], [1], [0, 0, 1, 1], [], []>} : vector<1x16xbf16>, vector<16x8xbf16>, vector<1x8xf32> -> vector<1x8xf32>
    %44 = arith.truncf %43 : vector<1x8xf32> to vector<1x8xbf16>
    %c0_16 = arith.constant 0 : index
    %c0_17 = arith.constant 0 : index
    %c8 = arith.constant 8 : index
    %45 = vector.load %arg3[%c0_16, %c0_17, %c8] : memref<1x1x16xbf16, #tpu.memory_space<vmem>>, vector<1x1x8xbf16>
    %46 = vector.shape_cast %45 : vector<1x1x8xbf16> to vector<1x8xbf16>
    %47 = vector.shape_cast %44 : vector<1x8xbf16> to vector<1x1x8xbf16>
    tpu.vector_store %arg3[%c0_16, %c0_17, %c8], %47 {strides = array<i32>} : memref<1x1x16xbf16, #tpu.memory_space<vmem>>, vector<1x1x8xbf16>,
    return
  }
  func.func @transform_0(%arg0: i32) -> (i32, i32, i32) {
    %c0_i32 = arith.constant 0 : i32
    %c0_i32_0 = arith.constant 0 : i32
    %c0_i32_1 = arith.constant 0 : i32
    return %arg0, %c0_i32, %c0_i32_0 : i32, i32, i32
  }
  func.func @transform_1(%arg0: i32) -> (i32, i32, i32) {
    %c0_i32 = arith.constant 0 : i32
    %c0_i32_0 = arith.constant 0 : i32
    %c0_i32_1 = arith.constant 0 : i32
    return %arg0, %c0_i32, %c0_i32_0 : i32, i32, i32
  }
  func.func @transform_2(%arg0: i32) -> (i32, i32, i32) {
    %c0_i32 = arith.constant 0 : i32
    %c0_i32_0 = arith.constant 0 : i32
    %c0_i32_1 = arith.constant 0 : i32
    return %arg0, %c0_i32, %c0_i32_0 : i32, i32, i32
  }
}

module attributes {stable_mosaic.version = 11 : i64} {
  func.func @_fused_linear_kernel(%arg0: i32, %arg1: memref<2x16xbf16, #tpu.memory_space<vmem>>, %arg2: memref<16x32xbf16, #tpu.memory_space<vmem>>, %arg3: memref<1x32xf32, #tpu.memory_space<vmem>>, %arg4: memref<2x32xbf16, #tpu.memory_space<vmem>>, %arg5: memref<2x32xbf16, #tpu.memory_space<vmem>>) attributes {dimension_semantics = [#tpu.dimension_semantics<parallel>], iteration_bounds = array<i64: 1>, scalar_prefetch = 0 : i64, scratch_operands = 0 : i64, tpu.core_type = #tpu.core_type<tc>, window_params = [{transform_indices = @transform_0, window_bounds = array<i64: 2, 16>}, {pipeline_mode = #tpu.pipeline_mode<synchronous>, transform_indices = @transform_1, window_bounds = array<i64: 16, 32>}, {pipeline_mode = #tpu.pipeline_mode<synchronous>, transform_indices = @transform_2, window_bounds = array<i64: 1, 32>}, {transform_indices = @transform_3, window_bounds = array<i64: 2, 32>}, {transform_indices = @transform_4, window_bounds = array<i64: 2, 32>}]} {
    %c0 = arith.constant 0 : index
    %c0_0 = arith.constant 0 : index
    %0 = vector.load %arg1[%c0, %c0_0] : memref<2x16xbf16, #tpu.memory_space<vmem>>, vector<2x16xbf16>
    %c0_1 = arith.constant 0 : index
    %c0_2 = arith.constant 0 : index
    %1 = vector.load %arg2[%c0_1, %c0_2] : memref<16x32xbf16, #tpu.memory_space<vmem>>, vector<16x32xbf16>
    %cst = arith.constant dense<0.000000e+00> : vector<2x32xf32>
    %2 = tpu.matmul %0, %1, %cst {dimension_numbers = #tpu.dot_dimension_numbers<[1], [0], [0], [1], [0, 0, 1, 1], [], []>} : vector<2x16xbf16>, vector<16x32xbf16>, vector<2x32xf32> -> vector<2x32xf32>
    %c0_3 = arith.constant 0 : index
    %c0_4 = arith.constant 0 : index
    %3 = vector.load %arg3[%c0_3, %c0_4] : memref<1x32xf32, #tpu.memory_space<vmem>>, vector<1x32xf32>
    %4 = vector.broadcast %3 : vector<1x32xf32> to vector<2x32xf32>
    %5 = arith.addf %2, %4 : vector<2x32xf32>
    %c0_5 = arith.constant 0 : index
    %c0_6 = arith.constant 0 : index
    %6 = vector.load %arg4[%c0_5, %c0_6] : memref<2x32xbf16, #tpu.memory_space<vmem>>, vector<2x32xbf16>
    %7 = arith.extf %6 : vector<2x32xbf16> to vector<2x32xf32>
    %8 = arith.addf %5, %7 : vector<2x32xf32>
    %9 = arith.truncf %8 : vector<2x32xf32> to vector<2x32xbf16>
    %c0_7 = arith.constant 0 : index
    %c0_8 = arith.constant 0 : index
    %10 = vector.load %arg5[%c0_7, %c0_8] : memref<2x32xbf16, #tpu.memory_space<vmem>>, vector<2x32xbf16>
    tpu.vector_store %arg5[%c0_7, %c0_8], %9 {strides = array<i32>} : memref<2x32xbf16, #tpu.memory_space<vmem>>, vector<2x32xbf16>,
    return
  }
  func.func @transform_0(%arg0: i32) -> (i32, i32) {
    %c0_i32 = arith.constant 0 : i32
    %c0_i32_0 = arith.constant 0 : i32
    return %arg0, %c0_i32 : i32, i32
  }
  func.func @transform_1(%arg0: i32) -> (i32, i32) {
    %c0_i32 = arith.constant 0 : i32
    %c0_i32_0 = arith.constant 0 : i32
    %c0_i32_1 = arith.constant 0 : i32
    return %c0_i32, %c0_i32_0 : i32, i32
  }
  func.func @transform_2(%arg0: i32) -> (i32, i32) {
    %c0_i32 = arith.constant 0 : i32
    %c0_i32_0 = arith.constant 0 : i32
    %c0_i32_1 = arith.constant 0 : i32
    return %c0_i32, %c0_i32_0 : i32, i32
  }
  func.func @transform_3(%arg0: i32) -> (i32, i32) {
    %c0_i32 = arith.constant 0 : i32
    %c0_i32_0 = arith.constant 0 : i32
    return %arg0, %c0_i32 : i32, i32
  }
  func.func @transform_4(%arg0: i32) -> (i32, i32) {
    %c0_i32 = arith.constant 0 : i32
    %c0_i32_0 = arith.constant 0 : i32
    return %arg0, %c0_i32 : i32, i32
  }
}

module attributes {stable_mosaic.version = 11 : i64} {
  func.func @_fused_linear_kernel(%arg0: i32, %arg1: memref<2x32xbf16, #tpu.memory_space<vmem>>, %arg2: memref<1x32xf32, #tpu.memory_space<vmem>>, %arg3: memref<1x32xf32, #tpu.memory_space<vmem>>, %arg4: memref<32x128xbf16, #tpu.memory_space<vmem>>, %arg5: memref<1x128xf32, #tpu.memory_space<vmem>>, %arg6: memref<2x128xbf16, #tpu.memory_space<vmem>>) attributes {dimension_semantics = [#tpu.dimension_semantics<parallel>], iteration_bounds = array<i64: 1>, scalar_prefetch = 0 : i64, scratch_operands = 0 : i64, tpu.core_type = #tpu.core_type<tc>, window_params = [{transform_indices = @transform_0, window_bounds = array<i64: 2, 32>}, {pipeline_mode = #tpu.pipeline_mode<synchronous>, transform_indices = @transform_1, window_bounds = array<i64: 1, 32>}, {pipeline_mode = #tpu.pipeline_mode<synchronous>, transform_indices = @transform_2, window_bounds = array<i64: 1, 32>}, {pipeline_mode = #tpu.pipeline_mode<synchronous>, transform_indices = @transform_3, window_bounds = array<i64: 32, 128>}, {pipeline_mode = #tpu.pipeline_mode<synchronous>, transform_indices = @transform_4, window_bounds = array<i64: 1, 128>}, {transform_indices = @transform_5, window_bounds = array<i64: 2, 128>}]} {
    %c0 = arith.constant 0 : index
    %c0_0 = arith.constant 0 : index
    %0 = vector.load %arg1[%c0, %c0_0] : memref<2x32xbf16, #tpu.memory_space<vmem>>, vector<2x32xbf16>
    %1 = arith.extf %0 : vector<2x32xbf16> to vector<2x32xf32>
    %c0_1 = arith.constant 0 : index
    %c0_2 = arith.constant 0 : index
    %2 = vector.load %arg2[%c0_1, %c0_2] : memref<1x32xf32, #tpu.memory_space<vmem>>, vector<1x32xf32>
    %c0_3 = arith.constant 0 : index
    %c0_4 = arith.constant 0 : index
    %3 = vector.load %arg3[%c0_3, %c0_4] : memref<1x32xf32, #tpu.memory_space<vmem>>, vector<1x32xf32>
    %cst = arith.constant dense<0.000000e+00> : vector<2xf32>
    %4 = vector.multi_reduction <add>, %1, %cst [1] : vector<2x32xf32> to vector<2xf32>
    %5 = vector.shape_cast %4 : vector<2xf32> to vector<2x1xf32>
    %cst_5 = arith.constant 3.200000e+01 : f32
    %6 = vector.broadcast %cst_5 : f32 to vector<2x1xf32>
    %7 = arith.divf %5, %6 : vector<2x1xf32>
    %8 = vector.broadcast %7 : vector<2x1xf32> to vector<2x32xf32>
    %9 = arith.subf %1, %8 : vector<2x32xf32>
    %10 = arith.mulf %9, %9 : vector<2x32xf32>
    %cst_6 = arith.constant dense<0.000000e+00> : vector<2xf32>
    %11 = vector.multi_reduction <add>, %10, %cst_6 [1] : vector<2x32xf32> to vector<2xf32>
    %12 = vector.shape_cast %11 : vector<2xf32> to vector<2x1xf32>
    %cst_7 = arith.constant 3.200000e+01 : f32
    %13 = vector.broadcast %cst_7 : f32 to vector<2x1xf32>
    %14 = arith.divf %12, %13 : vector<2x1xf32>
    %cst_8 = arith.constant 9.99999974E-6 : f32
    %15 = vector.broadcast %cst_8 : f32 to vector<2x1xf32>
    %16 = arith.addf %14, %15 : vector<2x1xf32>
    %17 = math.rsqrt %16 : vector<2x1xf32>
    %18 = vector.broadcast %17 : vector<2x1xf32> to vector<2x32xf32>
    %19 = arith.mulf %9, %18 : vector<2x32xf32>
    %20 = vector.broadcast %2 : vector<1x32xf32> to vector<2x32xf32>
    %21 = arith.mulf %19, %20 : vector<2x32xf32>
    %22 = vector.broadcast %3 : vector<1x32xf32> to vector<2x32xf32>
    %23 = arith.addf %21, %22 : vector<2x32xf32>
    %24 = arith.truncf %23 : vector<2x32xf32> to vector<2x32xbf16>
    %c0_9 = arith.constant 0 : index
    %c0_10 = arith.constant 0 : index
    %25 = vector.load %arg4[%c0_9, %c0_10] : memref<32x128xbf16, #tpu.memory_space<vmem>>, vector<32x128xbf16>
    %cst_11 = arith.constant dense<0.000000e+00> : vector<2x128xf32>
    %26 = tpu.matmul %24, %25, %cst_11 {dimension_numbers = #tpu.dot_dimension_numbers<[1], [0], [0], [1], [0, 0, 1, 1], [], []>} : vector<2x32xbf16>, vector<32x128xbf16>, vector<2x128xf32> -> vector<2x128xf32>
    %c0_12 = arith.constant 0 : index
    %c0_13 = arith.constant 0 : index
    %27 = vector.load %arg5[%c0_12, %c0_13] : memref<1x128xf32, #tpu.memory_space<vmem>>, vector<1x128xf32>
    %28 = vector.broadcast %27 : vector<1x128xf32> to vector<2x128xf32>
    %29 = arith.addf %26, %28 : vector<2x128xf32>
    %cst_14 = arith.constant 5.000000e-01 : f32
    %30 = vector.broadcast %cst_14 : f32 to vector<2x128xf32>
    %31 = arith.mulf %30, %29 : vector<2x128xf32>
    %cst_15 = arith.constant 4.471500e-02 : f32
    %32 = vector.broadcast %cst_15 : f32 to vector<2x128xf32>
    %33 = arith.mulf %32, %29 : vector<2x128xf32>
    %34 = arith.mulf %33, %29 : vector<2x128xf32>
    %35 = arith.mulf %34, %29 : vector<2x128xf32>
    %36 = arith.addf %29, %35 : vector<2x128xf32>
    %cst_16 = arith.constant 0.797884583 : f32
    %37 = vector.broadcast %cst_16 : f32 to vector<2x128xf32>
    %38 = arith.mulf %37, %36 : vector<2x128xf32>
    %39 = math.tanh %38 : vector<2x128xf32>
    %cst_17 = arith.constant 1.000000e+00 : f32
    %40 = vector.broadcast %cst_17 : f32 to vector<2x128xf32>
    %41 = arith.addf %40, %39 : vector<2x128xf32>
    %42 = arith.mulf %31, %41 : vector<2x128xf32>
    %43 = arith.truncf %42 : vector<2x128xf32> to vector<2x128xbf16>
    %c0_18 = arith.constant 0 : index
    %c0_19 = arith.constant 0 : index
    %44 = vector.load %arg6[%c0_18, %c0_19] : memref<2x128xbf16, #tpu.memory_space<vmem>>, vector<2x128xbf16>
    tpu.vector_store %arg6[%c0_18, %c0_19], %43 {strides = array<i32>} : memref<2x128xbf16, #tpu.memory_space<vmem>>, vector<2x128xbf16>,
    return
  }
  func.func @transform_0(%arg0: i32) -> (i32, i32) {
    %c0_i32 = arith.constant 0 : i32
    %c0_i32_0 = arith.constant 0 : i32
    return %arg0, %c0_i32 : i32, i32
  }
  func.func @transform_1(%arg0: i32) -> (i32, i32) {
    %c0_i32 = arith.constant 0 : i32
    %c0_i32_0 = arith.constant 0 : i32
    %c0_i32_1 = arith.constant 0 : i32
    return %c0_i32, %c0_i32_0 : i32, i32
  }
  func.func @transform_2(%arg0: i32) -> (i32, i32) {
    %c0_i32 = arith.constant 0 : i32
    %c0_i32_0 = arith.constant 0 : i32
    %c0_i32_1 = arith.constant 0 : i32
    return %c0_i32, %c0_i32_0 : i32, i32
  }
  func.func @transform_3(%arg0: i32) -> (i32, i32) {
    %c0_i32 = arith.constant 0 : i32
    %c0_i32_0 = arith.constant 0 : i32
    %c0_i32_1 = arith.constant 0 : i32
    return %c0_i32, %c0_i32_0 : i32, i32
  }
  func.func @transform_4(%arg0: i32) -> (i32, i32) {
    %c0_i32 = arith.constant 0 : i32
    %c0_i32_0 = arith.constant 0 : i32
    %c0_i32_1 = arith.constant 0 : i32
    return %c0_i32, %c0_i32_0 : i32, i32
  }
  func.func @transform_5(%arg0: i32) -> (i32, i32) {
    %c0_i32 = arith.constant 0 : i32
    %c0_i32_0 = arith.constant 0 : i32
    return %arg0, %c0_i32 : i32, i32
  }
}

module attributes {stable_mosaic.version = 11 : i64} {
  func.func @_fused_linear_kernel(%arg0: i32, %arg1: memref<2x128xbf16, #tpu.memory_space<vmem>>, %arg2: memref<128x32xbf16, #tpu.memory_space<vmem>>, %arg3: memref<1x32xf32, #tpu.memory_space<vmem>>, %arg4: memref<2x32xbf16, #tpu.memory_space<vmem>>, %arg5: memref<2x32xbf16, #tpu.memory_space<vmem>>) attributes {dimension_semantics = [#tpu.dimension_semantics<parallel>], iteration_bounds = array<i64: 1>, scalar_prefetch = 0 : i64, scratch_operands = 0 : i64, tpu.core_type = #tpu.core_type<tc>, window_params = [{transform_indices = @transform_0, window_bounds = array<i64: 2, 128>}, {pipeline_mode = #tpu.pipeline_mode<synchronous>, transform_indices = @transform_1, window_bounds = array<i64: 128, 32>}, {pipeline_mode = #tpu.pipeline_mode<synchronous>, transform_indices = @transform_2, window_bounds = array<i64: 1, 32>}, {transform_indices = @transform_3, window_bounds = array<i64: 2, 32>}, {transform_indices = @transform_4, window_bounds = array<i64: 2, 32>}]} {
    %c0 = arith.constant 0 : index
    %c0_0 = arith.constant 0 : index
    %0 = vector.load %arg1[%c0, %c0_0] : memref<2x128xbf16, #tpu.memory_space<vmem>>, vector<2x128xbf16>
    %c0_1 = arith.constant 0 : index
    %c0_2 = arith.constant 0 : index
    %1 = vector.load %arg2[%c0_1, %c0_2] : memref<128x32xbf16, #tpu.memory_space<vmem>>, vector<128x32xbf16>
    %cst = arith.constant dense<0.000000e+00> : vector<2x32xf32>
    %2 = tpu.matmul %0, %1, %cst {dimension_numbers = #tpu.dot_dimension_numbers<[1], [0], [0], [1], [0, 0, 1, 1], [], []>} : vector<2x128xbf16>, vector<128x32xbf16>, vector<2x32xf32> -> vector<2x32xf32>
    %c0_3 = arith.constant 0 : index
    %c0_4 = arith.constant 0 : index
    %3 = vector.load %arg3[%c0_3, %c0_4] : memref<1x32xf32, #tpu.memory_space<vmem>>, vector<1x32xf32>
    %4 = vector.broadcast %3 : vector<1x32xf32> to vector<2x32xf32>
    %5 = arith.addf %2, %4 : vector<2x32xf32>
    %c0_5 = arith.constant 0 : index
    %c0_6 = arith.constant 0 : index
    %6 = vector.load %arg4[%c0_5, %c0_6] : memref<2x32xbf16, #tpu.memory_space<vmem>>, vector<2x32xbf16>
    %7 = arith.extf %6 : vector<2x32xbf16> to vector<2x32xf32>
    %8 = arith.addf %5, %7 : vector<2x32xf32>
    %9 = arith.truncf %8 : vector<2x32xf32> to vector<2x32xbf16>
    %c0_7 = arith.constant 0 : index
    %c0_8 = arith.constant 0 : index
    %10 = vector.load %arg5[%c0_7, %c0_8] : memref<2x32xbf16, #tpu.memory_space<vmem>>, vector<2x32xbf16>
    tpu.vector_store %arg5[%c0_7, %c0_8], %9 {strides = array<i32>} : memref<2x32xbf16, #tpu.memory_space<vmem>>, vector<2x32xbf16>,
    return
  }
  func.func @transform_0(%arg0: i32) -> (i32, i32) {
    %c0_i32 = arith.constant 0 : i32
    %c0_i32_0 = arith.constant 0 : i32
    return %arg0, %c0_i32 : i32, i32
  }
  func.func @transform_1(%arg0: i32) -> (i32, i32) {
    %c0_i32 = arith.constant 0 : i32
    %c0_i32_0 = arith.constant 0 : i32
    %c0_i32_1 = arith.constant 0 : i32
    return %c0_i32, %c0_i32_0 : i32, i32
  }
  func.func @transform_2(%arg0: i32) -> (i32, i32) {
    %c0_i32 = arith.constant 0 : i32
    %c0_i32_0 = arith.constant 0 : i32
    %c0_i32_1 = arith.constant 0 : i32
    return %c0_i32, %c0_i32_0 : i32, i32
  }
  func.func @transform_3(%arg0: i32) -> (i32, i32) {
    %c0_i32 = arith.constant 0 : i32
    %c0_i32_0 = arith.constant 0 : i32
    return %arg0, %c0_i32 : i32, i32
  }
  func.func @transform_4(%arg0: i32) -> (i32, i32) {
    %c0_i32 = arith.constant 0 : i32
    %c0_i32_0 = arith.constant 0 : i32
    return %arg0, %c0_i32 : i32, i32
  }
}

module attributes {stable_mosaic.version = 11 : i64} {
  func.func @_fused_linear_kernel(%arg0: i32, %arg1: memref<2x32xbf16, #tpu.memory_space<vmem>>, %arg2: memref<1x32xf32, #tpu.memory_space<vmem>>, %arg3: memref<1x32xf32, #tpu.memory_space<vmem>>, %arg4: memref<32x128xbf16, #tpu.memory_space<vmem>>, %arg5: memref<1x128xf32, #tpu.memory_space<vmem>>, %arg6: memref<2x128xf32, #tpu.memory_space<vmem>>) attributes {dimension_semantics = [#tpu.dimension_semantics<parallel>], iteration_bounds = array<i64: 1>, scalar_prefetch = 0 : i64, scratch_operands = 0 : i64, tpu.core_type = #tpu.core_type<tc>, window_params = [{transform_indices = @transform_0, window_bounds = array<i64: 2, 32>}, {pipeline_mode = #tpu.pipeline_mode<synchronous>, transform_indices = @transform_1, window_bounds = array<i64: 1, 32>}, {pipeline_mode = #tpu.pipeline_mode<synchronous>, transform_indices = @transform_2, window_bounds = array<i64: 1, 32>}, {pipeline_mode = #tpu.pipeline_mode<synchronous>, transform_indices = @transform_3, window_bounds = array<i64: 32, 128>}, {pipeline_mode = #tpu.pipeline_mode<synchronous>, transform_indices = @transform_4, window_bounds = array<i64: 1, 128>}, {transform_indices = @transform_5, window_bounds = array<i64: 2, 128>}]} {
    %c0 = arith.constant 0 : index
    %c0_0 = arith.constant 0 : index
    %0 = vector.load %arg1[%c0, %c0_0] : memref<2x32xbf16, #tpu.memory_space<vmem>>, vector<2x32xbf16>
    %1 = arith.extf %0 : vector<2x32xbf16> to vector<2x32xf32>
    %c0_1 = arith.constant 0 : index
    %c0_2 = arith.constant 0 : index
    %2 = vector.load %arg2[%c0_1, %c0_2] : memref<1x32xf32, #tpu.memory_space<vmem>>, vector<1x32xf32>
    %c0_3 = arith.constant 0 : index
    %c0_4 = arith.constant 0 : index
    %3 = vector.load %arg3[%c0_3, %c0_4] : memref<1x32xf32, #tpu.memory_space<vmem>>, vector<1x32xf32>
    %cst = arith.constant dense<0.000000e+00> : vector<2xf32>
    %4 = vector.multi_reduction <add>, %1, %cst [1] : vector<2x32xf32> to vector<2xf32>
    %5 = vector.shape_cast %4 : vector<2xf32> to vector<2x1xf32>
    %cst_5 = arith.constant 3.200000e+01 : f32
    %6 = vector.broadcast %cst_5 : f32 to vector<2x1xf32>
    %7 = arith.divf %5, %6 : vector<2x1xf32>
    %8 = vector.broadcast %7 : vector<2x1xf32> to vector<2x32xf32>
    %9 = arith.subf %1, %8 : vector<2x32xf32>
    %10 = arith.mulf %9, %9 : vector<2x32xf32>
    %cst_6 = arith.constant dense<0.000000e+00> : vector<2xf32>
    %11 = vector.multi_reduction <add>, %10, %cst_6 [1] : vector<2x32xf32> to vector<2xf32>
    %12 = vector.shape_cast %11 : vector<2xf32> to vector<2x1xf32>
    %cst_7 = arith.constant 3.200000e+01 : f32
    %13 = vector.broadcast %cst_7 : f32 to vector<2x1xf32>
    %14 = arith.divf %12, %13 : vector<2x1xf32>
    %cst_8 = arith.constant 9.99999974E-6 : f32
    %15 = vector.broadcast %cst_8 : f32 to vector<2x1xf32>
    %16 = arith.addf %14, %15 : vector<2x1xf32>
    %17 = math.rsqrt %16 : vector<2x1xf32>
    %18 = vector.broadcast %17 : vector<2x1xf32> to vector<2x32xf32>
    %19 = arith.mulf %9, %18 : vector<2x32xf32>
    %20 = vector.broadcast %2 : vector<1x32xf32> to vector<2x32xf32>
    %21 = arith.mulf %19, %20 : vector<2x32xf32>
    %22 = vector.broadcast %3 : vector<1x32xf32> to vector<2x32xf32>
    %23 = arith.addf %21, %22 : vector<2x32xf32>
    %24 = arith.truncf %23 : vector<2x32xf32> to vector<2x32xbf16>
    %c0_9 = arith.constant 0 : index
    %c0_10 = arith.constant 0 : index
    %25 = vector.load %arg4[%c0_9, %c0_10] : memref<32x128xbf16, #tpu.memory_space<vmem>>, vector<32x128xbf16>
    %cst_11 = arith.constant dense<0.000000e+00> : vector<2x128xf32>
    %26 = tpu.matmul %24, %25, %cst_11 {dimension_numbers = #tpu.dot_dimension_numbers<[1], [0], [0], [1], [0, 0, 1, 1], [], []>} : vector<2x32xbf16>, vector<32x128xbf16>, vector<2x128xf32> -> vector<2x128xf32>
    %c0_12 = arith.constant 0 : index
    %c0_13 = arith.constant 0 : index
    %27 = vector.load %arg5[%c0_12, %c0_13] : memref<1x128xf32, #tpu.memory_space<vmem>>, vector<1x128xf32>
    %28 = vector.broadcast %27 : vector<1x128xf32> to vector<2x128xf32>
    %29 = arith.addf %26, %28 : vector<2x128xf32>
    %c0_14 = arith.constant 0 : index
    %c0_15 = arith.constant 0 : index
    %30 = vector.load %arg6[%c0_14, %c0_15] : memref<2x128xf32, #tpu.memory_space<vmem>>, vector<2x128xf32>
    tpu.vector_store %arg6[%c0_14, %c0_15], %29 {strides = array<i32>} : memref<2x128xf32, #tpu.memory_space<vmem>>, vector<2x128xf32>,
    return
  }
  func.func @transform_0(%arg0: i32) -> (i32, i32) {
    %c0_i32 = arith.constant 0 : i32
    %c0_i32_0 = arith.constant 0 : i32
    return %arg0, %c0_i32 : i32, i32
  }
  func.func @transform_1(%arg0: i32) -> (i32, i32) {
    %c0_i32 = arith.constant 0 : i32
    %c0_i32_0 = arith.constant 0 : i32
    %c0_i32_1 = arith.constant 0 : i32
    return %c0_i32, %c0_i32_0 : i32, i32
  }
  func.func @transform_2(%arg0: i32) -> (i32, i32) {
    %c0_i32 = arith.constant 0 : i32
    %c0_i32_0 = arith.constant 0 : i32
    %c0_i32_1 = arith.constant 0 : i32
    return %c0_i32, %c0_i32_0 : i32, i32
  }
  func.func @transform_3(%arg0: i32) -> (i32, i32) {
    %c0_i32 = arith.constant 0 : i32
    %c0_i32_0 = arith.constant 0 : i32
    %c0_i32_1 = arith.constant 0 : i32
    return %c0_i32, %c0_i32_0 : i32, i32
  }
  func.func @transform_4(%arg0: i32) -> (i32, i32) {
    %c0_i32 = arith.constant 0 : i32
    %c0_i32_0 = arith.constant 0 : i32
    %c0_i32_1 = arith.constant 0 : i32
    return %c0_i32, %c0_i32_0 : i32, i32
  }
  func.func @transform_5(%arg0: i32) -> (i32, i32) {
    %c0_i32 = arith.constant 0 : i32
    %c0_i32_0 = arith.constant 0 : i32
    return %arg0, %c0_i32 : i32, i32
  }
}

</mosaic_0001>

<bundles_post_ra>
// kernel: _lambda_.47
= control target key start
LH: loop header
LB: loop body
LE: loop exit
PB: predicated region body
PF: predicated region fallthrough
CT: control target
= control target key end

     0   :  { %s358_s12 = smov 0   ;;  %s387_s0 = inlined_call_operand.vmem [shape: bf16[32,48], index: 0, kind: input, shape index: {}]   ;;  %s388_s1 = inlined_call_operand.vmem [shape: bf16[48,32], index: 1, kind: input, shape index: {}]   ;;  %s389_s2 = inlined_call_operand.vmem [shape: f32[1,32], index: 2, kind: input, shape index: {}]   ;;  %s390_s3 = inlined_call_operand.vmem [shape: bf16[32,32], index: 3, kind: output, shape index: {}]  }
   0x1 LB: > { %s289_s13 = sadd.s32 4294967295, %s336_s12   ;;  %p293_p0 = scmp.ge.s32.totalorder %s336_s12, 1  ;;  %s336_s12 = sphi %s358_s12, %s13_s12  }
   0x2   : > { %p138_p1 = scmp.lt.s32.totalorder %s336_s12, 3 }
   0x4   : > { %p139_p2 = pnand %p293_p0, %p138_p1 }
   0x5   : > { %s294_s16 = sshll.u32 (!%p139_p2), %s289_s13, 1 }
   0x6   : > { %142 = sbr.rel (%p139_p2) target bundleno = 162 (0xa2), region = 32  ;;  %p163_p3 = scmp.lt.s32.totalorder (!%p139_p2), %s294_s16, 3 }
   0xb   : > { %v320_v0 = vld [vmem:[%s388_s1 + $0x10] sm:$0xff]  ;;  %v319_v1 = vld [vmem:[%s388_s1 + $0x8] sm:$0xff]  ;;  %s392_s16 = smov (!%p163_p3, %s294_s16), 3  ;;  %v318_v2 = vld [vmem:[%s388_s1] sm:$0xff]  ;;  %vm210_vm0 = vcmask 392192   ;;  %vm230_vm1 = vcmask 257024  }
   0xc   : > { %219 = vmatpush.bf16.msra.mxu0 %v320_v0  ;;  %s295_s19 = sshll.u32 %s392_s16, 2  ;;  %v329_v4 = vld [vmem:[%s389_s2] ss:$0 sm:$0xff] }
   0xd   : > { %s166_s24 = scalar_lea.vmem %s387_s0, %s295_s19  ;;  %s172_s29 = scalar_lea.vmem %s390_s3, %s295_s19 }
   0xe   : > { %v317_v3 = vld [vmem:[%s166_s24] sm:$0xff] }
  0x10   : > { %220 = vmatpush.bf16.msra.mxu0 %v319_v1 }
  0x14   : > { %221 = vmatpush.bf16.msra.mxu0 %v318_v2 }
  0x17   : > { %314 = vmatmul.msk.bf16.vlgmr.msra.gmra.mxu0 %vm210_vm0, %v317_v3 }
  0x94   : > { %v223_v5 = vpop.f32.mrf.mxu0 }
  0x95   : > { %v224_v6 = vadd.f32 %v329_v4, %v223_v5 }
  0x97   : > { %v228_v7 = vpack.c.bf16 %v224_v6, %v224_v6 }
  0x99   : > { %231 = vst.msk [vmem:[%s172_s29] sm:$0xf] %vm230_vm1, %v228_v7 }
  0x9c   : > { %v225_v8 = vpop.f32.mrf.mxu0 }
  0x9d   : > { %v226_v9 = vadd.f32 %v329_v4, %v225_v8 }
  0x9f   : > { %v229_v10 = vpack.c.bf16 %v226_v9, %v226_v9 }
  0xa1   : > { %232 = vst.msk [vmem:[%s172_s29 + $0x4] sm:$0xf] %vm230_vm1, %v229_v10 }
  0xa2 PF: > { %s13_s12 = sadd.s32 1, %s336_s12  }
  0xa3   : > { %p10_p4 = scmp.ge.s32.totalorder %s13_s12, 4  }
  0xa5   :  { %12 = sbr.rel (!%p10_p4) target bundleno = 1 (0x1), region = 62 }

// kernel: _lambda_.49
= control target key start
LH: loop header
LB: loop body
LE: loop exit
PB: predicated region body
PF: predicated region fallthrough
CT: control target
= control target key end

     0   :  { %s442_s15 = smov 0   ;;  %s483_s0 = inlined_call_operand.vmem [shape: bf16[32,32], index: 0, kind: input, shape index: {}]   ;;  %s484_s1 = inlined_call_operand.vmem [shape: f32[1,32], index: 1, kind: input, shape index: {}]   ;;  %s485_s2 = inlined_call_operand.vmem [shape: f32[1,32], index: 2, kind: input, shape index: {}]   ;;  %s486_s3 = inlined_call_operand.vmem [shape: bf16[32,32], index: 3, kind: input, shape index: {}]   ;;  %s487_s4 = inlined_call_operand.vmem [shape: bf16[32,32], index: 4, kind: output, shape index: {}]  }
   0x1 LB: > { %s365_s16 = sadd.s32 4294967295, %s414_s15   ;;  %p369_p0 = scmp.ge.s32.totalorder %s414_s15, 1  ;;  %s414_s15 = sphi %s442_s15, %s14_s15  }
   0x2   : > { %p163_p1 = scmp.lt.s32.totalorder %s414_s15, 3 }
   0x4   : > { %p164_p2 = pnand %p369_p0, %p163_p1 }
   0x5   : > { %s370_s17 = sshll.u32 (!%p164_p2), %s365_s16, 1 }
   0x6   : > { %167 = sbr.rel (%p164_p2) target bundleno = 432 (0x1b0), region = 36  ;;  %p190_p3 = scmp.lt.s32.totalorder (!%p164_p2), %s370_s17, 3 }
   0xb   : > { %s489_s17 = smov (!%p190_p3, %s370_s17), 3  ;;  %vm208_vm0 = vcmask 261120   ;;  %v416_v5 = vmov 32.0   ;;  %v386_v22 = vld [vmem:[%s486_s3 + $0x8] sm:$0xff]  ;;  %v385_v24 = vld [vmem:[%s486_s3] sm:$0xff]  ;;  %vm306_vm8 = vcmask 257024  }
   0xc   : > { %s371_s18 = sshll.u32 %s489_s17, 2  ;;  %402 = vrcp.f32 %v416_v5  ;;  %296 = vmatpush.bf16.msra.mxu0 %v386_v22  ;;  %v400_v43 = vld [vmem:[%s484_s1] ss:$0 sm:$0xff] }
   0xd   : > { %s193_s21 = scalar_lea.vmem %s483_s0, %s371_s18  ;;  %v401_v48 = vld [vmem:[%s485_s2] ss:$0 sm:$0xff]  ;;  %s199_s6 = scalar_lea.vmem %s487_s4, %s371_s18 }
   0xe   : > { %v388_v0 = vld [vmem:[%s193_s21] sm:$0xff]  }
   0xf   : > { %v389_v1 = vunpack.c.l.bf16 %v388_v0  ;;  %v390_v3 = vunpack.c.h.bf16 %v388_v0 }
  0x10   : > { %297 = vmatpush.bf16.msra.mxu0 %v385_v24 }
  0x11   : > { %v209_v2 = vsel %vm208_vm0, %v389_v1, 0.0  ;;  %v212_v4 = vsel %vm208_vm0, %v390_v3, 0.0 }
  0x12   : > { %210 = vadd.xlane.f32.xlu0 %v209_v2  ;;  %v403_v6 = vpop.eup %402 }
  0x13   : > { %v216_v7 = vmul.f32 32.0, %v403_v6  ;;  %vm220_vm1 = vweird.f32 %v403_v6 }
  0x15   : > { %v217_v8 = vsub.f32 1.0, %v216_v7 }
  0x17   : > { %v218_v9 = vmul.f32 %v403_v6, %v217_v8 }
  0x19   : > { %v219_v10 = vadd.f32 %v403_v6, %v218_v9 }
  0x1a   : > { %213 = vadd.xlane.f32.xlu0 %v212_v4 }
  0x1b   : > { %v221_v11 = vsel %vm220_vm1, %v403_v6, %v219_v10 }
  0x85   : > { %v211_v12 = vpop.xlane.xlu0 %210 }
  0x86   : > { %v222_v13 = vmul.f32 %v221_v11, %v211_v12 }
  0x88   : > { %v224_v14 = vsub.f32 %v389_v1, %v222_v13 }
  0x8a   : > { %v226_v15 = vmul.f32 %v224_v14, %v224_v14 }
  0x8c   : > { %v228_v16 = vsel %vm208_vm0, %v226_v15, 0.0 }
  0x8d   : > { %229 = vadd.xlane.f32.xlu1 %v228_v16  ;;  %v214_v17 = vpop.xlane.xlu0 %213 }
  0x8e   : > { %v223_v18 = vmul.f32 %v221_v11, %v214_v17 }
  0x90   : > { %v225_v19 = vsub.f32 %v390_v3, %v223_v18 }
  0x92   : > { %v227_v20 = vmul.f32 %v225_v19, %v225_v19 }
  0x94   : > { %v231_v21 = vsel %vm208_vm0, %v227_v20, 0.0 }
  0x95   : > { %232 = vadd.xlane.f32.xlu1 %v231_v21 }
 0x100   : > { %v230_v23 = vpop.xlane.xlu1 %229 }
 0x101   : > { %v234_v25 = vmul.f32 %v230_v23, %v221_v11 }
 0x103   : > { %v236_v26 = vadd.f32 1e-05, %v234_v25 }
 0x105   : > { %404 = vrsqrt.f32 %v236_v26  ;;  %vm244_vm3 = vweird.f32 %v236_v26 }
 0x108   : > { %v233_v27 = vpop.xlane.xlu1 %232 }
 0x109   : > { %v235_v28 = vmul.f32 %v233_v27, %v221_v11 }
 0x10b   : > { %v405_v29 = vpop.eup %404  ;;  %v237_v30 = vadd.f32 1e-05, %v235_v28 }
 0x10c   : > { %v239_v31 = vmul.f32 %v405_v29, %v236_v26  ;;  %vm245_vm2 = vweird.f32 %v405_v29 }
 0x10d   : > { %406 = vrsqrt.f32 %v237_v30  ;;  %vm246_vm4 = vmor %vm244_vm3, %vm245_vm2  ;;  %vm254_vm6 = vweird.f32 %v237_v30 }
 0x10e   : > { %v240_v32 = vmul.f32 %v405_v29, %v239_v31 }
 0x110   : > { %v241_v33 = vmul.f32 0.5, %v240_v32 }
 0x112   : > { %v242_v34 = vsub.f32 1.5, %v241_v33 }
 0x113   : > { %v407_v35 = vpop.eup %406 }
 0x114   : > { %v243_v36 = vmul.f32 %v405_v29, %v242_v34  ;;  %v249_v37 = vmul.f32 %v407_v35, %v237_v30  ;;  %vm255_vm5 = vweird.f32 %v407_v35 }
 0x115   : > { %vm256_vm7 = vmor %vm254_vm6, %vm255_vm5 }
 0x116   : > { %v250_v38 = vmul.f32 %v407_v35, %v249_v37  ;;  %v247_v39 = vsel %vm246_vm4, %v405_v29, %v243_v36 }
 0x117   : > { %v258_v42 = vmul.f32 %v247_v39, %v224_v14 }
 0x118   : > { %v251_v40 = vmul.f32 0.5, %v250_v38 }
 0x119   : > { %v263_v47 = vmul.f32 %v400_v43, %v258_v42 }
 0x11a   : > { %v252_v41 = vsub.f32 1.5, %v251_v40 }
 0x11b   : > { %v268_v50 = vadd.f32 %v401_v48, %v263_v47 }
 0x11c   : > { %v253_v44 = vmul.f32 %v407_v35, %v252_v41 }
 0x11e   : > { %v257_v45 = vsel %vm256_vm7, %v407_v35, %v253_v44 }
 0x11f   : > { %v259_v46 = vmul.f32 %v257_v45, %v225_v19 }
 0x121   : > { %v264_v49 = vmul.f32 %v400_v43, %v259_v46 }
 0x123   : > { %v269_v51 = vadd.f32 %v401_v48, %v264_v49 }
 0x125   : > { %v270_v52 = vpack.c.bf16 %v269_v51, %v268_v50 }
 0x127   : > { %382 = vmatmul.msk.bf16.vlgmr.msra.gmra.mxu0 %vm208_vm0, %v270_v52 }
 0x1a4   : > { %v299_v53 = vpop.f32.mrf.mxu0 }
 0x1a5   : > { %v304_v54 = vpack.c.bf16 %v299_v53, %v299_v53 }
 0x1a7   : > { %307 = vst.msk [vmem:[%s199_s6] sm:$0xf] %vm306_vm8, %v304_v54 }
 0x1ac   : > { %v301_v55 = vpop.f32.mrf.mxu0 }
 0x1ad   : > { %v305_v56 = vpack.c.bf16 %v301_v55, %v301_v55 }
 0x1af   : > { %308 = vst.msk [vmem:[%s199_s6 + $0x4] sm:$0xf] %vm306_vm8, %v305_v56 }
 0x1b0 PF: > { %s14_s15 = sadd.s32 1, %s414_s15  }
 0x1b1   : > { %p11_p4 = scmp.ge.s32.totalorder %s14_s15, 4  }
 0x1b3   :  { %13 = sbr.rel (!%p11_p4) target bundleno = 1 (0x1), region = 66 }

// kernel: _lambda_.48
= control target key start
LH: loop header
LB: loop body
LE: loop exit
PB: predicated region body
PF: predicated region fallthrough
CT: control target
= control target key end

     0   :  { %s442_s15 = smov 0   ;;  %s483_s0 = inlined_call_operand.vmem [shape: bf16[32,32], index: 0, kind: input, shape index: {}]   ;;  %s484_s1 = inlined_call_operand.vmem [shape: f32[1,32], index: 1, kind: input, shape index: {}]   ;;  %s485_s2 = inlined_call_operand.vmem [shape: f32[1,32], index: 2, kind: input, shape index: {}]   ;;  %s486_s3 = inlined_call_operand.vmem [shape: bf16[32,16], index: 3, kind: input, shape index: {}]   ;;  %s487_s4 = inlined_call_operand.vmem [shape: bf16[32,16], index: 4, kind: output, shape index: {}]  }
   0x1 LB: > { %s365_s16 = sadd.s32 4294967295, %s414_s15   ;;  %p369_p0 = scmp.ge.s32.totalorder %s414_s15, 1  ;;  %s414_s15 = sphi %s442_s15, %s14_s15  }
   0x2   : > { %p163_p1 = scmp.lt.s32.totalorder %s414_s15, 3 }
   0x4   : > { %p164_p2 = pnand %p369_p0, %p163_p1 }
   0x5   : > { %s370_s17 = sshll.u32 (!%p164_p2), %s365_s16, 1 }
   0x6   : > { %167 = sbr.rel (%p164_p2) target bundleno = 432 (0x1b0), region = 36  ;;  %p190_p3 = scmp.lt.s32.totalorder (!%p164_p2), %s370_s17, 3 }
   0xb   : > { %s489_s17 = smov (!%p190_p3, %s370_s17), 3  ;;  %vm208_vm0 = vcmask 261120   ;;  %v416_v5 = vmov 32.0   ;;  %v386_v22 = vld [vmem:[%s486_s3 + $0x8] sm:$0xff]  ;;  %v385_v24 = vld [vmem:[%s486_s3] sm:$0xff]  ;;  %vm306_vm8 = vcmask 125952  }
   0xc   : > { %s371_s18 = sshll.u32 %s489_s17, 2  ;;  %402 = vrcp.f32 %v416_v5  ;;  %296 = vmatpush.bf16.msra.mxu0 %v386_v22  ;;  %v400_v43 = vld [vmem:[%s484_s1] ss:$0 sm:$0xff] }
   0xd   : > { %s193_s21 = scalar_lea.vmem %s483_s0, %s371_s18  ;;  %v401_v48 = vld [vmem:[%s485_s2] ss:$0 sm:$0xff]  ;;  %s199_s6 = scalar_lea.vmem %s487_s4, %s371_s18 }
   0xe   : > { %v388_v0 = vld [vmem:[%s193_s21] sm:$0xff]  }
   0xf   : > { %v389_v1 = vunpack.c.l.bf16 %v388_v0  ;;  %v390_v3 = vunpack.c.h.bf16 %v388_v0 }
  0x10   : > { %297 = vmatpush.bf16.msra.mxu0 %v385_v24 }
  0x11   : > { %v209_v2 = vsel %vm208_vm0, %v389_v1, 0.0  ;;  %v212_v4 = vsel %vm208_vm0, %v390_v3, 0.0 }
  0x12   : > { %210 = vadd.xlane.f32.xlu0 %v209_v2  ;;  %v403_v6 = vpop.eup %402 }
  0x13   : > { %v216_v7 = vmul.f32 32.0, %v403_v6  ;;  %vm220_vm1 = vweird.f32 %v403_v6 }
  0x15   : > { %v217_v8 = vsub.f32 1.0, %v216_v7 }
  0x17   : > { %v218_v9 = vmul.f32 %v403_v6, %v217_v8 }
  0x19   : > { %v219_v10 = vadd.f32 %v403_v6, %v218_v9 }
  0x1a   : > { %213 = vadd.xlane.f32.xlu0 %v212_v4 }
  0x1b   : > { %v221_v11 = vsel %vm220_vm1, %v403_v6, %v219_v10 }
  0x85   : > { %v211_v12 = vpop.xlane.xlu0 %210 }
  0x86   : > { %v222_v13 = vmul.f32 %v221_v11, %v211_v12 }
  0x88   : > { %v224_v14 = vsub.f32 %v389_v1, %v222_v13 }
  0x8a   : > { %v226_v15 = vmul.f32 %v224_v14, %v224_v14 }
  0x8c   : > { %v228_v16 = vsel %vm208_vm0, %v226_v15, 0.0 }
  0x8d   : > { %229 = vadd.xlane.f32.xlu1 %v228_v16  ;;  %v214_v17 = vpop.xlane.xlu0 %213 }
  0x8e   : > { %v223_v18 = vmul.f32 %v221_v11, %v214_v17 }
  0x90   : > { %v225_v19 = vsub.f32 %v390_v3, %v223_v18 }
  0x92   : > { %v227_v20 = vmul.f32 %v225_v19, %v225_v19 }
  0x94   : > { %v231_v21 = vsel %vm208_vm0, %v227_v20, 0.0 }
  0x95   : > { %232 = vadd.xlane.f32.xlu1 %v231_v21 }
 0x100   : > { %v230_v23 = vpop.xlane.xlu1 %229 }
 0x101   : > { %v234_v25 = vmul.f32 %v230_v23, %v221_v11 }
 0x103   : > { %v236_v26 = vadd.f32 1e-05, %v234_v25 }
 0x105   : > { %404 = vrsqrt.f32 %v236_v26  ;;  %vm244_vm3 = vweird.f32 %v236_v26 }
 0x108   : > { %v233_v27 = vpop.xlane.xlu1 %232 }
 0x109   : > { %v235_v28 = vmul.f32 %v233_v27, %v221_v11 }
 0x10b   : > { %v405_v29 = vpop.eup %404  ;;  %v237_v30 = vadd.f32 1e-05, %v235_v28 }
 0x10c   : > { %v239_v31 = vmul.f32 %v405_v29, %v236_v26  ;;  %vm245_vm2 = vweird.f32 %v405_v29 }
 0x10d   : > { %406 = vrsqrt.f32 %v237_v30  ;;  %vm246_vm4 = vmor %vm244_vm3, %vm245_vm2  ;;  %vm254_vm6 = vweird.f32 %v237_v30 }
 0x10e   : > { %v240_v32 = vmul.f32 %v405_v29, %v239_v31 }
 0x110   : > { %v241_v33 = vmul.f32 0.5, %v240_v32 }
 0x112   : > { %v242_v34 = vsub.f32 1.5, %v241_v33 }
 0x113   : > { %v407_v35 = vpop.eup %406 }
 0x114   : > { %v243_v36 = vmul.f32 %v405_v29, %v242_v34  ;;  %v249_v37 = vmul.f32 %v407_v35, %v237_v30  ;;  %vm255_vm5 = vweird.f32 %v407_v35 }
 0x115   : > { %vm256_vm7 = vmor %vm254_vm6, %vm255_vm5 }
 0x116   : > { %v250_v38 = vmul.f32 %v407_v35, %v249_v37  ;;  %v247_v39 = vsel %vm246_vm4, %v405_v29, %v243_v36 }
 0x117   : > { %v258_v42 = vmul.f32 %v247_v39, %v224_v14 }
 0x118   : > { %v251_v40 = vmul.f32 0.5, %v250_v38 }
 0x119   : > { %v263_v47 = vmul.f32 %v400_v43, %v258_v42 }
 0x11a   : > { %v252_v41 = vsub.f32 1.5, %v251_v40 }
 0x11b   : > { %v268_v50 = vadd.f32 %v401_v48, %v263_v47 }
 0x11c   : > { %v253_v44 = vmul.f32 %v407_v35, %v252_v41 }
 0x11e   : > { %v257_v45 = vsel %vm256_vm7, %v407_v35, %v253_v44 }
 0x11f   : > { %v259_v46 = vmul.f32 %v257_v45, %v225_v19 }
 0x121   : > { %v264_v49 = vmul.f32 %v400_v43, %v259_v46 }
 0x123   : > { %v269_v51 = vadd.f32 %v401_v48, %v264_v49 }
 0x125   : > { %v270_v52 = vpack.c.bf16 %v269_v51, %v268_v50 }
 0x127   : > { %382 = vmatmul.msk.bf16.vlgmr.msra.gmra.mxu0 %vm208_vm0, %v270_v52 }
 0x1a4   : > { %v299_v53 = vpop.f32.mrf.mxu0 }
 0x1a5   : > { %v304_v54 = vpack.c.bf16 %v299_v53, %v299_v53 }
 0x1a7   : > { %307 = vst.msk [vmem:[%s199_s6] sm:$0xf] %vm306_vm8, %v304_v54 }
 0x1ac   : > { %v301_v55 = vpop.f32.mrf.mxu0 }
 0x1ad   : > { %v305_v56 = vpack.c.bf16 %v301_v55, %v301_v55 }
 0x1af   : > { %308 = vst.msk [vmem:[%s199_s6 + $0x4] sm:$0xf] %vm306_vm8, %v305_v56 }
 0x1b0 PF: > { %s14_s15 = sadd.s32 1, %s414_s15  }
 0x1b1   : > { %p11_p4 = scmp.ge.s32.totalorder %s14_s15, 4  }
 0x1b3   :  { %13 = sbr.rel (!%p11_p4) target bundleno = 1 (0x1), region = 66 }

// kernel: _lambda_.50
= control target key start
LH: loop header
LB: loop body
LE: loop exit
PB: predicated region body
PF: predicated region fallthrough
CT: control target
= control target key end

     0   :  { %s486_s9 = smov 0   ;;  %s531_s0 = inlined_call_operand.vmem [shape: bf16[2,16,16], index: 0, kind: input, shape index: {}]   ;;  %s532_s1 = inlined_call_operand.vmem [shape: bf16[2,16,32], index: 1, kind: input, shape index: {}]   ;;  %s533_s2 = inlined_call_operand.vmem [shape: bf16[2,16,16], index: 2, kind: output, shape index: {}]  }
   0x1 LB: > { %s402_s10 = sadd.s32 4294967295, %s465_s9   ;;  %p406_p0 = scmp.ge.s32.totalorder %s465_s9, 1  ;;  %s465_s9 = sphi %s486_s9, %s12_s9  }
   0x2   : > { %p122_p1 = scmp.lt.s32.totalorder %s465_s9, 3 }
   0x4   : > { %p123_p2 = pnand %p406_p0, %p122_p1 }
   0x5   : > { %p149_p3 = scmp.lt.s32.totalorder (!%p123_p2), %s402_s10, 1  ;;  %s467_s18 = smov (!%p123_p2), 120  }
   0x6   : > { %126 = sbr.rel (%p123_p2) target bundleno = 771 (0x303), region = 28  ;;  %s468_s19 = smov (!%p123_p2), 104  }
   0x7   : > { %s469_s20 = smov (!%p123_p2), 112   ;;  %s470_s21 = smov (!%p123_p2), 8  }
   0xb   : > { %s535_s10 = smov (!%p149_p3, %s402_s10), 1  ;;  %vm185_vm0 = vcmask 64512   ;;  %vm206_vm1 = vcmask 130048   ;;  %vm252_vm2 = vcmask 60416   ;;  %vm332_vm3 = vcmask 126016  }
   0xc   : > { %s494_s11 = sshll.u32 %s535_s10, 3 }
   0xd   : > { %s158_s14 = scalar_lea.vmem %s532_s1, %s494_s11  ;;  %s153_s17 = scalar_lea.vmem %s531_s0, %s494_s11 }
   0xe   : > { %v504_v0 = vld [vmem:[%s158_s14] sm:$0xff]  ;;  %s163_s24 = scalar_lea.vmem %s533_s2, %s494_s11 }
   0xf   : > { %v428_v1 = vld [vmem:[%s153_s17] sm:$0xff]   ;;  %257 = vrot.lane.b32.xlu0 %v504_v0, %s467_s18  ;;  %v190_v4 = vsel %vm185_vm0, %v504_v0, 0 }
  0x10   : > { %v429_v2 = vunpack.c.l.bf16 %v428_v1  ;;  %v430_v3 = vunpack.c.h.bf16 %v428_v1  ;;  %199 = vmatpush.bf16.xpose.msra.mxu0 %v190_v4 }
  0x12   : > { %v171_v5 = vmul.f32 0.35355338, %v429_v2  ;;  %v172_v6 = vmul.f32 0.35355338, %v430_v3 }
  0x14   : > { %v173_v7 = vpack.c.bf16 %v171_v5, %v171_v5  ;;  %v174_v8 = vpack.c.bf16 %v172_v6, %v172_v6 }
  0x16   : > { %v177_v9 = vunpack.c.l.b16 %v173_v7  ;;  %v178_v10 = vunpack.c.l.b16 %v174_v8 }
  0x18   : > { %v179_v11 = vpack.c.b16 %v178_v10, %v177_v9 }
  0x1a   : > { %255 = vrot.lane.b32.xlu0 %v179_v11, %s467_s18  ;;  %417 = vmatmul.msk.bf16.vlgmr.msra.gmra.mxu0 %vm185_vm0, %v179_v11 }
  0x81   : > { %v258_v12 = vpop.permute.xlu0 %257 }
  0x82   : > { %v263_v13 = vsel %vm185_vm0, %v258_v12, 0 }
  0x83   : > { %272 = vmatpush.bf16.xpose.msra.mxu2 %v263_v13 }
  0x8c   : > { %v256_v14 = vpop.permute.xlu0 %255 }
  0x8d   : > { %419 = vmatmul.msk.bf16.vlgmr.msra.gmra.mxu2 %vm185_vm0, %v256_v14 }
  0x97   : > { %v201_v15 = vpop.f32.mrf.mxu0 }
  0x98   : > { %v207_v16 = vsel %vm206_vm1, %v201_v15, -inf }
  0x99   : > { %208 = vmax.xlane.f32.xlu2 %v207_v16 }
  0x9f   : > { %v203_v17 = vpop.f32.mrf.mxu0 }
  0xa0   : > { %v210_v18 = vsel %vm206_vm1, %v203_v17, -inf }
  0xa1   : > { %211 = vmax.xlane.f32.xlu2 %v210_v18 }
  0xb9   : > { %302 = vrot.lane.b32.xlu2 %v504_v0, %s468_s19 }
 0x10c   : > { %v209_v26 = vpop.xlane.xlu2 %208 }
 0x10d   : > { %v213_v30 = vsub.f32 %v201_v15, %v209_v26 }
 0x10f   : > { %v215_v33 = vmul.f32 1.442695, %v213_v30 }
 0x110   : > { %v274_v19 = vpop.f32.mrf.mxu2 }
 0x111   : > { %v279_v20 = vsel %vm206_vm1, %v274_v19, -inf }
 0x112   : > { %280 = vmax.xlane.f32.xlu1 %v279_v20 }
 0x114   : > { %v212_v34 = vpop.xlane.xlu2 %211 }
 0x115   : > { %v214_v36 = vsub.f32 %v203_v17, %v212_v34 }
 0x117   : > { %v217_v38 = vmul.f32 1.442695, %v214_v36 }
 0x118   : > { %v276_v21 = vpop.f32.mrf.mxu2 }
 0x119   : > { %v282_v22 = vsel %vm206_vm1, %v276_v21, -inf }
 0x11a   : > { %283 = vmax.xlane.f32.xlu1 %v282_v22 }
 0x11c   : > { %v303_v43 = vpop.permute.xlu2 %302 }
 0x11d   : > { %315 = vmatpush.bf16.msra.mxu3 %v303_v43 }
 0x185   : > { %v281_v23 = vpop.xlane.xlu1 %280 }
 0x186   : > { %v285_v24 = vsub.f32 %v274_v19, %v281_v23 }
 0x188   : > { %v287_v25 = vmul.f32 1.442695, %v285_v24 }
 0x18a   : > { %443 = vpow2.f32 %v287_v25 }
 0x18d   : > { %v284_v27 = vpop.xlane.xlu1 %283 }
 0x18e   : > { %v286_v28 = vsub.f32 %v276_v21, %v284_v27 }
 0x190   : > { %v444_v29 = vpop.eup %443  ;;  %v289_v31 = vmul.f32 1.442695, %v286_v28 }
 0x191   : > { %v291_v32 = vsel %vm206_vm1, %v444_v29, 0.0 }
 0x192   : > { %445 = vpow2.f32 %v289_v31  ;;  %292 = vadd.xlane.f32.xlu0 %v291_v32 }
 0x193   : > { %447 = vpow2.f32 %v215_v33 }
 0x194   : > { %449 = vpow2.f32 %v217_v38 }
 0x198   : > { %v446_v35 = vpop.eup %445 }
 0x199   : > { %v294_v37 = vsel %vm206_vm1, %v446_v35, 0.0  ;;  %v448_v39 = vpop.eup %447 }
 0x19a   : > { %295 = vadd.xlane.f32.xlu1 %v294_v37  ;;  %v219_v40 = vsel %vm206_vm1, %v448_v39, 0.0  ;;  %v450_v41 = vpop.eup %449 }
 0x19b   : > { %v222_v42 = vsel %vm206_vm1, %v450_v41, 0.0 }
 0x1a2   : > { %220 = vadd.xlane.f32.xlu1 %v219_v40 }
 0x1aa   : > { %223 = vadd.xlane.f32.xlu1 %v222_v42 }
 0x1c3   : > { %230 = vrot.lane.b32.xlu1 %v504_v0, %s469_s20 }
 0x205   : > { %v293_v44 = vpop.xlane.xlu0 %292 }
 0x206   : > { %451 = vrcp.f32 %v293_v44 }
 0x20c   : > { %v452_v46 = vpop.eup %451 }
 0x20d   : > { %v296_v45 = vpop.xlane.xlu1 %295  ;;  %v299_v48 = vmul.f32 %v452_v46, %v444_v29 }
 0x20e   : > { %453 = vrcp.f32 %v296_v45 }
 0x214   : > { %v454_v47 = vpop.eup %453 }
 0x215   : > { %v300_v49 = vmul.f32 %v454_v47, %v446_v35  ;;  %v221_v51 = vpop.xlane.xlu1 %220 }
 0x217   : > { %v301_v50 = vpack.c.bf16 %v300_v49, %v299_v48 }
 0x219   : > { %420 = vmatmul.msk.bf16.vlgmr.msra.gmra.mxu3 %vm206_vm1, %v301_v50 }
 0x21d   : > { %v224_v52 = vpop.xlane.xlu1 %223 }
 0x21e   : > { %455 = vrcp.f32 %v224_v52 }
 0x21f   : > { %457 = vrcp.f32 %v221_v51 }
 0x224   : > { %v456_v53 = vpop.eup %455 }
 0x225   : > { %v458_v54 = vpop.eup %457  ;;  %v228_v55 = vmul.f32 %v456_v53, %v450_v41 }
 0x226   : > { %v227_v57 = vmul.f32 %v458_v54, %v448_v39 }
 0x228   : > { %v229_v58 = vpack.c.bf16 %v228_v55, %v227_v57 }
 0x235   : > { %v231_v56 = vpop.permute.xlu1 %230 }
 0x236   : > { %243 = vmatpush.bf16.msra.mxu1 %v231_v56 }
 0x239   : > { %418 = vmatmul.msk.bf16.vlgmr.msra.gmra.mxu1 %vm206_vm1, %v229_v58 }
 0x29c   : > { %v317_v59 = vpop.f32.mrf.mxu3 }
 0x29d   : > { %v322_v60 = vpack.c.bf16 %v317_v59, %v317_v59 }
 0x29f   : > { %326 = vrot.lane.b32.xlu2 %v322_v60, %s470_s21 }
 0x2a4   : > { %v319_v61 = vpop.f32.mrf.mxu3 }
 0x2a5   : > { %v323_v62 = vpack.c.bf16 %v319_v61, %v319_v61 }
 0x2a7   : > { %328 = vrot.lane.b32.xlu2 %v323_v62, %s470_s21 }
 0x2b6   : > { %v245_v63 = vpop.f32.mrf.mxu1 }
 0x2b7   : > { %v250_v0 = vpack.c.bf16 %v245_v63, %v245_v63 }
 0x2b9   : > { %253 = vst.msk [vmem:[%s163_s24] sm:$0xf] %vm252_vm2, %v250_v0 }
 0x2be   : > { %v247_v1 = vpop.f32.mrf.mxu1 }
 0x2bf   : > { %v251_v2 = vpack.c.bf16 %v247_v1, %v247_v1 }
 0x2c1   : > { %254 = vst.msk [vmem:[%s163_s24 + $0x4] sm:$0xf] %vm252_vm2, %v251_v2 }
 0x2f9   : > { %v327_v3 = vpop.permute.xlu2 %326 }
 0x2fa   : > { %333 = vst.msk [vmem:[%s163_s24] sm:$0xf] %vm332_vm3, %v327_v3 }
 0x301   : > { %v329_v4 = vpop.permute.xlu2 %328 }
 0x302   : > { %334 = vst.msk [vmem:[%s163_s24 + $0x4] sm:$0xf] %vm332_vm3, %v329_v4 }
 0x303 PF: > { %s12_s9 = sadd.s32 1, %s465_s9  }
 0x304   : > { %p9_p4 = scmp.ge.s32.totalorder %s12_s9, 4  }
 0x306   :  { %11 = sbr.rel (!%p9_p4) target bundleno = 1 (0x1), region = 61 }

// kernel: _lambda_.51
= control target key start
LH: loop header
LB: loop body
LE: loop exit
PB: predicated region body
PF: predicated region fallthrough
CT: control target
= control target key end

     0   :  { %s410_s15 = smov 0   ;;  %s436_s0 = inlined_call_operand.vmem [shape: bf16[32,16], index: 0, kind: input, shape index: {}]   ;;  %s437_s1 = inlined_call_operand.vmem [shape: bf16[16,32], index: 1, kind: input, shape index: {}]   ;;  %s438_s2 = inlined_call_operand.vmem [shape: f32[1,32], index: 2, kind: input, shape index: {}]   ;;  %s439_s3 = inlined_call_operand.vmem [shape: bf16[32,32], index: 3, kind: input, shape index: {}]   ;;  %s440_s4 = inlined_call_operand.vmem [shape: bf16[32,32], index: 4, kind: output, shape index: {}]  }
   0x1 LB: > { %s340_s16 = sadd.s32 4294967295, %s383_s15   ;;  %p344_p0 = scmp.ge.s32.totalorder %s383_s15, 1  ;;  %s383_s15 = sphi %s410_s15, %s14_s15  }
   0x2   : > { %p174_p1 = scmp.lt.s32.totalorder %s383_s15, 3 }
   0x4   : > { %p175_p2 = pnand %p344_p0, %p174_p1 }
   0x5   : > { %s345_s19 = sshll.u32 (!%p175_p2), %s340_s16, 1 }
   0x6   : > { %178 = sbr.rel (%p175_p2) target bundleno = 156 (0x9c), region = 36  ;;  %p206_p3 = scmp.lt.s32.totalorder (!%p175_p2), %s345_s19, 3 }
   0xb   : > { %v363_v0 = vld [vmem:[%s437_s1] sm:$0xff]  ;;  %s442_s19 = smov (!%p206_p3, %s345_s19), 3  ;;  %vm243_vm0 = vcmask 130048   ;;  %vm269_vm1 = vcmask 257024  }
   0xc   : > { %254 = vmatpush.bf16.msra.mxu0 %v363_v0  ;;  %s346_s20 = sshll.u32 %s442_s19, 2  ;;  %v376_v3 = vld [vmem:[%s438_s2] ss:$0 sm:$0xff] }
   0xd   : > { %s209_s23 = scalar_lea.vmem %s436_s0, %s346_s20  ;;  %s215_s26 = scalar_lea.vmem %s439_s3, %s346_s20 }
   0xe   : > { %v362_v1 = vld [vmem:[%s209_s23] sm:$0xff]  ;;  %s221_s5 = scalar_lea.vmem %s440_s4, %s346_s20 }
   0xf   : > { %359 = vmatmul.msk.bf16.vlgmr.msra.gmra.mxu0 %vm243_vm0, %v362_v1  ;;  %v365_v2 = vld [vmem:[%s215_s26] sm:$0xff]  }
  0x10   : > { %v366_v4 = vunpack.c.l.bf16 %v365_v2  ;;  %v367_v9 = vunpack.c.h.bf16 %v365_v2 }
  0x8c   : > { %v256_v5 = vpop.f32.mrf.mxu0 }
  0x8d   : > { %v257_v6 = vadd.f32 %v376_v3, %v256_v5 }
  0x8f   : > { %v265_v7 = vadd.f32 %v366_v4, %v257_v6 }
  0x91   : > { %v267_v8 = vpack.c.bf16 %v265_v7, %v265_v7 }
  0x93   : > { %270 = vst.msk [vmem:[%s221_s5] sm:$0xf] %vm269_vm1, %v267_v8 }
  0x94   : > { %v258_v10 = vpop.f32.mrf.mxu0 }
  0x95   : > { %v259_v11 = vadd.f32 %v376_v3, %v258_v10 }
  0x97   : > { %v266_v12 = vadd.f32 %v367_v9, %v259_v11 }
  0x99   : > { %v268_v13 = vpack.c.bf16 %v266_v12, %v266_v12 }
  0x9b   : > { %271 = vst.msk [vmem:[%s221_s5 + $0x4] sm:$0xf] %vm269_vm1, %v268_v13 }
  0x9c PF: > { %s14_s15 = sadd.s32 1, %s383_s15  }
  0x9d   : > { %p11_p4 = scmp.ge.s32.totalorder %s14_s15, 4  }
  0x9f   :  { %13 = sbr.rel (!%p11_p4) target bundleno = 1 (0x1), region = 69 }

// kernel: _lambda_.52
= control target key start
LH: loop header
LB: loop body
LE: loop exit
PB: predicated region body
PF: predicated region fallthrough
CT: control target
= control target key end

     0   :  { %s505_s18 = smov 0   ;;  %s549_s0 = inlined_call_operand.vmem [shape: bf16[32,32], index: 0, kind: input, shape index: {}]   ;;  %s550_s1 = inlined_call_operand.vmem [shape: f32[1,32], index: 1, kind: input, shape index: {}]   ;;  %s551_s2 = inlined_call_operand.vmem [shape: f32[1,32], index: 2, kind: input, shape index: {}]   ;;  %s552_s3 = inlined_call_operand.vmem [shape: bf16[32,128], index: 3, kind: input, shape index: {}]   ;;  %s553_s4 = inlined_call_operand.vmem [shape: f32[1,128], index: 4, kind: input, shape index: {}]   ;;  %s554_s5 = inlined_call_operand.vmem [shape: bf16[32,128], index: 5, kind: output, shape index: {}]  }
   0x1 LB: > { %s413_s19 = sadd.s32 4294967295, %s472_s18   ;;  %p417_p0 = scmp.ge.s32.totalorder %s472_s18, 1  ;;  %s472_s18 = sphi %s505_s18, %s15_s18  }
   0x2   : > { %p188_p1 = scmp.lt.s32.totalorder %s472_s18, 3 }
   0x4   : > { %p189_p2 = pnand %p417_p0, %p188_p1 }
   0x5   : > { %s418_s20 = sshll.u32 (!%p189_p2), %s413_s19, 1 }
   0x6   : > { %192 = sbr.rel (%p189_p2) target bundleno = 455 (0x1c7), region = 40  ;;  %p217_p3 = scmp.lt.s32.totalorder (!%p189_p2), %s418_s20, 3 }
   0xb   : > { %s556_s20 = smov (!%p217_p3, %s418_s20), 3  ;;  %vm235_vm0 = vcmask 261120   ;;  %v474_v5 = vmov 32.0   ;;  %v434_v22 = vld [vmem:[%s552_s3 + $0x8] sm:$0xff]  ;;  %v433_v24 = vld [vmem:[%s552_s3] sm:$0xff] }
   0xc   : > { %s419_s21 = sshll.u32 %s556_s20, 2  ;;  %456 = vrcp.f32 %v474_v5  ;;  %327 = vmatpush.bf16.msra.mxu0 %v434_v22  ;;  %v453_v43 = vld [vmem:[%s550_s1] ss:$0 sm:$0xff] }
   0xd   : > { %s220_s24 = scalar_lea.vmem %s549_s0, %s419_s21  ;;  %v454_v48 = vld [vmem:[%s551_s2] ss:$0 sm:$0xff]  ;;  %s226_s12 = scalar_lea.vmem %s554_s5, %s419_s21 }
   0xe   : > { %v436_v0 = vld [vmem:[%s220_s24] sm:$0xff]  }
   0xf   : > { %v437_v1 = vunpack.c.l.bf16 %v436_v0  ;;  %v438_v3 = vunpack.c.h.bf16 %v436_v0  ;;  %v455_v53 = vld [vmem:[%s553_s4] ss:$0 sm:$0xff] }
  0x10   : > { %328 = vmatpush.bf16.msra.mxu0 %v433_v24 }
  0x11   : > { %v236_v2 = vsel %vm235_vm0, %v437_v1, 0.0  ;;  %v239_v4 = vsel %vm235_vm0, %v438_v3, 0.0 }
  0x12   : > { %237 = vadd.xlane.f32.xlu0 %v236_v2  ;;  %v457_v6 = vpop.eup %456 }
  0x13   : > { %v243_v7 = vmul.f32 32.0, %v457_v6  ;;  %vm247_vm1 = vweird.f32 %v457_v6 }
  0x15   : > { %v244_v8 = vsub.f32 1.0, %v243_v7 }
  0x17   : > { %v245_v9 = vmul.f32 %v457_v6, %v244_v8 }
  0x19   : > { %v246_v10 = vadd.f32 %v457_v6, %v245_v9 }
  0x1a   : > { %240 = vadd.xlane.f32.xlu0 %v239_v4 }
  0x1b   : > { %v248_v11 = vsel %vm247_vm1, %v457_v6, %v246_v10 }
  0x85   : > { %v238_v12 = vpop.xlane.xlu0 %237 }
  0x86   : > { %v249_v13 = vmul.f32 %v248_v11, %v238_v12 }
  0x88   : > { %v251_v14 = vsub.f32 %v437_v1, %v249_v13 }
  0x8a   : > { %v253_v15 = vmul.f32 %v251_v14, %v251_v14 }
  0x8c   : > { %v255_v16 = vsel %vm235_vm0, %v253_v15, 0.0 }
  0x8d   : > { %256 = vadd.xlane.f32.xlu1 %v255_v16  ;;  %v241_v17 = vpop.xlane.xlu0 %240 }
  0x8e   : > { %v250_v18 = vmul.f32 %v248_v11, %v241_v17 }
  0x90   : > { %v252_v19 = vsub.f32 %v438_v3, %v250_v18 }
  0x92   : > { %v254_v20 = vmul.f32 %v252_v19, %v252_v19 }
  0x94   : > { %v258_v21 = vsel %vm235_vm0, %v254_v20, 0.0 }
  0x95   : > { %259 = vadd.xlane.f32.xlu1 %v258_v21 }
 0x100   : > { %v257_v23 = vpop.xlane.xlu1 %256 }
 0x101   : > { %v261_v25 = vmul.f32 %v257_v23, %v248_v11 }
 0x103   : > { %v263_v26 = vadd.f32 1e-05, %v261_v25 }
 0x105   : > { %458 = vrsqrt.f32 %v263_v26  ;;  %vm271_vm3 = vweird.f32 %v263_v26 }
 0x108   : > { %v260_v27 = vpop.xlane.xlu1 %259 }
 0x109   : > { %v262_v28 = vmul.f32 %v260_v27, %v248_v11 }
 0x10b   : > { %v459_v29 = vpop.eup %458  ;;  %v264_v30 = vadd.f32 1e-05, %v262_v28 }
 0x10c   : > { %v266_v31 = vmul.f32 %v459_v29, %v263_v26  ;;  %vm272_vm2 = vweird.f32 %v459_v29 }
 0x10d   : > { %460 = vrsqrt.f32 %v264_v30  ;;  %vm273_vm4 = vmor %vm271_vm3, %vm272_vm2  ;;  %vm281_vm6 = vweird.f32 %v264_v30 }
 0x10e   : > { %v267_v32 = vmul.f32 %v459_v29, %v266_v31 }
 0x110   : > { %v268_v33 = vmul.f32 0.5, %v267_v32 }
 0x112   : > { %v269_v34 = vsub.f32 1.5, %v268_v33 }
 0x113   : > { %v461_v35 = vpop.eup %460 }
 0x114   : > { %v270_v36 = vmul.f32 %v459_v29, %v269_v34  ;;  %v276_v37 = vmul.f32 %v461_v35, %v264_v30  ;;  %vm282_vm5 = vweird.f32 %v461_v35 }
 0x115   : > { %vm283_vm7 = vmor %vm281_vm6, %vm282_vm5 }
 0x116   : > { %v277_v38 = vmul.f32 %v461_v35, %v276_v37  ;;  %v274_v39 = vsel %vm273_vm4, %v459_v29, %v270_v36 }
 0x117   : > { %v285_v42 = vmul.f32 %v274_v39, %v251_v14 }
 0x118   : > { %v278_v40 = vmul.f32 0.5, %v277_v38 }
 0x119   : > { %v290_v47 = vmul.f32 %v453_v43, %v285_v42 }
 0x11a   : > { %v279_v41 = vsub.f32 1.5, %v278_v40 }
 0x11b   : > { %v295_v50 = vadd.f32 %v454_v48, %v290_v47 }
 0x11c   : > { %v280_v44 = vmul.f32 %v461_v35, %v279_v41 }
 0x11e   : > { %v284_v45 = vsel %vm283_vm7, %v461_v35, %v280_v44 }
 0x11f   : > { %v286_v46 = vmul.f32 %v284_v45, %v252_v19 }
 0x121   : > { %v291_v49 = vmul.f32 %v453_v43, %v286_v46 }
 0x123   : > { %v296_v51 = vadd.f32 %v454_v48, %v291_v49 }
 0x125   : > { %v297_v52 = vpack.c.bf16 %v296_v51, %v295_v50 }
 0x127   : > { %430 = vmatmul.msk.bf16.vlgmr.msra.gmra.mxu0 %vm235_vm0, %v297_v52 }
 0x1a4   : > { %v330_v54 = vpop.f32.mrf.mxu0 }
 0x1a5   : > { %v331_v55 = vadd.f32 %v455_v53, %v330_v54 }
 0x1a7   : > { %v337_v56 = vmul.f32 0.044715, %v331_v55  ;;  %v335_v7 = vmul.f32 0.5, %v331_v55 }
 0x1a9   : > { %v339_v57 = vmul.f32 %v337_v56, %v331_v55 }
 0x1ab   : > { %v341_v58 = vmul.f32 %v339_v57, %v331_v55 }
 0x1ac   : > { %v332_v59 = vpop.f32.mrf.mxu0 }
 0x1ad   : > { %v343_v60 = vadd.f32 %v341_v58, %v331_v55  ;;  %v333_v61 = vadd.f32 %v455_v53, %v332_v59 }
 0x1af   : > { %v338_v62 = vmul.f32 0.044715, %v333_v61  ;;  %v345_v63 = vmul.f32 0.7978846, %v343_v60  ;;  %v336_v8 = vmul.f32 0.5, %v333_v61 }
 0x1b1   : > { %v340_v0 = vmul.f32 %v338_v62, %v333_v61  ;;  %462 = vtanh.f32 %v345_v63 }
 0x1b3   : > { %v342_v1 = vmul.f32 %v340_v0, %v333_v61 }
 0x1b5   : > { %v344_v2 = vadd.f32 %v342_v1, %v333_v61 }
 0x1b7   : > { %v346_v3 = vmul.f32 0.7978846, %v344_v2  ;;  %v463_v4 = vpop.eup %462 }
 0x1b8   : > { %v349_v5 = vadd.f32 1.0, %v463_v4 }
 0x1b9   : > { %464 = vtanh.f32 %v346_v3 }
 0x1ba   : > { %v351_v10 = vmul.f32 %v349_v5, %v335_v7 }
 0x1bf   : > { %v465_v6 = vpop.eup %464 }
 0x1c0   : > { %v350_v9 = vadd.f32 1.0, %v465_v6 }
 0x1c2   : > { %v352_v11 = vmul.f32 %v350_v9, %v336_v8 }
 0x1c4   : > { %v442_v12 = vpack.c.bf16 %v352_v11, %v351_v10 }
 0x1c6   : > { %443 = vst [vmem:[%s226_s12] sm:$0xff] %v442_v12  }
 0x1c7 PF: > { %s15_s18 = sadd.s32 1, %s472_s18  }
 0x1c8   : > { %p12_p4 = scmp.ge.s32.totalorder %s15_s18, 4  }
 0x1ca   :  { %14 = sbr.rel (!%p12_p4) target bundleno = 1 (0x1), region = 70 }

// kernel: _lambda_.53
= control target key start
LH: loop header
LB: loop body
LE: loop exit
PB: predicated region body
PF: predicated region fallthrough
CT: control target
= control target key end

     0   :  { %s496_s15 = smov 0   ;;  %s543_s0 = inlined_call_operand.vmem [shape: bf16[32,128], index: 0, kind: input, shape index: {}]   ;;  %s544_s1 = inlined_call_operand.vmem [shape: bf16[128,32], index: 1, kind: input, shape index: {}]   ;;  %s545_s2 = inlined_call_operand.vmem [shape: f32[1,32], index: 2, kind: input, shape index: {}]   ;;  %s546_s3 = inlined_call_operand.vmem [shape: bf16[32,32], index: 3, kind: input, shape index: {}]   ;;  %s547_s4 = inlined_call_operand.vmem [shape: bf16[32,32], index: 4, kind: output, shape index: {}]  }
   0x1 LB: > { %s392_s16 = sadd.s32 4294967295, %s469_s15   ;;  %p396_p0 = scmp.ge.s32.totalorder %s469_s15, 1  ;;  %s469_s15 = sphi %s496_s15, %s14_s15  }
   0x2   : > { %p174_p1 = scmp.lt.s32.totalorder %s469_s15, 3 }
   0x4   : > { %p175_p2 = pnand %p396_p0, %p174_p1 }
   0x5   : > { %s397_s25 = sshll.u32 (!%p175_p2), %s392_s16, 1 }
   0x6   : > { %178 = sbr.rel (%p175_p2) target bundleno = 184 (0xb8), region = 36  ;;  %p206_p3 = scmp.lt.s32.totalorder (!%p175_p2), %s397_s25, 3 }
   0xb   : > { %v449_v0 = vld [vmem:[%s544_s1 + $0x38] sm:$0xff]  ;;  %v448_v1 = vld [vmem:[%s544_s1 + $0x30] sm:$0xff]  ;;  %v447_v2 = vld [vmem:[%s544_s1 + $0x28] sm:$0xff]  ;;  %s549_s25 = smov (!%p206_p3, %s397_s25), 3  ;;  %vm321_vm0 = vcmask 257024  }
   0xc   : > { %299 = vmatpush.bf16.msra.mxu0 %v449_v0  ;;  %v446_v3 = vld [vmem:[%s544_s1 + $0x20] sm:$0xff]  ;;  %v445_v4 = vld [vmem:[%s544_s1 + $0x18] sm:$0xff]  ;;  %v444_v5 = vld [vmem:[%s544_s1 + $0x10] sm:$0xff]  ;;  %s398_s6 = sshll.u32 %s549_s25, 2 }
   0xd   : > { %v443_v6 = vld [vmem:[%s544_s1 + $0x8] sm:$0xff]  ;;  %v442_v7 = vld [vmem:[%s544_s1] sm:$0xff]  ;;  %s209_s11 = scalar_lea.vmem %s543_s0, %s398_s6  ;;  %s215_s14 = scalar_lea.vmem %s546_s3, %s398_s6 }
   0xe   : > { %v441_v8 = vld [vmem:[%s209_s11] sm:$0xff]  ;;  %s221_s20 = scalar_lea.vmem %s547_s4, %s398_s6 }
   0xf   : > { %v451_v9 = vld [vmem:[%s215_s14] sm:$0xff]  }
  0x10   : > { %300 = vmatpush.bf16.msra.mxu0 %v448_v1  ;;  %v462_v10 = vld [vmem:[%s545_s2] ss:$0 sm:$0xff]  ;;  %v452_v11 = vunpack.c.l.bf16 %v451_v9  ;;  %v453_v16 = vunpack.c.h.bf16 %v451_v9 }
  0x14   : > { %301 = vmatpush.bf16.msra.mxu0 %v447_v2 }
  0x18   : > { %302 = vmatpush.bf16.msra.mxu0 %v446_v3 }
  0x1c   : > { %303 = vmatpush.bf16.msra.mxu0 %v445_v4 }
  0x20   : > { %304 = vmatpush.bf16.msra.mxu0 %v444_v5 }
  0x24   : > { %305 = vmatpush.bf16.msra.mxu0 %v443_v6 }
  0x28   : > { %306 = vmatpush.bf16.msra.mxu0 %v442_v7 }
  0x2b   : > { %307 = vmatmul.bf16.vlgmr.msra.gmra.mxu0 %v441_v8 }
  0xa8   : > { %v308_v12 = vpop.f32.mrf.mxu0 }
  0xa9   : > { %v309_v13 = vadd.f32 %v462_v10, %v308_v12 }
  0xab   : > { %v317_v14 = vadd.f32 %v452_v11, %v309_v13 }
  0xad   : > { %v319_v15 = vpack.c.bf16 %v317_v14, %v317_v14 }
  0xaf   : > { %322 = vst.msk [vmem:[%s221_s20] sm:$0xf] %vm321_vm0, %v319_v15 }
  0xb0   : > { %v310_v17 = vpop.f32.mrf.mxu0 }
  0xb1   : > { %v311_v18 = vadd.f32 %v462_v10, %v310_v17 }
  0xb3   : > { %v318_v19 = vadd.f32 %v453_v16, %v311_v18 }
  0xb5   : > { %v320_v20 = vpack.c.bf16 %v318_v19, %v318_v19 }
  0xb7   : > { %323 = vst.msk [vmem:[%s221_s20 + $0x4] sm:$0xf] %vm321_vm0, %v320_v20 }
  0xb8 PF: > { %s14_s15 = sadd.s32 1, %s469_s15  }
  0xb9   : > { %p11_p4 = scmp.ge.s32.totalorder %s14_s15, 4  }
  0xbb   :  { %13 = sbr.rel (!%p11_p4) target bundleno = 1 (0x1), region = 69 }

// kernel: _lambda_.54
= control target key start
LH: loop header
LB: loop body
LE: loop exit
PB: predicated region body
PF: predicated region fallthrough
CT: control target
= control target key end

     0   :  { %s442_s15 = smov 0   ;;  %s483_s0 = inlined_call_operand.vmem [shape: bf16[32,32], index: 0, kind: input, shape index: {}]   ;;  %s484_s1 = inlined_call_operand.vmem [shape: f32[1,32], index: 1, kind: input, shape index: {}]   ;;  %s485_s2 = inlined_call_operand.vmem [shape: f32[1,32], index: 2, kind: input, shape index: {}]   ;;  %s486_s3 = inlined_call_operand.vmem [shape: bf16[32,48], index: 3, kind: input, shape index: {}]   ;;  %s487_s4 = inlined_call_operand.vmem [shape: bf16[32,48], index: 4, kind: output, shape index: {}]  }
   0x1 LB: > { %s365_s16 = sadd.s32 4294967295, %s414_s15   ;;  %p369_p0 = scmp.ge.s32.totalorder %s414_s15, 1  ;;  %s414_s15 = sphi %s442_s15, %s14_s15  }
   0x2   : > { %p163_p1 = scmp.lt.s32.totalorder %s414_s15, 3 }
   0x4   : > { %p164_p2 = pnand %p369_p0, %p163_p1 }
   0x5   : > { %s370_s17 = sshll.u32 (!%p164_p2), %s365_s16, 1 }
   0x6   : > { %167 = sbr.rel (%p164_p2) target bundleno = 432 (0x1b0), region = 36  ;;  %p190_p3 = scmp.lt.s32.totalorder (!%p164_p2), %s370_s17, 3 }
   0xb   : > { %s489_s17 = smov (!%p190_p3, %s370_s17), 3  ;;  %vm208_vm0 = vcmask 261120   ;;  %v416_v5 = vmov 32.0   ;;  %v386_v22 = vld [vmem:[%s486_s3 + $0x8] sm:$0xff]  ;;  %v385_v24 = vld [vmem:[%s486_s3] sm:$0xff]  ;;  %vm306_vm8 = vcmask 388096  }
   0xc   : > { %s371_s18 = sshll.u32 %s489_s17, 2  ;;  %402 = vrcp.f32 %v416_v5  ;;  %296 = vmatpush.bf16.msra.mxu0 %v386_v22  ;;  %v400_v43 = vld [vmem:[%s484_s1] ss:$0 sm:$0xff] }
   0xd   : > { %s193_s21 = scalar_lea.vmem %s483_s0, %s371_s18  ;;  %v401_v48 = vld [vmem:[%s485_s2] ss:$0 sm:$0xff]  ;;  %s199_s6 = scalar_lea.vmem %s487_s4, %s371_s18 }
   0xe   : > { %v388_v0 = vld [vmem:[%s193_s21] sm:$0xff]  }
   0xf   : > { %v389_v1 = vunpack.c.l.bf16 %v388_v0  ;;  %v390_v3 = vunpack.c.h.bf16 %v388_v0 }
  0x10   : > { %297 = vmatpush.bf16.msra.mxu0 %v385_v24 }
  0x11   : > { %v209_v2 = vsel %vm208_vm0, %v389_v1, 0.0  ;;  %v212_v4 = vsel %vm208_vm0, %v390_v3, 0.0 }
  0x12   : > { %210 = vadd.xlane.f32.xlu0 %v209_v2  ;;  %v403_v6 = vpop.eup %402 }
  0x13   : > { %v216_v7 = vmul.f32 32.0, %v403_v6  ;;  %vm220_vm1 = vweird.f32 %v403_v6 }
  0x15   : > { %v217_v8 = vsub.f32 1.0, %v216_v7 }
  0x17   : > { %v218_v9 = vmul.f32 %v403_v6, %v217_v8 }
  0x19   : > { %v219_v10 = vadd.f32 %v403_v6, %v218_v9 }
  0x1a   : > { %213 = vadd.xlane.f32.xlu0 %v212_v4 }
  0x1b   : > { %v221_v11 = vsel %vm220_vm1, %v403_v6, %v219_v10 }
  0x85   : > { %v211_v12 = vpop.xlane.xlu0 %210 }
  0x86   : > { %v222_v13 = vmul.f32 %v221_v11, %v211_v12 }
  0x88   : > { %v224_v14 = vsub.f32 %v389_v1, %v222_v13 }
  0x8a   : > { %v226_v15 = vmul.f32 %v224_v14, %v224_v14 }
  0x8c   : > { %v228_v16 = vsel %vm208_vm0, %v226_v15, 0.0 }
  0x8d   : > { %229 = vadd.xlane.f32.xlu1 %v228_v16  ;;  %v214_v17 = vpop.xlane.xlu0 %213 }
  0x8e   : > { %v223_v18 = vmul.f32 %v221_v11, %v214_v17 }
  0x90   : > { %v225_v19 = vsub.f32 %v390_v3, %v223_v18 }
  0x92   : > { %v227_v20 = vmul.f32 %v225_v19, %v225_v19 }
  0x94   : > { %v231_v21 = vsel %vm208_vm0, %v227_v20, 0.0 }
  0x95   : > { %232 = vadd.xlane.f32.xlu1 %v231_v21 }
 0x100   : > { %v230_v23 = vpop.xlane.xlu1 %229 }
 0x101   : > { %v234_v25 = vmul.f32 %v230_v23, %v221_v11 }
 0x103   : > { %v236_v26 = vadd.f32 1e-05, %v234_v25 }
 0x105   : > { %404 = vrsqrt.f32 %v236_v26  ;;  %vm244_vm3 = vweird.f32 %v236_v26 }
 0x108   : > { %v233_v27 = vpop.xlane.xlu1 %232 }
 0x109   : > { %v235_v28 = vmul.f32 %v233_v27, %v221_v11 }
 0x10b   : > { %v405_v29 = vpop.eup %404  ;;  %v237_v30 = vadd.f32 1e-05, %v235_v28 }
 0x10c   : > { %v239_v31 = vmul.f32 %v405_v29, %v236_v26  ;;  %vm245_vm2 = vweird.f32 %v405_v29 }
 0x10d   : > { %406 = vrsqrt.f32 %v237_v30  ;;  %vm246_vm4 = vmor %vm244_vm3, %vm245_vm2  ;;  %vm254_vm6 = vweird.f32 %v237_v30 }
 0x10e   : > { %v240_v32 = vmul.f32 %v405_v29, %v239_v31 }
 0x110   : > { %v241_v33 = vmul.f32 0.5, %v240_v32 }
 0x112   : > { %v242_v34 = vsub.f32 1.5, %v241_v33 }
 0x113   : > { %v407_v35 = vpop.eup %406 }
 0x114   : > { %v243_v36 = vmul.f32 %v405_v29, %v242_v34  ;;  %v249_v37 = vmul.f32 %v407_v35, %v237_v30  ;;  %vm255_vm5 = vweird.f32 %v407_v35 }
 0x115   : > { %vm256_vm7 = vmor %vm254_vm6, %vm255_vm5 }
 0x116   : > { %v250_v38 = vmul.f32 %v407_v35, %v249_v37  ;;  %v247_v39 = vsel %vm246_vm4, %v405_v29, %v243_v36 }
 0x117   : > { %v258_v42 = vmul.f32 %v247_v39, %v224_v14 }
 0x118   : > { %v251_v40 = vmul.f32 0.5, %v250_v38 }
 0x119   : > { %v263_v47 = vmul.f32 %v400_v43, %v258_v42 }
 0x11a   : > { %v252_v41 = vsub.f32 1.5, %v251_v40 }
 0x11b   : > { %v268_v50 = vadd.f32 %v401_v48, %v263_v47 }
 0x11c   : > { %v253_v44 = vmul.f32 %v407_v35, %v252_v41 }
 0x11e   : > { %v257_v45 = vsel %vm256_vm7, %v407_v35, %v253_v44 }
 0x11f   : > { %v259_v46 = vmul.f32 %v257_v45, %v225_v19 }
 0x121   : > { %v264_v49 = vmul.f32 %v400_v43, %v259_v46 }
 0x123   : > { %v269_v51 = vadd.f32 %v401_v48, %v264_v49 }
 0x125   : > { %v270_v52 = vpack.c.bf16 %v269_v51, %v268_v50 }
 0x127   : > { %382 = vmatmul.msk.bf16.vlgmr.msra.gmra.mxu0 %vm208_vm0, %v270_v52 }
 0x1a4   : > { %v299_v53 = vpop.f32.mrf.mxu0 }
 0x1a5   : > { %v304_v54 = vpack.c.bf16 %v299_v53, %v299_v53 }
 0x1a7   : > { %307 = vst.msk [vmem:[%s199_s6] sm:$0xf] %vm306_vm8, %v304_v54 }
 0x1ac   : > { %v301_v55 = vpop.f32.mrf.mxu0 }
 0x1ad   : > { %v305_v56 = vpack.c.bf16 %v301_v55, %v301_v55 }
 0x1af   : > { %308 = vst.msk [vmem:[%s199_s6 + $0x4] sm:$0xf] %vm306_vm8, %v305_v56 }
 0x1b0 PF: > { %s14_s15 = sadd.s32 1, %s414_s15  }
 0x1b1   : > { %p11_p4 = scmp.ge.s32.totalorder %s14_s15, 4  }
 0x1b3   :  { %13 = sbr.rel (!%p11_p4) target bundleno = 1 (0x1), region = 66 }

// kernel: _lambda_.55
= control target key start
LH: loop header
LB: loop body
LE: loop exit
PB: predicated region body
PF: predicated region fallthrough
CT: control target
= control target key end

     0   :  { %s419_s6 = smov 0   ;;  %s459_s0 = inlined_call_operand.vmem [shape: bf16[2,16,48], index: 0, kind: input, shape index: {}]   ;;  %s460_s1 = inlined_call_operand.vmem [shape: bf16[2,16,16], index: 1, kind: output, shape index: {}]  }
   0x1 LB: > { %s343_s7 = sadd.s32 4294967295, %s401_s6   ;;  %p347_p0 = scmp.ge.s32.totalorder %s401_s6, 1  ;;  %s401_s6 = sphi %s419_s6, %s11_s6  }
   0x2   : > { %p87_p1 = scmp.lt.s32.totalorder %s401_s6, 3 }
   0x4   : > { %p88_p2 = pnand %p347_p0, %p87_p1 }
   0x5   : > { %p107_p3 = scmp.lt.s32.totalorder (!%p88_p2), %s343_s7, 1  ;;  %s403_s12 = smov (!%p88_p2), 104  }
   0x6   : > { %91 = sbr.rel (%p88_p2) target bundleno = 795 (0x31b), region = 24  ;;  %s404_s13 = smov (!%p88_p2), 112  }
   0x7   : > { %s405_s14 = smov (!%p88_p2), 120   ;;  %s406_s15 = smov (!%p88_p2), 96  }
   0x8   : > { %s407_s16 = smov (!%p88_p2), 88   ;;  %s408_s17 = smov (!%p88_p2), 8  }
   0xb   : > { %s462_s7 = smov (!%p107_p3, %s343_s7), 1  ;;  %vm138_vm0 = vcmask 64512   ;;  %vm159_vm1 = vcmask 130048   ;;  %vm205_vm2 = vcmask 60416   ;;  %vm285_vm3 = vcmask 126016  }
   0xc   : > { %s362_s8 = sshll.u32 %s462_s7, 3 }
   0xd   : > { %s111_s11 = scalar_lea.vmem %s459_s0, %s362_s8  ;;  %s116_s20 = scalar_lea.vmem %s460_s1, %s362_s8 }
   0xe   : > { %v435_v0 = vld [vmem:[%s111_s11] sm:$0xff] }
   0xf   : > { %v118_v1 = vld [vmem:[%s111_s11] sm:$0xff]   ;;  %210 = vrot.lane.b32.xlu0 %v435_v0, %s403_s12  ;;  %136 = vrot.lane.b32.xlu1 %v435_v0, %s404_s13 }
  0x10   : > { %v120_v2 = vunpack.c.l.bf16 %v118_v1  ;;  %v121_v3 = vunpack.c.h.bf16 %v118_v1 }
  0x12   : > { %v122_v4 = vmul.f32 0.35355338, %v120_v2  ;;  %v123_v5 = vmul.f32 0.35355338, %v121_v3 }
  0x14   : > { %v124_v6 = vpack.c.bf16 %v122_v4, %v122_v4  ;;  %v125_v7 = vpack.c.bf16 %v123_v5, %v123_v5 }
  0x16   : > { %v128_v8 = vunpack.c.l.b16 %v124_v6  ;;  %v129_v9 = vunpack.c.l.b16 %v125_v7 }
  0x18   : > { %v130_v10 = vpack.c.b16 %v129_v9, %v128_v8 }
  0x1a   : > { %208 = vrot.lane.b32.xlu0 %v130_v10, %s405_s14 }
  0x81   : > { %v211_v11 = vpop.permute.xlu0 %210  ;;  %v137_v12 = vpop.permute.xlu1 %136 }
  0x82   : > { %v216_v13 = vsel %vm138_vm0, %v211_v11, 0  ;;  %v143_v14 = vsel %vm138_vm0, %v137_v12, 0 }
  0x83   : > { %225 = vmatpush.bf16.xpose.msra.mxu2 %v216_v13  ;;  %152 = vmatpush.bf16.xpose.msra.mxu0 %v143_v14 }
  0x8a   : > { %356 = vmatmul.msk.bf16.vlgmr.msra.gmra.mxu0 %vm138_vm0, %v130_v10 }
  0x8c   : > { %v209_v15 = vpop.permute.xlu0 %208 }
  0x8d   : > { %358 = vmatmul.msk.bf16.vlgmr.msra.gmra.mxu2 %vm138_vm0, %v209_v15 }
 0x107   : > { %v154_v16 = vpop.f32.mrf.mxu0 }
 0x108   : > { %v160_v23 = vsel %vm159_vm1, %v154_v16, -inf }
 0x10f   : > { %v156_v19 = vpop.f32.mrf.mxu0 }
 0x110   : > { %v227_v17 = vpop.f32.mrf.mxu2  ;;  %v163_v20 = vsel %vm159_vm1, %v156_v19, -inf }
 0x111   : > { %v232_v18 = vsel %vm159_vm1, %v227_v17, -inf  ;;  %164 = vmax.xlane.f32.xlu0 %v163_v20 }
 0x112   : > { %233 = vmax.xlane.f32.xlu1 %v232_v18 }
 0x118   : > { %v229_v21 = vpop.f32.mrf.mxu2 }
 0x119   : > { %v235_v22 = vsel %vm159_vm1, %v229_v21, -inf }
 0x11a   : > { %236 = vmax.xlane.f32.xlu2 %v235_v22 }
 0x122   : > { %161 = vmax.xlane.f32.xlu2 %v160_v23 }
 0x125   : > { %183 = vrot.lane.b32.xlu0 %v435_v0, %s406_s15 }
 0x184   : > { %v165_v39 = vpop.xlane.xlu0 %164 }
 0x185   : > { %v234_v24 = vpop.xlane.xlu1 %233  ;;  %v167_v40 = vsub.f32 %v156_v19, %v165_v39 }
 0x186   : > { %v238_v25 = vsub.f32 %v227_v17, %v234_v24 }
 0x187   : > { %v170_v41 = vmul.f32 1.442695, %v167_v40 }
 0x188   : > { %v240_v26 = vmul.f32 1.442695, %v238_v25 }
 0x18a   : > { %379 = vpow2.f32 %v240_v26 }
 0x18d   : > { %v237_v27 = vpop.xlane.xlu2 %236 }
 0x18e   : > { %v239_v28 = vsub.f32 %v229_v21, %v237_v27 }
 0x190   : > { %v380_v29 = vpop.eup %379  ;;  %v242_v30 = vmul.f32 1.442695, %v239_v28 }
 0x191   : > { %v244_v31 = vsel %vm159_vm1, %v380_v29, 0.0 }
 0x192   : > { %381 = vpow2.f32 %v242_v30  ;;  %245 = vadd.xlane.f32.xlu2 %v244_v31 }
 0x195   : > { %v162_v32 = vpop.xlane.xlu2 %161 }
 0x196   : > { %v166_v33 = vsub.f32 %v154_v16, %v162_v32 }
 0x197   : > { %v184_v52 = vpop.permute.xlu0 %183 }
 0x198   : > { %v382_v34 = vpop.eup %381  ;;  %v168_v35 = vmul.f32 1.442695, %v166_v33  ;;  %196 = vmatpush.bf16.msra.mxu1 %v184_v52 }
 0x199   : > { %v247_v36 = vsel %vm159_vm1, %v382_v34, 0.0 }
 0x19a   : > { %383 = vpow2.f32 %v168_v35  ;;  %248 = vadd.xlane.f32.xlu2 %v247_v36 }
 0x19b   : > { %385 = vpow2.f32 %v170_v41 }
 0x1a0   : > { %v384_v37 = vpop.eup %383 }
 0x1a1   : > { %v172_v38 = vsel %vm159_vm1, %v384_v37, 0.0  ;;  %v386_v42 = vpop.eup %385 }
 0x1a2   : > { %173 = vadd.xlane.f32.xlu1 %v172_v38  ;;  %v175_v43 = vsel %vm159_vm1, %v386_v42, 0.0 }
 0x1b2   : > { %255 = vrot.lane.b32.xlu2 %v435_v0, %s407_s16 }
 0x1db   : > { %176 = vadd.xlane.f32.xlu2 %v175_v43 }
 0x205   : > { %v246_v44 = vpop.xlane.xlu2 %245 }
 0x206   : > { %387 = vrcp.f32 %v246_v44 }
 0x20c   : > { %v388_v46 = vpop.eup %387 }
 0x20d   : > { %v249_v45 = vpop.xlane.xlu2 %248  ;;  %v252_v49 = vmul.f32 %v388_v46, %v380_v29 }
 0x20e   : > { %389 = vrcp.f32 %v249_v45 }
 0x214   : > { %v390_v47 = vpop.eup %389 }
 0x215   : > { %v256_v48 = vpop.permute.xlu2 %255  ;;  %v253_v50 = vmul.f32 %v390_v47, %v382_v34  ;;  %v174_v53 = vpop.xlane.xlu1 %173 }
 0x216   : > { %268 = vmatpush.bf16.msra.mxu3 %v256_v48  ;;  %391 = vrcp.f32 %v174_v53 }
 0x217   : > { %v254_v51 = vpack.c.bf16 %v253_v50, %v252_v49 }
 0x219   : > { %359 = vmatmul.msk.bf16.vlgmr.msra.gmra.mxu3 %vm159_vm1, %v254_v51 }
 0x21c   : > { %v392_v55 = vpop.eup %391 }
 0x21d   : > { %v180_v57 = vmul.f32 %v392_v55, %v384_v37 }
 0x24e   : > { %v177_v54 = vpop.xlane.xlu2 %176 }
 0x24f   : > { %393 = vrcp.f32 %v177_v54 }
 0x255   : > { %v394_v56 = vpop.eup %393 }
 0x256   : > { %v181_v58 = vmul.f32 %v394_v56, %v386_v42 }
 0x258   : > { %v182_v59 = vpack.c.bf16 %v181_v58, %v180_v57 }
 0x25a   : > { %357 = vmatmul.msk.bf16.vlgmr.msra.gmra.mxu1 %vm159_vm1, %v182_v59 }
 0x29c   : > { %v270_v60 = vpop.f32.mrf.mxu3 }
 0x29d   : > { %v275_v61 = vpack.c.bf16 %v270_v60, %v270_v60 }
 0x29f   : > { %279 = vrot.lane.b32.xlu1 %v275_v61, %s408_s17 }
 0x2a4   : > { %v272_v62 = vpop.f32.mrf.mxu3 }
 0x2a5   : > { %v276_v63 = vpack.c.bf16 %v272_v62, %v272_v62 }
 0x2a7   : > { %281 = vrot.lane.b32.xlu0 %v276_v63, %s408_s17 }
 0x2d7   : > { %v198_v0 = vpop.f32.mrf.mxu1 }
 0x2d8   : > { %v203_v1 = vpack.c.bf16 %v198_v0, %v198_v0 }
 0x2da   : > { %206 = vst.msk [vmem:[%s116_s20] sm:$0xf] %vm205_vm2, %v203_v1 }
 0x2df   : > { %v200_v2 = vpop.f32.mrf.mxu1 }
 0x2e0   : > { %v204_v3 = vpack.c.bf16 %v200_v2, %v200_v2 }
 0x2e2   : > { %207 = vst.msk [vmem:[%s116_s20 + $0x4] sm:$0xf] %vm205_vm2, %v204_v3 }
 0x311   : > { %v280_v4 = vpop.permute.xlu1 %279 }
 0x312   : > { %286 = vst.msk [vmem:[%s116_s20] sm:$0xf] %vm285_vm3, %v280_v4 }
 0x319   : > { %v282_v5 = vpop.permute.xlu0 %281 }
 0x31a   : > { %287 = vst.msk [vmem:[%s116_s20 + $0x4] sm:$0xf] %vm285_vm3, %v282_v5 }
 0x31b PF: > { %s11_s6 = sadd.s32 1, %s401_s6  }
 0x31c   : > { %p8_p4 = scmp.ge.s32.totalorder %s11_s6, 4  }
 0x31e   :  { %10 = sbr.rel (!%p8_p4) target bundleno = 1 (0x1), region = 54 }

// kernel: _lambda_.59
= control target key start
LH: loop header
LB: loop body
LE: loop exit
PB: predicated region body
PF: predicated region fallthrough
CT: control target
= control target key end

     0   :  { %vm22_vm0 = vcmask 254976   ;;  %v119_v3 = vmov 32.0   ;;  %vm77_vm5 = vcmask 261120   ;;  %vm95_vm6 = vcmask 122880   ;;  %s165_s0 = inlined_call_operand.vmem [shape: bf16[2,32], index: 0, kind: input, shape index: {}]   ;;  %s166_s1 = inlined_call_operand.vmem [shape: f32[1,32], index: 1, kind: input, shape index: {}]   ;;  %s167_s2 = inlined_call_operand.vmem [shape: f32[1,32], index: 2, kind: input, shape index: {}]   ;;  %s168_s3 = inlined_call_operand.vmem [shape: bf16[32,16], index: 3, kind: input, shape index: {}]   ;;  %s169_s4 = inlined_call_operand.vmem [shape: bf16[2,16], index: 4, kind: output, shape index: {}]  }
   0x1   :  { %v18_v0 = vld [vmem:[%s165_s0] sm:$0x1]  ;;  %115 = vrcp.f32 %v119_v3  ;;  %v111_v15 = vld [vmem:[%s168_s3 + $0x8] sm:$0xff] }
   0x2   :  { %v19_v1 = vunpack.c.l.bf16 %v18_v0  ;;  %87 = vmatpush.bf16.msra.mxu0 %v111_v15  ;;  %v110_v16 = vld [vmem:[%s168_s3] sm:$0xff] }
   0x3   :  { %v113_v26 = vld [vmem:[%s166_s1] ss:$0 sm:$0xff] }
   0x4   :  { %v23_v2 = vsel %vm22_vm0, %v19_v1, 0.0  ;;  %v114_v29 = vld [vmem:[%s167_s2] ss:$0 sm:$0xff] }
   0x5   :  { %24 = vadd.xlane.f32.xlu0 %v23_v2 }
   0x6   :  { %88 = vmatpush.bf16.msra.mxu0 %v110_v16 }
   0x7   :  { %v116_v4 = vpop.eup %115 }
   0x8   :  { %v27_v5 = vmul.f32 32.0, %v116_v4  ;;  %vm31_vm1 = vweird.f32 %v116_v4 }
   0xa   :  { %v28_v6 = vsub.f32 1.0, %v27_v5 }
   0xc   :  { %v29_v7 = vmul.f32 %v116_v4, %v28_v6 }
   0xe   :  { %v30_v8 = vadd.f32 %v116_v4, %v29_v7 }
  0x10   :  { %v32_v9 = vsel %vm31_vm1, %v116_v4, %v30_v8 }
  0x78   :  { %v25_v10 = vpop.xlane.xlu0 %24 }
  0x79   :  { %v33_v11 = vmul.f32 %v32_v9, %v25_v10 }
  0x7b   :  { %v34_v12 = vsub.f32 %v19_v1, %v33_v11 }
  0x7d   :  { %v35_v13 = vmul.f32 %v34_v12, %v34_v12 }
  0x7f   :  { %v36_v14 = vsel %vm22_vm0, %v35_v13, 0.0 }
  0x80   :  { %37 = vadd.xlane.f32.xlu0 %v36_v14 }
  0xf3   :  { %v38_v17 = vpop.xlane.xlu0 %37 }
  0xf4   :  { %v39_v18 = vmul.f32 %v38_v17, %v32_v9 }
  0xf6   :  { %v40_v19 = vadd.f32 1e-05, %v39_v18 }
  0xf8   :  { %117 = vrsqrt.f32 %v40_v19  ;;  %vm47_vm3 = vweird.f32 %v40_v19 }
  0xfe   :  { %v118_v20 = vpop.eup %117 }
  0xff   :  { %v42_v21 = vmul.f32 %v118_v20, %v40_v19  ;;  %vm48_vm2 = vweird.f32 %v118_v20 }
 0x100   :  { %vm49_vm4 = vmor %vm47_vm3, %vm48_vm2 }
 0x101   :  { %v43_v22 = vmul.f32 %v118_v20, %v42_v21 }
 0x103   :  { %v44_v23 = vmul.f32 0.5, %v43_v22 }
 0x105   :  { %v45_v24 = vsub.f32 1.5, %v44_v23 }
 0x107   :  { %v46_v25 = vmul.f32 %v118_v20, %v45_v24 }
 0x109   :  { %v50_v27 = vsel %vm49_vm4, %v118_v20, %v46_v25 }
 0x10a   :  { %v51_v28 = vmul.f32 %v50_v27, %v34_v12 }
 0x10c   :  { %v55_v30 = vmul.f32 %v113_v26, %v51_v28 }
 0x10e   :  { %v59_v31 = vadd.f32 %v114_v29, %v55_v30 }
 0x110   :  { %v60_v32 = vpack.c.bf16 %v59_v31, %v59_v31 }
 0x112   :  { %109 = vmatmul.msk.bf16.vlgmr.msra.gmra.mxu0 %vm77_vm5, %v60_v32 }
 0x18f   :  { %v90_v33 = vpop.f32.mrf.mxu0 }
 0x190   :  { %v94_v34 = vpack.c.bf16 %v90_v33, %v90_v33 }
 0x192   :  { %96 = vst.msk [vmem:[%s169_s4] sm:$0x1] %vm95_vm6, %v94_v34 }
 0x197   :  { %v92_v35 = vpop.f32.mrf.mxu0 }

// kernel: _lambda_.61
= control target key start
LH: loop header
LB: loop body
LE: loop exit
PB: predicated region body
PF: predicated region fallthrough
CT: control target
= control target key end

     0   :  { %s421_s9 = smov 0   ;;  %s452_s0 = inlined_call_operand.vmem [shape: bf16[2,1,16], index: 0, kind: input, shape index: {}]   ;;  %s453_s1 = inlined_call_operand.vmem [shape: bf16[2,16,32], index: 1, kind: input, shape index: {}]   ;;  %s454_s2 = inlined_call_operand.vmem [shape: bf16[2,1,16], index: 2, kind: output, shape index: {}]  }
   0x1 LB: > { %s355_s10 = sadd.s32 4294967295, %s400_s9   ;;  %p359_p0 = scmp.ge.s32.totalorder %s400_s9, 1  ;;  %s400_s9 = sphi %s421_s9, %s12_s9  }
   0x2   : > { %p120_p1 = scmp.lt.s32.totalorder %s400_s9, 3 }
   0x4   : > { %p121_p2 = pnand %p359_p0, %p120_p1 }
   0x5   : > { %p143_p3 = scmp.lt.s32.totalorder (!%p121_p2), %s355_s10, 1  ;;  %s402_s18 = smov (!%p121_p2), 120  }
   0x6   : > { %124 = sbr.rel (%p121_p2) target bundleno = 757 (0x2f5), region = 28  ;;  %s403_s19 = smov (!%p121_p2), 112  }
   0x7   : > { %s404_s20 = smov (!%p121_p2), 104   ;;  %s405_s24 = smov (!%p121_p2), 8  }
   0xb   : > { %s456_s10 = smov (!%p143_p3, %s355_s10), 1  ;;  %vm166_vm0 = vcmask 64512   ;;  %vm186_vm1 = vcmask 122880   ;;  %vm202_vm2 = vcmask 130048   ;;  %vm220_vm3 = vcmask 57344  }
   0xc   : > { %s372_s11 = sshll.u32 %s456_s10, 3  ;;  %s145_s14 = scalar_lea.vmem %s452_s0, %s456_s10  ;;  %vm221_vm4 = vsmask.f32 256  ;;  %vm286_vm6 = vcmask 1040384   ;;  %vm294_vm7 = vcmask 122944  }
   0xd   : > { %s150_s17 = scalar_lea.vmem %s453_s1, %s372_s11  ;;  %v155_v0 = vld [vmem:[%s145_s14] sm:$0x1]  ;;  %s153_s23 = scalar_lea.vmem %s454_s2, %s456_s10  ;;  %vm222_vm5 = vmand %vm220_vm3, %vm221_vm4 }
   0xe   : > { %v373_v1 = vld [vmem:[%s150_s17] sm:$0xff]  ;;  %v158_v2 = vunpack.c.l.bf16 %v155_v0  ;;  %vm295_vm8 = vmand %vm294_vm7, %vm221_vm4 }
   0xf   : > { %231 = vrot.lane.b32.xlu0 %v373_v1, %s402_s18  ;;  %v171_v7 = vsel %vm166_vm0, %v373_v1, 0  ;;  %v223_v40 = vld [vmem:[%s153_s23] sm:$0x1] }
  0x10   : > { %v159_v3 = vmul.f32 0.35355338, %v158_v2  ;;  %180 = vmatpush.bf16.xpose.msra.mxu0 %v171_v7 }
  0x12   : > { %v160_v4 = vpack.c.bf16 %v159_v3, %v159_v3 }
  0x14   : > { %v227_v5 = vunpack.c.l.b16 %v160_v4 }
  0x16   : > { %v228_v6 = vpack.c.b16 %v227_v5, %v227_v5 }
  0x17   : > { %366 = vmatmul.msk.bf16.vlgmr.msra.gmra.mxu0 %vm166_vm0, %v160_v4 }
  0x18   : > { %229 = vrot.lane.b32.xlu0 %v228_v6, %s402_s18 }
  0x81   : > { %v232_v8 = vpop.permute.xlu0 %231 }
  0x82   : > { %v237_v9 = vsel %vm166_vm0, %v232_v8, 0 }
  0x83   : > { %246 = vmatpush.bf16.xpose.msra.mxu2 %v237_v9 }
  0x8a   : > { %v230_v10 = vpop.permute.xlu0 %229 }
  0x8b   : > { %368 = vmatmul.msk.bf16.vlgmr.msra.gmra.mxu2 %vm166_vm0, %v230_v10 }
  0x94   : > { %v182_v11 = vpop.f32.mrf.mxu0 }
  0x95   : > { %v187_v15 = vsel %vm186_vm1, %v182_v11, -inf }
  0x9c   : > { %v184_v12 = vpop.f32.mrf.mxu0 }
 0x10e   : > { %v248_v13 = vpop.f32.mrf.mxu2 }
 0x10f   : > { %v252_v14 = vsel %vm186_vm1, %v248_v13, -inf }
 0x110   : > { %253 = vmax.xlane.f32.xlu1 %v252_v14 }
 0x116   : > { %v250_v16 = vpop.f32.mrf.mxu2 }
 0x118   : > { %188 = vmax.xlane.f32.xlu1 %v187_v15 }
 0x131   : > { %199 = vrot.lane.b32.xlu1 %v373_v1, %s403_s19 }
 0x183   : > { %v254_v17 = vpop.xlane.xlu1 %253 }
 0x184   : > { %v255_v18 = vsub.f32 %v248_v13, %v254_v17 }
 0x186   : > { %v256_v19 = vmul.f32 1.442695, %v255_v18 }
 0x188   : > { %386 = vpow2.f32 %v256_v19 }
 0x18b   : > { %v189_v20 = vpop.xlane.xlu1 %188 }
 0x18c   : > { %v190_v21 = vsub.f32 %v182_v11, %v189_v20 }
 0x18e   : > { %v387_v22 = vpop.eup %386  ;;  %v191_v23 = vmul.f32 1.442695, %v190_v21 }
 0x18f   : > { %v258_v24 = vsel %vm186_vm1, %v387_v22, 0.0 }
 0x190   : > { %388 = vpow2.f32 %v191_v23  ;;  %259 = vadd.xlane.f32.xlu2 %v258_v24 }
 0x196   : > { %v389_v25 = vpop.eup %388 }
 0x197   : > { %v193_v26 = vsel %vm186_vm1, %v389_v25, 0.0 }
 0x198   : > { %194 = vadd.xlane.f32.xlu0 %v193_v26 }
 0x1a3   : > { %v200_v27 = vpop.permute.xlu1 %199 }
 0x1a4   : > { %213 = vmatpush.bf16.msra.mxu1 %v200_v27 }
 0x1a8   : > { %264 = vrot.lane.b32.xlu2 %v373_v1, %s404_s20 }
 0x203   : > { %v260_v28 = vpop.xlane.xlu2 %259 }
 0x204   : > { %390 = vrcp.f32 %v260_v28 }
 0x20a   : > { %v391_v29 = vpop.eup %390 }
 0x20b   : > { %v265_v30 = vpop.permute.xlu2 %264  ;;  %v195_v31 = vpop.xlane.xlu0 %194  ;;  %v262_v32 = vmul.f32 %v391_v29, %v387_v22 }
 0x20c   : > { %392 = vrcp.f32 %v195_v31  ;;  %277 = vmatpush.bf16.msra.mxu3 %v265_v30 }
 0x20d   : > { %v263_v33 = vpack.c.bf16 %v262_v32, %v262_v32 }
 0x20f   : > { %369 = vmatmul.msk.bf16.vlgmr.msra.gmra.mxu3 %vm202_vm2, %v263_v33 }
 0x212   : > { %v393_v34 = vpop.eup %392 }
 0x213   : > { %v197_v35 = vmul.f32 %v393_v34, %v389_v25 }
 0x215   : > { %v198_v36 = vpack.c.bf16 %v197_v35, %v197_v35 }
 0x217   : > { %367 = vmatmul.msk.bf16.vlgmr.msra.gmra.mxu1 %vm202_vm2, %v198_v36 }
 0x292   : > { %v279_v37 = vpop.f32.mrf.mxu3 }
 0x293   : > { %v283_v38 = vpack.c.bf16 %v279_v37, %v279_v37 }
 0x294   : > { %v215_v39 = vpop.f32.mrf.mxu1 }
 0x295   : > { %v285_v41 = vrot.slane %v283_v38, 3  ;;  %v219_v42 = vpack.c.bf16 %v215_v39, %v215_v39 }
 0x297   : > { %v224_v43 = vsel %vm222_vm5, %v219_v42, %v223_v40  ;;  %v289_v44 = vsel %vm286_vm6, %v283_v38, %v285_v41 }
 0x298   : > { %225 = vst [vmem:[%s153_s23] sm:$0x1] %v224_v43  ;;  %291 = vrot.lane.b32.xlu2 %v289_v44, %s405_s24 }
 0x29a   : > { %v281_v45 = vpop.f32.mrf.mxu3 }
 0x29c   : > { %v217_v46 = vpop.f32.mrf.mxu1 }
 0x29f   : > { %v296_v48 = vld [vmem:[%s153_s23] sm:$0x1] }
 0x2f2   : > { %v292_v47 = vpop.permute.xlu2 %291 }
 0x2f3   : > { %v297_v49 = vsel %vm295_vm8, %v292_v47, %v296_v48 }
 0x2f4   : > { %298 = vst [vmem:[%s153_s23] sm:$0x1] %v297_v49 }
 0x2f5 PF: > { %s12_s9 = sadd.s32 1, %s400_s9  }
 0x2f6   : > { %p9_p4 = scmp.ge.s32.totalorder %s12_s9, 4  }
 0x2f8   :  { %11 = sbr.rel (!%p9_p4) target bundleno = 1 (0x1), region = 61 }

// kernel: _lambda_.62
= control target key start
LH: loop header
LB: loop body
LE: loop exit
PB: predicated region body
PF: predicated region fallthrough
CT: control target
= control target key end

     0   :  { %vm31_vm0 = vcmask 130048   ;;  %vm52_vm1 = vcmask 253952   ;;  %s105_s1 = inlined_call_operand.vmem [shape: bf16[16,32], index: 1, kind: input, shape index: {}]   ;;  %s106_s0 = inlined_call_operand.vmem [shape: bf16[2,16], index: 0, kind: input, shape index: {}]   ;;  %s107_s2 = inlined_call_operand.vmem [shape: f32[1,32], index: 2, kind: input, shape index: {}]   ;;  %s108_s3 = inlined_call_operand.vmem [shape: bf16[2,32], index: 3, kind: input, shape index: {}]   ;;  %s109_s4 = inlined_call_operand.vmem [shape: bf16[2,32], index: 4, kind: output, shape index: {}]  }
   0x1   :  { %v63_v0 = vld [vmem:[%s105_s1] sm:$0xff] }
   0x2   :  { %42 = vmatpush.bf16.msra.mxu0 %v63_v0  ;;  %v18_v1 = vld [vmem:[%s106_s0] sm:$0x1] }
   0x3   :  { %v48_v2 = vld [vmem:[%s108_s3] sm:$0x1] }
   0x4   :  { %v64_v3 = vld [vmem:[%s107_s2] ss:$0 sm:$0xff]  ;;  %v49_v4 = vunpack.c.l.bf16 %v48_v2 }
   0x5   :  { %62 = vmatmul.msk.bf16.vlgmr.msra.gmra.mxu0 %vm31_vm0, %v18_v1 }
  0x82   :  { %v44_v5 = vpop.f32.mrf.mxu0 }
  0x83   :  { %v45_v6 = vadd.f32 %v64_v3, %v44_v5 }
  0x85   :  { %v50_v7 = vadd.f32 %v49_v4, %v45_v6 }
  0x87   :  { %v51_v8 = vpack.c.bf16 %v50_v7, %v50_v7 }
  0x89   :  { %53 = vst.msk [vmem:[%s109_s4] sm:$0x1] %vm52_vm1, %v51_v8 }
  0x8a   :  { %v46_v9 = vpop.f32.mrf.mxu0 }

// kernel: _lambda_.63
= control target key start
LH: loop header
LB: loop body
LE: loop exit
PB: predicated region body
PF: predicated region fallthrough
CT: control target
= control target key end

     0   :  { %vm25_vm0 = vcmask 254976   ;;  %v137_v3 = vmov 32.0   ;;  %vm84_vm5 = vcmask 261120   ;;  %s191_s0 = inlined_call_operand.vmem [shape: bf16[2,32], index: 0, kind: input, shape index: {}]   ;;  %s192_s1 = inlined_call_operand.vmem [shape: f32[1,32], index: 1, kind: input, shape index: {}]   ;;  %s193_s2 = inlined_call_operand.vmem [shape: f32[1,32], index: 2, kind: input, shape index: {}]   ;;  %s194_s4 = inlined_call_operand.vmem [shape: f32[1,128], index: 4, kind: input, shape index: {}]   ;;  %s195_s3 = inlined_call_operand.vmem [shape: bf16[32,128], index: 3, kind: input, shape index: {}]   ;;  %s196_s5 = inlined_call_operand.vmem [shape: bf16[2,128], index: 5, kind: output, shape index: {}]  }
   0x1   :  { %v21_v0 = vld [vmem:[%s191_s0] sm:$0x1]  ;;  %131 = vrcp.f32 %v137_v3  ;;  %v126_v15 = vld [vmem:[%s195_s3 + $0x8] sm:$0xff] }
   0x2   :  { %v22_v1 = vunpack.c.l.bf16 %v21_v0  ;;  %94 = vmatpush.bf16.msra.mxu0 %v126_v15  ;;  %v125_v16 = vld [vmem:[%s195_s3] sm:$0xff] }
   0x3   :  { %v128_v26 = vld [vmem:[%s192_s1] ss:$0 sm:$0xff] }
   0x4   :  { %v26_v2 = vsel %vm25_vm0, %v22_v1, 0.0  ;;  %v129_v29 = vld [vmem:[%s193_s2] ss:$0 sm:$0xff] }
   0x5   :  { %27 = vadd.xlane.f32.xlu0 %v26_v2  ;;  %v130_v33 = vld [vmem:[%s194_s4] ss:$0 sm:$0xff] }
   0x6   :  { %95 = vmatpush.bf16.msra.mxu0 %v125_v16 }
   0x7   :  { %v132_v4 = vpop.eup %131 }
   0x8   :  { %v30_v5 = vmul.f32 32.0, %v132_v4  ;;  %vm34_vm1 = vweird.f32 %v132_v4 }
   0xa   :  { %v31_v6 = vsub.f32 1.0, %v30_v5 }
   0xc   :  { %v32_v7 = vmul.f32 %v132_v4, %v31_v6 }
   0xe   :  { %v33_v8 = vadd.f32 %v132_v4, %v32_v7 }
  0x10   :  { %v35_v9 = vsel %vm34_vm1, %v132_v4, %v33_v8 }
  0x78   :  { %v28_v10 = vpop.xlane.xlu0 %27 }
  0x79   :  { %v36_v11 = vmul.f32 %v35_v9, %v28_v10 }
  0x7b   :  { %v37_v12 = vsub.f32 %v22_v1, %v36_v11 }
  0x7d   :  { %v38_v13 = vmul.f32 %v37_v12, %v37_v12 }
  0x7f   :  { %v39_v14 = vsel %vm25_vm0, %v38_v13, 0.0 }
  0x80   :  { %40 = vadd.xlane.f32.xlu0 %v39_v14 }
  0xf3   :  { %v41_v17 = vpop.xlane.xlu0 %40 }
  0xf4   :  { %v42_v18 = vmul.f32 %v41_v17, %v35_v9 }
  0xf6   :  { %v43_v19 = vadd.f32 1e-05, %v42_v18 }
  0xf8   :  { %133 = vrsqrt.f32 %v43_v19  ;;  %vm50_vm3 = vweird.f32 %v43_v19 }
  0xfe   :  { %v134_v20 = vpop.eup %133 }
  0xff   :  { %v45_v21 = vmul.f32 %v134_v20, %v43_v19  ;;  %vm51_vm2 = vweird.f32 %v134_v20 }
 0x100   :  { %vm52_vm4 = vmor %vm50_vm3, %vm51_vm2 }
 0x101   :  { %v46_v22 = vmul.f32 %v134_v20, %v45_v21 }
 0x103   :  { %v47_v23 = vmul.f32 0.5, %v46_v22 }
 0x105   :  { %v48_v24 = vsub.f32 1.5, %v47_v23 }
 0x107   :  { %v49_v25 = vmul.f32 %v134_v20, %v48_v24 }
 0x109   :  { %v53_v27 = vsel %vm52_vm4, %v134_v20, %v49_v25 }
 0x10a   :  { %v54_v28 = vmul.f32 %v53_v27, %v37_v12 }
 0x10c   :  { %v58_v30 = vmul.f32 %v128_v26, %v54_v28 }
 0x10e   :  { %v62_v31 = vadd.f32 %v129_v29, %v58_v30 }
 0x110   :  { %v63_v32 = vpack.c.bf16 %v62_v31, %v62_v31 }
 0x112   :  { %124 = vmatmul.msk.bf16.vlgmr.msra.gmra.mxu0 %vm84_vm5, %v63_v32 }
 0x18f   :  { %v97_v34 = vpop.f32.mrf.mxu0 }
 0x190   :  { %v98_v35 = vadd.f32 %v130_v33, %v97_v34 }
 0x192   :  { %v102_v36 = vmul.f32 0.044715, %v98_v35  ;;  %v101_v43 = vmul.f32 0.5, %v98_v35 }
 0x194   :  { %v103_v37 = vmul.f32 %v102_v36, %v98_v35 }
 0x196   :  { %v104_v38 = vmul.f32 %v103_v37, %v98_v35 }
 0x197   :  { %v99_v39 = vpop.f32.mrf.mxu0 }
 0x198   :  { %v105_v40 = vadd.f32 %v104_v38, %v98_v35 }
 0x19a   :  { %v106_v41 = vmul.f32 0.7978846, %v105_v40 }
 0x19c   :  { %135 = vtanh.f32 %v106_v41 }
 0x1a2   :  { %v136_v42 = vpop.eup %135 }
 0x1a3   :  { %v108_v44 = vadd.f32 1.0, %v136_v42 }
 0x1a5   :  { %v109_v45 = vmul.f32 %v108_v44, %v101_v43 }
 0x1a7   :  { %v110_v46 = vpack.c.bf16 %v109_v45, %v109_v45 }
 0x1a9   :  { %111 = vst [vmem:[%s196_s5] sm:$0x1] %v110_v46 }

// kernel: _lambda_.64
= control target key start
LH: loop header
LB: loop body
LE: loop exit
PB: predicated region body
PF: predicated region fallthrough
CT: control target
= control target key end

     0   :  { %vm103_vm0 = vcmask 253952   ;;  %s211_s1 = inlined_call_operand.vmem [shape: bf16[128,32], index: 1, kind: input, shape index: {}]   ;;  %s212_s2 = inlined_call_operand.vmem [shape: f32[1,32], index: 2, kind: input, shape index: {}]   ;;  %s213_s0 = inlined_call_operand.vmem [shape: bf16[2,128], index: 0, kind: input, shape index: {}]   ;;  %s214_s3 = inlined_call_operand.vmem [shape: bf16[2,32], index: 3, kind: input, shape index: {}]   ;;  %s215_s4 = inlined_call_operand.vmem [shape: bf16[2,32], index: 4, kind: output, shape index: {}]  }
   0x1   :  { %v148_v0 = vld [vmem:[%s211_s1 + $0x38] sm:$0xff]  ;;  %v147_v1 = vld [vmem:[%s211_s1 + $0x30] sm:$0xff]  ;;  %v146_v2 = vld [vmem:[%s211_s1 + $0x28] sm:$0xff] }
   0x2   :  { %86 = vmatpush.bf16.msra.mxu0 %v148_v0  ;;  %v145_v3 = vld [vmem:[%s211_s1 + $0x20] sm:$0xff]  ;;  %v144_v4 = vld [vmem:[%s211_s1 + $0x18] sm:$0xff]  ;;  %v143_v5 = vld [vmem:[%s211_s1 + $0x10] sm:$0xff] }
   0x3   :  { %v142_v6 = vld [vmem:[%s211_s1 + $0x8] sm:$0xff]  ;;  %v141_v7 = vld [vmem:[%s211_s1] sm:$0xff] }
   0x4   :  { %v17_v8 = vld [vmem:[%s213_s0] sm:$0x1] }
   0x5   :  { %v99_v9 = vld [vmem:[%s214_s3] sm:$0x1] }
   0x6   :  { %87 = vmatpush.bf16.msra.mxu0 %v147_v1  ;;  %v149_v10 = vld [vmem:[%s212_s2] ss:$0 sm:$0xff]  ;;  %v100_v11 = vunpack.c.l.bf16 %v99_v9 }
   0xa   :  { %88 = vmatpush.bf16.msra.mxu0 %v146_v2 }
   0xe   :  { %89 = vmatpush.bf16.msra.mxu0 %v145_v3 }
  0x12   :  { %90 = vmatpush.bf16.msra.mxu0 %v144_v4 }
  0x16   :  { %91 = vmatpush.bf16.msra.mxu0 %v143_v5 }
  0x1a   :  { %92 = vmatpush.bf16.msra.mxu0 %v142_v6 }
  0x1e   :  { %93 = vmatpush.bf16.msra.mxu0 %v141_v7 }
  0x21   :  { %94 = vmatmul.bf16.vlgmr.msra.gmra.mxu0 %v17_v8 }
  0x9e   :  { %v95_v12 = vpop.f32.mrf.mxu0 }
  0x9f   :  { %v96_v13 = vadd.f32 %v149_v10, %v95_v12 }
  0xa1   :  { %v101_v14 = vadd.f32 %v100_v11, %v96_v13 }
  0xa3   :  { %v102_v15 = vpack.c.bf16 %v101_v14, %v101_v14 }
  0xa5   :  { %104 = vst.msk [vmem:[%s215_s4] sm:$0x1] %vm103_vm0, %v102_v15 }
  0xa6   :  { %v97_v16 = vpop.f32.mrf.mxu0 }

// kernel: _lambda_.93
= control target key start
LH: loop header
LB: loop body
LE: loop exit
PB: predicated region body
PF: predicated region fallthrough
CT: control target
= control target key end

     0   :  { %vm25_vm0 = vcmask 254976   ;;  %v125_v3 = vmov 32.0   ;;  %vm84_vm5 = vcmask 261120   ;;  %s179_s0 = inlined_call_operand.vmem [shape: bf16[2,32], index: 0, kind: input, shape index: {}]   ;;  %s180_s1 = inlined_call_operand.vmem [shape: f32[1,32], index: 1, kind: input, shape index: {}]   ;;  %s181_s2 = inlined_call_operand.vmem [shape: f32[1,32], index: 2, kind: input, shape index: {}]   ;;  %s182_s4 = inlined_call_operand.vmem [shape: f32[1,128], index: 4, kind: input, shape index: {}]   ;;  %s183_s3 = inlined_call_operand.vmem [shape: bf16[32,128], index: 3, kind: input, shape index: {}]   ;;  %s184_s5 = inlined_call_operand.vmem [shape: f32[2,128], index: 5, kind: output, shape index: {}]  }
   0x1   :  { %v21_v0 = vld [vmem:[%s179_s0] sm:$0x1]  ;;  %121 = vrcp.f32 %v125_v3  ;;  %v116_v15 = vld [vmem:[%s183_s3 + $0x8] sm:$0xff] }
   0x2   :  { %v22_v1 = vunpack.c.l.bf16 %v21_v0  ;;  %94 = vmatpush.bf16.msra.mxu0 %v116_v15  ;;  %v115_v16 = vld [vmem:[%s183_s3] sm:$0xff] }
   0x3   :  { %v118_v26 = vld [vmem:[%s180_s1] ss:$0 sm:$0xff] }
   0x4   :  { %v26_v2 = vsel %vm25_vm0, %v22_v1, 0.0  ;;  %v119_v29 = vld [vmem:[%s181_s2] ss:$0 sm:$0xff] }
   0x5   :  { %27 = vadd.xlane.f32.xlu0 %v26_v2  ;;  %v120_v33 = vld [vmem:[%s182_s4] ss:$0 sm:$0xff] }
   0x6   :  { %95 = vmatpush.bf16.msra.mxu0 %v115_v16 }
   0x7   :  { %v122_v4 = vpop.eup %121 }
   0x8   :  { %v30_v5 = vmul.f32 32.0, %v122_v4  ;;  %vm34_vm1 = vweird.f32 %v122_v4 }
   0xa   :  { %v31_v6 = vsub.f32 1.0, %v30_v5 }
   0xc   :  { %v32_v7 = vmul.f32 %v122_v4, %v31_v6 }
   0xe   :  { %v33_v8 = vadd.f32 %v122_v4, %v32_v7 }
  0x10   :  { %v35_v9 = vsel %vm34_vm1, %v122_v4, %v33_v8 }
  0x78   :  { %v28_v10 = vpop.xlane.xlu0 %27 }
  0x79   :  { %v36_v11 = vmul.f32 %v35_v9, %v28_v10 }
  0x7b   :  { %v37_v12 = vsub.f32 %v22_v1, %v36_v11 }
  0x7d   :  { %v38_v13 = vmul.f32 %v37_v12, %v37_v12 }
  0x7f   :  { %v39_v14 = vsel %vm25_vm0, %v38_v13, 0.0 }
  0x80   :  { %40 = vadd.xlane.f32.xlu0 %v39_v14 }
  0xf3   :  { %v41_v17 = vpop.xlane.xlu0 %40 }
  0xf4   :  { %v42_v18 = vmul.f32 %v41_v17, %v35_v9 }
  0xf6   :  { %v43_v19 = vadd.f32 1e-05, %v42_v18 }
  0xf8   :  { %123 = vrsqrt.f32 %v43_v19  ;;  %vm50_vm3 = vweird.f32 %v43_v19 }
  0xfe   :  { %v124_v20 = vpop.eup %123 }
  0xff   :  { %v45_v21 = vmul.f32 %v124_v20, %v43_v19  ;;  %vm51_vm2 = vweird.f32 %v124_v20 }
 0x100   :  { %vm52_vm4 = vmor %vm50_vm3, %vm51_vm2 }
 0x101   :  { %v46_v22 = vmul.f32 %v124_v20, %v45_v21 }
 0x103   :  { %v47_v23 = vmul.f32 0.5, %v46_v22 }
 0x105   :  { %v48_v24 = vsub.f32 1.5, %v47_v23 }
 0x107   :  { %v49_v25 = vmul.f32 %v124_v20, %v48_v24 }
 0x109   :  { %v53_v27 = vsel %vm52_vm4, %v124_v20, %v49_v25 }
 0x10a   :  { %v54_v28 = vmul.f32 %v53_v27, %v37_v12 }
 0x10c   :  { %v58_v30 = vmul.f32 %v118_v26, %v54_v28 }
 0x10e   :  { %v62_v31 = vadd.f32 %v119_v29, %v58_v30 }
 0x110   :  { %v63_v32 = vpack.c.bf16 %v62_v31, %v62_v31 }
 0x112   :  { %114 = vmatmul.msk.bf16.vlgmr.msra.gmra.mxu0 %vm84_vm5, %v63_v32 }
 0x18f   :  { %v97_v34 = vpop.f32.mrf.mxu0 }
 0x190   :  { %v98_v35 = vadd.f32 %v120_v33, %v97_v34 }
 0x192   :  { %101 = vst [vmem:[%s184_s5] sm:$0x3] %v98_v35 }
 0x197   :  { %v99_v36 = vpop.f32.mrf.mxu0 }

</bundles_post_ra>
